<compile_context>
chip_gen: v5e
topology: v5e:2x2
jax: 0.10.0
libtpu: 0.0.40
codegen_flags: <defaults>
</compile_context>

<pallas_src>
import functools
import math

import numpy as np
import jax
import jax.numpy as jnp
from jax.experimental import pallas as pl
from jax.experimental.pallas import tpu as pltpu

# ---- module hyper-parameters (from Transformer.__init__ defaults) ----
HIDDEN = 128          # hidden_size
D_FEAT = 6            # d_feat
D_MODEL = 8           # d_model
NHEAD = 4             # nhead
NUM_LAYERS = 2        # num_layers
FFN = 2048            # nn.TransformerEncoderLayer default dim_feedforward
HEAD_DIM = D_MODEL // NHEAD   # == 2
LN_EPS = 1e-5


def _layernorm(x, w, b):
    mu = jnp.mean(x, axis=-1, keepdims=True)
    var = jnp.mean((x - mu) ** 2, axis=-1, keepdims=True)
    return (x - mu) * jax.lax.rsqrt(var + LN_EPS) * w + b


def transformer_kernel(feat_ref, xt_ref, pe_ref, fwb_ref, inwb_ref, owb_ref,
                       l1w_ref, l1b_ref, l2w_ref, l2b_ref, lnp_ref, dec_ref,
                       out_ref, x_scr_ref, *, B, T):
    E, H, hd = D_MODEL, NHEAD, HEAD_DIM
    scale = 1.0 / math.sqrt(hd)

    # feature_layer + positional encoding (pe broadcast over batch in-kernel)
    fwb = fwb_ref[...]                                    # [d_feat+1, E]
    x = jnp.dot(feat_ref[...], fwb[:D_FEAT],
                preferred_element_type=jnp.float32) + fwb[D_FEAT:]
    x = (x.reshape(B, T, E) + pe_ref[...]).reshape(B * T, E)

    for l in range(NUM_LAYERS):
        # ---- multi-head self-attention, batched over (batch, head) ----
        inwb = inwb_ref[l]                                # [E+1, 3E]
        qkv = jnp.dot(x, inwb[:E],
                      preferred_element_type=jnp.float32) + inwb[E:]
        # Column layout (host-side permutation): inside each of q/k/v the H
        # columns of head-dim component d come consecutively (d-major).
        q = [qkv[:, 0 * E + d * H:0 * E + (d + 1) * H].reshape(B, T, H) * scale
             for d in range(hd)]
        k = [qkv[:, 1 * E + d * H:1 * E + (d + 1) * H].reshape(B, T, H)
             for d in range(hd)]
        v = [qkv[:, 2 * E + d * H:2 * E + (d + 1) * H].reshape(B, T, H)
             for d in range(hd)]

        # scores[b, i, j, h] = sum_d q[b,i,h,d] * k[b,j,h,d]  -> [B, T, T, H]
        s = q[0][:, :, None, :] * k[0][:, None, :, :]
        for d in range(1, hd):
            s = s + q[d][:, :, None, :] * k[d][:, None, :, :]

        # one softmax over j for all (b, h, i) at once
        s = s - jnp.max(s, axis=2, keepdims=True)
        p = jnp.exp(s)
        p = p * pl.reciprocal(jnp.sum(p, axis=2, keepdims=True), approx=True)

        # attention output + out_proj, split per head-dim component (no concat)
        owb = owb_ref[l]                                  # [E+1, E]
        attn = owb[E:]
        for d in range(hd):
            o_d = jnp.sum(p * v[d][:, None, :, :], axis=2).reshape(B * T, H)
            attn = attn + jnp.dot(o_d, owb[d * H:(d + 1) * H],
                                  preferred_element_type=jnp.float32)

        # residual + norm1 (dropout = identity, eval mode)
        ln = lnp_ref[l]                                   # [4, E]
        x = _layernorm(x + attn, ln[0:1], ln[1:2])

        # ---- feed-forward (lane-dense [B*T, 2048] path) ----
        h1 = jnp.dot(x, l1w_ref[l],
                     preferred_element_type=jnp.float32) + l1b_ref[l]
        h1 = jnp.maximum(h1, 0.0)
        h2 = jnp.dot(h1, l2w_ref[l],
                     preferred_element_type=jnp.float32) + l2b_ref[l]

        # residual + norm2
        x = _layernorm(x + h2, ln[2:3], ln[3:4])

    # last time step of each batch element via a strided VMEM read (no concat)
    x_scr_ref[...] = x
    last = x_scr_ref[pl.ds(T - 1, B, stride=T), :]        # [B, E]

    # decoder: concat([last, xt]) @ dw + db == last @ dw[:E] + xt * dw[E] + db
    dec = dec_ref[...]                                    # [E+2, HIDDEN]
    out_ref[...] = (jnp.dot(last, dec[:E], preferred_element_type=jnp.float32)
                    + xt_ref[...] * dec[E:E + 1] + dec[E + 1:])


def _positional_encoding(T, d_model):
    # numpy -> becomes a compile-time constant (no wrapper-side XLA ops)
    pos = np.arange(T, dtype=np.float32)[:, None]
    div = np.exp(np.arange(0, d_model, 2, dtype=np.float32)
                 * (-math.log(10000.0) / d_model))
    pe = np.zeros((T, d_model), np.float32)
    pe[:, 0::2] = np.sin(pos * div)
    pe[:, 1::2] = np.cos(pos * div)
    return jnp.asarray(pe)


def init_params(key):
    """Deterministic synthetic weights, shapes matching the PyTorch module,
    pre-transposed to [in, out] (i.e. W.T of each nn.Linear / MHA weight)."""
    names_shapes = [
        ("fw", (D_FEAT, D_MODEL)), ("fb", (1, D_MODEL)),
        ("inw", (NUM_LAYERS, D_MODEL, 3 * D_MODEL)),
        ("inb", (NUM_LAYERS, 1, 3 * D_MODEL)),
        ("ow", (NUM_LAYERS, D_MODEL, D_MODEL)),
        ("ob", (NUM_LAYERS, 1, D_MODEL)),
        ("l1w", (NUM_LAYERS, D_MODEL, FFN)), ("l1b", (NUM_LAYERS, 1, FFN)),
        ("l2w", (NUM_LAYERS, FFN, D_MODEL)), ("l2b", (NUM_LAYERS, 1, D_MODEL)),
        ("dw", (D_MODEL + 1, HIDDEN)), ("db", (1, HIDDEN)),
    ]
    params = {}
    keys = jax.random.split(key, len(names_shapes))
    for k, (name, shape) in zip(keys, names_shapes):
        params[name] = (0.1 * jax.random.normal(k, shape)).astype(jnp.float32)
    # layer-norm weights init like PyTorch: ones / zeros
    params["n1w"] = jnp.ones((NUM_LAYERS, 1, D_MODEL), jnp.float32)
    params["n1b"] = jnp.zeros((NUM_LAYERS, 1, D_MODEL), jnp.float32)
    params["n2w"] = jnp.ones((NUM_LAYERS, 1, D_MODEL), jnp.float32)
    params["n2b"] = jnp.zeros((NUM_LAYERS, 1, D_MODEL), jnp.float32)
    return params


def pack_params(p):
    """One-time host-side repacking into the kernel layout:
       - in_proj columns grouped by head-dim component (kernel only does
         contiguous static slices), bias fused as an extra row,
       - out_proj rows split per component, stacked [E, E] + bias row,
       - the 4 LayerNorm vectors fused into one [L, 4, E] slab,
       - feature weight+bias fused, decoder weight split into d_model part,
         xt row and bias row (kills the concat)."""
    E, H, hd = D_MODEL, NHEAD, HEAD_DIM
    grouped = np.arange(E).reshape(H, hd).T.reshape(-1)   # d-major head layout
    perm = np.concatenate([part * E + grouped for part in range(3)])
    ow = jnp.stack([p["ow"][:, d::hd, :] for d in range(hd)], axis=1)
    ow = ow.reshape(NUM_LAYERS, E, E)
    return dict(
        fwb=jnp.concatenate([p["fw"], p["fb"]], axis=0),                # [7, E]
        inwb=jnp.concatenate([p["inw"][:, :, perm],
                              p["inb"][:, :, perm]], axis=1),           # [L, E+1, 3E]
        owb=jnp.concatenate([ow, p["ob"]], axis=1),                     # [L, E+1, E]
        l1w=p["l1w"], l1b=p["l1b"],
        l2w=p["l2w"], l2b=p["l2b"],
        lnp=jnp.concatenate([p["n1w"], p["n1b"],
                             p["n2w"], p["n2b"]], axis=1),              # [L, 4, E]
        dec=jnp.concatenate([p["dw"], p["db"]], axis=0),                # [E+2, 128]
    )


@jax.jit
def transformer_forward(src_input, packed):
    B = src_input.shape[0]
    feature = src_input[:, :-1]                     # [B, d_feat*T]
    xt = src_input[:, -1:]                          # [B, 1]
    T = feature.shape[1] // D_FEAT
    # reshape(B, d_feat, -1).permute(0, 2, 1) -> [B, T, d_feat] -> b-major flat
    feat = feature.reshape(B, D_FEAT, T).transpose(0, 2, 1).reshape(B * T, D_FEAT)
    pe = _positional_encoding(T, D_MODEL)           # [T, d_model] constant

    ordered = (feat, xt, pe,
               packed["fwb"], packed["inwb"], packed["owb"],
               packed["l1w"], packed["l1b"], packed["l2w"], packed["l2b"],
               packed["lnp"], packed["dec"])

    vmem = pl.BlockSpec(memory_space=pltpu.MemorySpace.VMEM)
    # TODO(synk): for non-trivial batch sizes add a grid over batch blocks with
    # dimension_semantics=("parallel",) so v7x's 2 TensorCores split the work;
    # at B=2 a single gridless invocation is cheaper.
    return pl.pallas_call(
        functools.partial(transformer_kernel, B=B, T=T),
        out_shape=jax.ShapeDtypeStruct((B, HIDDEN), jnp.float32),
        in_specs=[vmem] * len(ordered),
        out_specs=vmem,
        scratch_shapes=[pltpu.VMEM((B * T, D_MODEL), jnp.float32)],
        compiler_params=pltpu.CompilerParams(vmem_limit_bytes=8 << 20),
    )(*ordered)


# ---------------- pure-JAX reference (eval-mode PyTorch semantics) -----------
def transformer_reference(src_input, p):
    hp = jax.lax.Precision.HIGHEST
    B = src_input.shape[0]
    feature, xt = src_input[:, :-1], src_input[:, -1:]
    T = feature.shape[1] // D_FEAT
    x = feature.reshape(B, D_FEAT, T).transpose(0, 2, 1)
    x = jnp.dot(x, p["fw"], precision=hp) + p["fb"]
    x = x + _positional_encoding(T, D_MODEL)[None]
    for l in range(NUM_LAYERS):
        qkv = jnp.dot(x, p["inw"][l], precision=hp) + p["inb"][l]
        q, k, v = jnp.split(qkv, 3, axis=-1)

        def heads(a):
            return a.reshape(B, T, NHEAD, HEAD_DIM).transpose(0, 2, 1, 3)

        qh, kh, vh = heads(q), heads(k), heads(v)
        s = jnp.einsum("bhid,bhjd->bhij", qh, kh, precision=hp) / math.sqrt(HEAD_DIM)
        a = jax.nn.softmax(s, axis=-1)
        o = jnp.einsum("bhij,bhjd->bhid", a, vh, precision=hp)
        o = o.transpose(0, 2, 1, 3).reshape(B, T, D_MODEL)
        attn = jnp.dot(o, p["ow"][l], precision=hp) + p["ob"][l]
        x = _layernorm(x + attn, p["n1w"][l], p["n1b"][l])
        h = jnp.maximum(jnp.dot(x, p["l1w"][l], precision=hp) + p["l1b"][l], 0.0)
        h2 = jnp.dot(h, p["l2w"][l], precision=hp) + p["l2b"][l]
        x = _layernorm(x + h2, p["n2w"][l], p["n2b"][l])
    last = x[:, -1, :]
    return jnp.dot(jnp.concatenate([last, xt], axis=1), p["dw"],
                   precision=hp) + p["db"]


if __name__ == "__main__":
    # TODO(synk): dropout layers are identity (eval-mode forward); training-mode
    # dropout masks are not reproduced.
    B, T = 2, 8
    key = jax.random.PRNGKey(0)
    k_in, k_par = jax.random.split(key)
    src_input = jax.random.normal(k_in, (B, D_FEAT * T + 1), jnp.float32)
    params = init_params(k_par)
    packed = pack_params(params)

    out = transformer_forward(src_input, packed)
    jax.block_until_ready(out)
    assert out.shape == (B, HIDDEN) and out.dtype == jnp.float32

    ref = transformer_reference(src_input, params)
    err = float(jnp.max(jnp.abs(out - ref)))
    assert err < 5e-2, f"kernel/reference mismatch: max abs err {err}"
    print("KERNEL_OK")
</pallas_src>

<mosaic_0001>
module attributes {stable_mosaic.version = 11 : i64} {
  func.func @transformer_kernel(%arg0: memref<16x6xf32, #tpu.memory_space<vmem>>, %arg1: memref<2x1xf32, #tpu.memory_space<vmem>>, %arg2: memref<8x8xf32, #tpu.memory_space<vmem>>, %arg3: memref<7x8xf32, #tpu.memory_space<vmem>>, %arg4: memref<2x9x24xf32, #tpu.memory_space<vmem>>, %arg5: memref<2x9x8xf32, #tpu.memory_space<vmem>>, %arg6: memref<2x8x2048xf32, #tpu.memory_space<vmem>>, %arg7: memref<2x1x2048xf32, #tpu.memory_space<vmem>>, %arg8: memref<2x2048x8xf32, #tpu.memory_space<vmem>>, %arg9: memref<2x1x8xf32, #tpu.memory_space<vmem>>, %arg10: memref<2x4x8xf32, #tpu.memory_space<vmem>>, %arg11: memref<10x128xf32, #tpu.memory_space<vmem>>, %arg12: memref<2x128xf32, #tpu.memory_space<vmem>>, %arg13: memref<16x8xf32, #tpu.memory_space<vmem>>) attributes {dimension_semantics = [], scalar_prefetch = 0 : i64, scratch_operands = 1 : i64, tpu.core_type = #tpu.core_type<tc>} {
    %c0 = arith.constant 0 : index
    %c0_0 = arith.constant 0 : index
    %0 = vector.load %arg3[%c0, %c0_0] : memref<7x8xf32, #tpu.memory_space<vmem>>, vector<7x8xf32>
    %c0_1 = arith.constant 0 : index
    %c0_2 = arith.constant 0 : index
    %1 = vector.load %arg0[%c0_1, %c0_2] : memref<16x6xf32, #tpu.memory_space<vmem>>, vector<16x6xf32>
    %2 = vector.extract_strided_slice %0 {offsets = [0, 0], sizes = [6, 8], strides = [1, 1]} : vector<7x8xf32> to vector<6x8xf32>
    %cst = arith.constant dense<0.000000e+00> : vector<16x8xf32>
    %3 = tpu.matmul %1, %2, %cst {dimension_numbers = #tpu.dot_dimension_numbers<[1], [0], [0], [1], [0, 0, 1, 1], [], []>} : vector<16x6xf32>, vector<6x8xf32>, vector<16x8xf32> -> vector<16x8xf32>
    %4 = vector.extract_strided_slice %0 {offsets = [6, 0], sizes = [1, 8], strides = [1, 1]} : vector<7x8xf32> to vector<1x8xf32>
    %5 = vector.broadcast %4 : vector<1x8xf32> to vector<16x8xf32>
    %6 = arith.addf %3, %5 : vector<16x8xf32>
    %7 = vector.shape_cast %6 : vector<16x8xf32> to vector<2x8x8xf32>
    %c0_3 = arith.constant 0 : index
    %c0_4 = arith.constant 0 : index
    %8 = vector.load %arg2[%c0_3, %c0_4] : memref<8x8xf32, #tpu.memory_space<vmem>>, vector<8x8xf32>
    %9 = vector.shape_cast %8 : vector<8x8xf32> to vector<1x8x8xf32>
    %10 = vector.broadcast %9 : vector<1x8x8xf32> to vector<2x8x8xf32>
    %11 = arith.addf %7, %10 : vector<2x8x8xf32>
    %12 = vector.shape_cast %11 : vector<2x8x8xf32> to vector<16x8xf32>
    %c0_5 = arith.constant 0 : index
    %c0_6 = arith.constant 0 : index
    %c0_7 = arith.constant 0 : index
    %13 = vector.load %arg4[%c0_5, %c0_6, %c0_7] : memref<2x9x24xf32, #tpu.memory_space<vmem>>, vector<1x9x24xf32>
    %14 = vector.shape_cast %13 : vector<1x9x24xf32> to vector<9x24xf32>
    %15 = vector.extract_strided_slice %14 {offsets = [0, 0], sizes = [8, 24], strides = [1, 1]} : vector<9x24xf32> to vector<8x24xf32>
    %cst_8 = arith.constant dense<0.000000e+00> : vector<16x24xf32>
    %16 = tpu.matmul %12, %15, %cst_8 {dimension_numbers = #tpu.dot_dimension_numbers<[1], [0], [0], [1], [0, 0, 1, 1], [], []>} : vector<16x8xf32>, vector<8x24xf32>, vector<16x24xf32> -> vector<16x24xf32>
    %17 = vector.extract_strided_slice %14 {offsets = [8, 0], sizes = [1, 24], strides = [1, 1]} : vector<9x24xf32> to vector<1x24xf32>
    %18 = vector.broadcast %17 : vector<1x24xf32> to vector<16x24xf32>
    %19 = arith.addf %16, %18 : vector<16x24xf32>
    %20 = vector.extract_strided_slice %19 {offsets = [0, 0], sizes = [16, 4], strides = [1, 1]} : vector<16x24xf32> to vector<16x4xf32>
    %21 = vector.shape_cast %20 : vector<16x4xf32> to vector<2x8x4xf32>
    %cst_9 = arith.constant 0.707106769 : f32
    %22 = vector.broadcast %cst_9 : f32 to vector<2x8x4xf32>
    %23 = arith.mulf %21, %22 : vector<2x8x4xf32>
    %24 = vector.extract_strided_slice %19 {offsets = [0, 4], sizes = [16, 4], strides = [1, 1]} : vector<16x24xf32> to vector<16x4xf32>
    %25 = vector.shape_cast %24 : vector<16x4xf32> to vector<2x8x4xf32>
    %cst_10 = arith.constant 0.707106769 : f32
    %26 = vector.broadcast %cst_10 : f32 to vector<2x8x4xf32>
    %27 = arith.mulf %25, %26 : vector<2x8x4xf32>
    %28 = vector.extract_strided_slice %19 {offsets = [0, 8], sizes = [16, 4], strides = [1, 1]} : vector<16x24xf32> to vector<16x4xf32>
    %29 = vector.shape_cast %28 : vector<16x4xf32> to vector<2x8x4xf32>
    %30 = vector.extract_strided_slice %19 {offsets = [0, 12], sizes = [16, 4], strides = [1, 1]} : vector<16x24xf32> to vector<16x4xf32>
    %31 = vector.shape_cast %30 : vector<16x4xf32> to vector<2x8x4xf32>
    %32 = vector.extract_strided_slice %19 {offsets = [0, 16], sizes = [16, 4], strides = [1, 1]} : vector<16x24xf32> to vector<16x4xf32>
    %33 = vector.shape_cast %32 : vector<16x4xf32> to vector<2x8x4xf32>
    %34 = vector.extract_strided_slice %19 {offsets = [0, 20], sizes = [16, 4], strides = [1, 1]} : vector<16x24xf32> to vector<16x4xf32>
    %35 = vector.shape_cast %34 : vector<16x4xf32> to vector<2x8x4xf32>
    %36 = vector.shape_cast %23 : vector<2x8x4xf32> to vector<2x8x1x4xf32>
    %37 = vector.shape_cast %29 : vector<2x8x4xf32> to vector<2x1x8x4xf32>
    %38 = vector.broadcast %36 : vector<2x8x1x4xf32> to vector<2x8x8x4xf32>
    %39 = vector.broadcast %37 : vector<2x1x8x4xf32> to vector<2x8x8x4xf32>
    %40 = arith.mulf %38, %39 : vector<2x8x8x4xf32>
    %41 = vector.shape_cast %27 : vector<2x8x4xf32> to vector<2x8x1x4xf32>
    %42 = vector.shape_cast %31 : vector<2x8x4xf32> to vector<2x1x8x4xf32>
    %43 = vector.broadcast %41 : vector<2x8x1x4xf32> to vector<2x8x8x4xf32>
    %44 = vector.broadcast %42 : vector<2x1x8x4xf32> to vector<2x8x8x4xf32>
    %45 = arith.mulf %43, %44 : vector<2x8x8x4xf32>
    %46 = arith.addf %40, %45 : vector<2x8x8x4xf32>
    %cst_11 = arith.constant dense<0xFF800000> : vector<2x8x4xf32>
    %47 = vector.multi_reduction <maximumf>, %46, %cst_11 [2] : vector<2x8x8x4xf32> to vector<2x8x4xf32>
    %48 = vector.shape_cast %47 : vector<2x8x4xf32> to vector<2x8x1x4xf32>
    %49 = vector.broadcast %48 : vector<2x8x1x4xf32> to vector<2x8x8x4xf32>
    %50 = arith.subf %46, %49 : vector<2x8x8x4xf32>
    %51 = math.exp %50 : vector<2x8x8x4xf32>
    %cst_12 = arith.constant dense<0.000000e+00> : vector<2x8x4xf32>
    %52 = vector.multi_reduction <add>, %51, %cst_12 [2] : vector<2x8x8x4xf32> to vector<2x8x4xf32>
    %53 = vector.shape_cast %52 : vector<2x8x4xf32> to vector<2x8x1x4xf32>
    %54 = tpu.reciprocal %53 {approx = true} : vector<2x8x1x4xf32> -> vector<2x8x1x4xf32>
    %55 = vector.broadcast %54 : vector<2x8x1x4xf32> to vector<2x8x8x4xf32>
    %56 = arith.mulf %51, %55 : vector<2x8x8x4xf32>
    %c0_13 = arith.constant 0 : index
    %c0_14 = arith.constant 0 : index
    %c0_15 = arith.constant 0 : index
    %57 = vector.load %arg5[%c0_13, %c0_14, %c0_15] : memref<2x9x8xf32, #tpu.memory_space<vmem>>, vector<1x9x8xf32>
    %58 = vector.shape_cast %57 : vector<1x9x8xf32> to vector<9x8xf32>
    %59 = vector.extract_strided_slice %58 {offsets = [8, 0], sizes = [1, 8], strides = [1, 1]} : vector<9x8xf32> to vector<1x8xf32>
    %60 = vector.shape_cast %33 : vector<2x8x4xf32> to vector<2x1x8x4xf32>
    %61 = vector.broadcast %60 : vector<2x1x8x4xf32> to vector<2x8x8x4xf32>
    %62 = arith.mulf %56, %61 : vector<2x8x8x4xf32>
    %cst_16 = arith.constant dense<0.000000e+00> : vector<2x8x4xf32>
    %63 = vector.multi_reduction <add>, %62, %cst_16 [2] : vector<2x8x8x4xf32> to vector<2x8x4xf32>
    %64 = vector.shape_cast %63 : vector<2x8x4xf32> to vector<16x4xf32>
    %65 = vector.extract_strided_slice %58 {offsets = [0, 0], sizes = [4, 8], strides = [1, 1]} : vector<9x8xf32> to vector<4x8xf32>
    %cst_17 = arith.constant dense<0.000000e+00> : vector<16x8xf32>
    %66 = tpu.matmul %64, %65, %cst_17 {dimension_numbers = #tpu.dot_dimension_numbers<[1], [0], [0], [1], [0, 0, 1, 1], [], []>} : vector<16x4xf32>, vector<4x8xf32>, vector<16x8xf32> -> vector<16x8xf32>
    %67 = vector.broadcast %59 : vector<1x8xf32> to vector<16x8xf32>
    %68 = arith.addf %67, %66 : vector<16x8xf32>
    %69 = vector.shape_cast %35 : vector<2x8x4xf32> to vector<2x1x8x4xf32>
    %70 = vector.broadcast %69 : vector<2x1x8x4xf32> to vector<2x8x8x4xf32>
    %71 = arith.mulf %56, %70 : vector<2x8x8x4xf32>
    %cst_18 = arith.constant dense<0.000000e+00> : vector<2x8x4xf32>
    %72 = vector.multi_reduction <add>, %71, %cst_18 [2] : vector<2x8x8x4xf32> to vector<2x8x4xf32>
    %73 = vector.shape_cast %72 : vector<2x8x4xf32> to vector<16x4xf32>
    %74 = vector.extract_strided_slice %58 {offsets = [4, 0], sizes = [4, 8], strides = [1, 1]} : vector<9x8xf32> to vector<4x8xf32>
    %cst_19 = arith.constant dense<0.000000e+00> : vector<16x8xf32>
    %75 = tpu.matmul %73, %74, %cst_19 {dimension_numbers = #tpu.dot_dimension_numbers<[1], [0], [0], [1], [0, 0, 1, 1], [], []>} : vector<16x4xf32>, vector<4x8xf32>, vector<16x8xf32> -> vector<16x8xf32>
    %76 = arith.addf %68, %75 : vector<16x8xf32>
    %c0_20 = arith.constant 0 : index
    %c0_21 = arith.constant 0 : index
    %c0_22 = arith.constant 0 : index
    %77 = vector.load %arg10[%c0_20, %c0_21, %c0_22] : memref<2x4x8xf32, #tpu.memory_space<vmem>>, vector<1x4x8xf32>
    %78 = vector.shape_cast %77 : vector<1x4x8xf32> to vector<4x8xf32>
    %79 = arith.addf %12, %76 : vector<16x8xf32>
    %80 = vector.extract_strided_slice %78 {offsets = [0, 0], sizes = [1, 8], strides = [1, 1]} : vector<4x8xf32> to vector<1x8xf32>
    %81 = vector.extract_strided_slice %78 {offsets = [1, 0], sizes = [1, 8], strides = [1, 1]} : vector<4x8xf32> to vector<1x8xf32>
    %cst_23 = arith.constant dense<0.000000e+00> : vector<16xf32>
    %82 = vector.multi_reduction <add>, %79, %cst_23 [1] : vector<16x8xf32> to vector<16xf32>
    %83 = vector.shape_cast %82 : vector<16xf32> to vector<16x1xf32>
    %cst_24 = arith.constant 8.000000e+00 : f32
    %84 = vector.broadcast %cst_24 : f32 to vector<16x1xf32>
    %85 = arith.divf %83, %84 : vector<16x1xf32>
    %86 = vector.broadcast %85 : vector<16x1xf32> to vector<16x8xf32>
    %87 = arith.subf %79, %86 : vector<16x8xf32>
    %88 = arith.mulf %87, %87 : vector<16x8xf32>
    %cst_25 = arith.constant dense<0.000000e+00> : vector<16xf32>
    %89 = vector.multi_reduction <add>, %88, %cst_25 [1] : vector<16x8xf32> to vector<16xf32>
    %90 = vector.shape_cast %89 : vector<16xf32> to vector<16x1xf32>
    %cst_26 = arith.constant 8.000000e+00 : f32
    %91 = vector.broadcast %cst_26 : f32 to vector<16x1xf32>
    %92 = arith.divf %90, %91 : vector<16x1xf32>
    %93 = vector.broadcast %85 : vector<16x1xf32> to vector<16x8xf32>
    %94 = arith.subf %79, %93 : vector<16x8xf32>
    %cst_27 = arith.constant 9.99999974E-6 : f32
    %95 = vector.broadcast %cst_27 : f32 to vector<16x1xf32>
    %96 = arith.addf %92, %95 : vector<16x1xf32>
    %97 = math.rsqrt %96 : vector<16x1xf32>
    %98 = vector.broadcast %97 : vector<16x1xf32> to vector<16x8xf32>
    %99 = arith.mulf %94, %98 : vector<16x8xf32>
    %100 = vector.broadcast %80 : vector<1x8xf32> to vector<16x8xf32>
    %101 = arith.mulf %99, %100 : vector<16x8xf32>
    %102 = vector.broadcast %81 : vector<1x8xf32> to vector<16x8xf32>
    %103 = arith.addf %101, %102 : vector<16x8xf32>
    %c0_28 = arith.constant 0 : index
    %c0_29 = arith.constant 0 : index
    %c0_30 = arith.constant 0 : index
    %104 = vector.load %arg6[%c0_28, %c0_29, %c0_30] : memref<2x8x2048xf32, #tpu.memory_space<vmem>>, vector<1x8x2048xf32>
    %105 = vector.shape_cast %104 : vector<1x8x2048xf32> to vector<8x2048xf32>
    %cst_31 = arith.constant dense<0.000000e+00> : vector<16x2048xf32>
    %106 = tpu.matmul %103, %105, %cst_31 {dimension_numbers = #tpu.dot_dimension_numbers<[1], [0], [0], [1], [0, 0, 1, 1], [], []>} : vector<16x8xf32>, vector<8x2048xf32>, vector<16x2048xf32> -> vector<16x2048xf32>
    %c0_32 = arith.constant 0 : index
    %c0_33 = arith.constant 0 : index
    %c0_34 = arith.constant 0 : index
    %107 = vector.load %arg7[%c0_32, %c0_33, %c0_34] : memref<2x1x2048xf32, #tpu.memory_space<vmem>>, vector<1x1x2048xf32>
    %108 = vector.shape_cast %107 : vector<1x1x2048xf32> to vector<1x2048xf32>
    %109 = vector.broadcast %108 : vector<1x2048xf32> to vector<16x2048xf32>
    %110 = arith.addf %106, %109 : vector<16x2048xf32>
    %cst_35 = arith.constant 0.000000e+00 : f32
    %111 = vector.broadcast %cst_35 : f32 to vector<16x2048xf32>
    %112 = arith.maximumf %110, %111 : vector<16x2048xf32>
    %c0_36 = arith.constant 0 : index
    %c0_37 = arith.constant 0 : index
    %c0_38 = arith.constant 0 : index
    %113 = vector.load %arg8[%c0_36, %c0_37, %c0_38] : memref<2x2048x8xf32, #tpu.memory_space<vmem>>, vector<1x2048x8xf32>
    %114 = vector.shape_cast %113 : vector<1x2048x8xf32> to vector<2048x8xf32>
    %cst_39 = arith.constant dense<0.000000e+00> : vector<16x8xf32>
    %115 = tpu.matmul %112, %114, %cst_39 {dimension_numbers = #tpu.dot_dimension_numbers<[1], [0], [0], [1], [0, 0, 1, 1], [], []>} : vector<16x2048xf32>, vector<2048x8xf32>, vector<16x8xf32> -> vector<16x8xf32>
    %c0_40 = arith.constant 0 : index
    %c0_41 = arith.constant 0 : index
    %c0_42 = arith.constant 0 : index
    %116 = vector.load %arg9[%c0_40, %c0_41, %c0_42] : memref<2x1x8xf32, #tpu.memory_space<vmem>>, vector<1x1x8xf32>
    %117 = vector.shape_cast %116 : vector<1x1x8xf32> to vector<1x8xf32>
    %118 = vector.broadcast %117 : vector<1x8xf32> to vector<16x8xf32>
    %119 = arith.addf %115, %118 : vector<16x8xf32>
    %120 = arith.addf %103, %119 : vector<16x8xf32>
    %121 = vector.extract_strided_slice %78 {offsets = [2, 0], sizes = [1, 8], strides = [1, 1]} : vector<4x8xf32> to vector<1x8xf32>
    %122 = vector.extract_strided_slice %78 {offsets = [3, 0], sizes = [1, 8], strides = [1, 1]} : vector<4x8xf32> to vector<1x8xf32>
    %cst_43 = arith.constant dense<0.000000e+00> : vector<16xf32>
    %123 = vector.multi_reduction <add>, %120, %cst_43 [1] : vector<16x8xf32> to vector<16xf32>
    %124 = vector.shape_cast %123 : vector<16xf32> to vector<16x1xf32>
    %cst_44 = arith.constant 8.000000e+00 : f32
    %125 = vector.broadcast %cst_44 : f32 to vector<16x1xf32>
    %126 = arith.divf %124, %125 : vector<16x1xf32>
    %127 = vector.broadcast %126 : vector<16x1xf32> to vector<16x8xf32>
    %128 = arith.subf %120, %127 : vector<16x8xf32>
    %129 = arith.mulf %128, %128 : vector<16x8xf32>
    %cst_45 = arith.constant dense<0.000000e+00> : vector<16xf32>
    %130 = vector.multi_reduction <add>, %129, %cst_45 [1] : vector<16x8xf32> to vector<16xf32>
    %131 = vector.shape_cast %130 : vector<16xf32> to vector<16x1xf32>
    %cst_46 = arith.constant 8.000000e+00 : f32
    %132 = vector.broadcast %cst_46 : f32 to vector<16x1xf32>
    %133 = arith.divf %131, %132 : vector<16x1xf32>
    %134 = vector.broadcast %126 : vector<16x1xf32> to vector<16x8xf32>
    %135 = arith.subf %120, %134 : vector<16x8xf32>
    %cst_47 = arith.constant 9.99999974E-6 : f32
    %136 = vector.broadcast %cst_47 : f32 to vector<16x1xf32>
    %137 = arith.addf %133, %136 : vector<16x1xf32>
    %138 = math.rsqrt %137 : vector<16x1xf32>
    %139 = vector.broadcast %138 : vector<16x1xf32> to vector<16x8xf32>
    %140 = arith.mulf %135, %139 : vector<16x8xf32>
    %141 = vector.broadcast %121 : vector<1x8xf32> to vector<16x8xf32>
    %142 = arith.mulf %140, %141 : vector<16x8xf32>
    %143 = vector.broadcast %122 : vector<1x8xf32> to vector<16x8xf32>
    %144 = arith.addf %142, %143 : vector<16x8xf32>
    %c1 = arith.constant 1 : index
    %c0_48 = arith.constant 0 : index
    %c0_49 = arith.constant 0 : index
    %145 = vector.load %arg4[%c1, %c0_48, %c0_49] : memref<2x9x24xf32, #tpu.memory_space<vmem>>, vector<1x9x24xf32>
    %146 = vector.shape_cast %145 : vector<1x9x24xf32> to vector<9x24xf32>
    %147 = vector.extract_strided_slice %146 {offsets = [0, 0], sizes = [8, 24], strides = [1, 1]} : vector<9x24xf32> to vector<8x24xf32>
    %cst_50 = arith.constant dense<0.000000e+00> : vector<16x24xf32>
    %148 = tpu.matmul %144, %147, %cst_50 {dimension_numbers = #tpu.dot_dimension_numbers<[1], [0], [0], [1], [0, 0, 1, 1], [], []>} : vector<16x8xf32>, vector<8x24xf32>, vector<16x24xf32> -> vector<16x24xf32>
    %149 = vector.extract_strided_slice %146 {offsets = [8, 0], sizes = [1, 24], strides = [1, 1]} : vector<9x24xf32> to vector<1x24xf32>
    %150 = vector.broadcast %149 : vector<1x24xf32> to vector<16x24xf32>
    %151 = arith.addf %148, %150 : vector<16x24xf32>
    %152 = vector.extract_strided_slice %151 {offsets = [0, 0], sizes = [16, 4], strides = [1, 1]} : vector<16x24xf32> to vector<16x4xf32>
    %153 = vector.shape_cast %152 : vector<16x4xf32> to vector<2x8x4xf32>
    %cst_51 = arith.constant 0.707106769 : f32
    %154 = vector.broadcast %cst_51 : f32 to vector<2x8x4xf32>
    %155 = arith.mulf %153, %154 : vector<2x8x4xf32>
    %156 = vector.extract_strided_slice %151 {offsets = [0, 4], sizes = [16, 4], strides = [1, 1]} : vector<16x24xf32> to vector<16x4xf32>
    %157 = vector.shape_cast %156 : vector<16x4xf32> to vector<2x8x4xf32>
    %cst_52 = arith.constant 0.707106769 : f32
    %158 = vector.broadcast %cst_52 : f32 to vector<2x8x4xf32>
    %159 = arith.mulf %157, %158 : vector<2x8x4xf32>
    %160 = vector.extract_strided_slice %151 {offsets = [0, 8], sizes = [16, 4], strides = [1, 1]} : vector<16x24xf32> to vector<16x4xf32>
    %161 = vector.shape_cast %160 : vector<16x4xf32> to vector<2x8x4xf32>
    %162 = vector.extract_strided_slice %151 {offsets = [0, 12], sizes = [16, 4], strides = [1, 1]} : vector<16x24xf32> to vector<16x4xf32>
    %163 = vector.shape_cast %162 : vector<16x4xf32> to vector<2x8x4xf32>
    %164 = vector.extract_strided_slice %151 {offsets = [0, 16], sizes = [16, 4], strides = [1, 1]} : vector<16x24xf32> to vector<16x4xf32>
    %165 = vector.shape_cast %164 : vector<16x4xf32> to vector<2x8x4xf32>
    %166 = vector.extract_strided_slice %151 {offsets = [0, 20], sizes = [16, 4], strides = [1, 1]} : vector<16x24xf32> to vector<16x4xf32>
    %167 = vector.shape_cast %166 : vector<16x4xf32> to vector<2x8x4xf32>
    %168 = vector.shape_cast %155 : vector<2x8x4xf32> to vector<2x8x1x4xf32>
    %169 = vector.shape_cast %161 : vector<2x8x4xf32> to vector<2x1x8x4xf32>
    %170 = vector.broadcast %168 : vector<2x8x1x4xf32> to vector<2x8x8x4xf32>
    %171 = vector.broadcast %169 : vector<2x1x8x4xf32> to vector<2x8x8x4xf32>
    %172 = arith.mulf %170, %171 : vector<2x8x8x4xf32>
    %173 = vector.shape_cast %159 : vector<2x8x4xf32> to vector<2x8x1x4xf32>
    %174 = vector.shape_cast %163 : vector<2x8x4xf32> to vector<2x1x8x4xf32>
    %175 = vector.broadcast %173 : vector<2x8x1x4xf32> to vector<2x8x8x4xf32>
    %176 = vector.broadcast %174 : vector<2x1x8x4xf32> to vector<2x8x8x4xf32>
    %177 = arith.mulf %175, %176 : vector<2x8x8x4xf32>
    %178 = arith.addf %172, %177 : vector<2x8x8x4xf32>
    %cst_53 = arith.constant dense<0xFF800000> : vector<2x8x4xf32>
    %179 = vector.multi_reduction <maximumf>, %178, %cst_53 [2] : vector<2x8x8x4xf32> to vector<2x8x4xf32>
    %180 = vector.shape_cast %179 : vector<2x8x4xf32> to vector<2x8x1x4xf32>
    %181 = vector.broadcast %180 : vector<2x8x1x4xf32> to vector<2x8x8x4xf32>
    %182 = arith.subf %178, %181 : vector<2x8x8x4xf32>
    %183 = math.exp %182 : vector<2x8x8x4xf32>
    %cst_54 = arith.constant dense<0.000000e+00> : vector<2x8x4xf32>
    %184 = vector.multi_reduction <add>, %183, %cst_54 [2] : vector<2x8x8x4xf32> to vector<2x8x4xf32>
    %185 = vector.shape_cast %184 : vector<2x8x4xf32> to vector<2x8x1x4xf32>
    %186 = tpu.reciprocal %185 {approx = true} : vector<2x8x1x4xf32> -> vector<2x8x1x4xf32>
    %187 = vector.broadcast %186 : vector<2x8x1x4xf32> to vector<2x8x8x4xf32>
    %188 = arith.mulf %183, %187 : vector<2x8x8x4xf32>
    %c1_55 = arith.constant 1 : index
    %c0_56 = arith.constant 0 : index
    %c0_57 = arith.constant 0 : index
    %189 = vector.load %arg5[%c1_55, %c0_56, %c0_57] : memref<2x9x8xf32, #tpu.memory_space<vmem>>, vector<1x9x8xf32>
    %190 = vector.shape_cast %189 : vector<1x9x8xf32> to vector<9x8xf32>
    %191 = vector.extract_strided_slice %190 {offsets = [8, 0], sizes = [1, 8], strides = [1, 1]} : vector<9x8xf32> to vector<1x8xf32>
    %192 = vector.shape_cast %165 : vector<2x8x4xf32> to vector<2x1x8x4xf32>
    %193 = vector.broadcast %192 : vector<2x1x8x4xf32> to vector<2x8x8x4xf32>
    %194 = arith.mulf %188, %193 : vector<2x8x8x4xf32>
    %cst_58 = arith.constant dense<0.000000e+00> : vector<2x8x4xf32>
    %195 = vector.multi_reduction <add>, %194, %cst_58 [2] : vector<2x8x8x4xf32> to vector<2x8x4xf32>
    %196 = vector.shape_cast %195 : vector<2x8x4xf32> to vector<16x4xf32>
    %197 = vector.extract_strided_slice %190 {offsets = [0, 0], sizes = [4, 8], strides = [1, 1]} : vector<9x8xf32> to vector<4x8xf32>
    %cst_59 = arith.constant dense<0.000000e+00> : vector<16x8xf32>
    %198 = tpu.matmul %196, %197, %cst_59 {dimension_numbers = #tpu.dot_dimension_numbers<[1], [0], [0], [1], [0, 0, 1, 1], [], []>} : vector<16x4xf32>, vector<4x8xf32>, vector<16x8xf32> -> vector<16x8xf32>
    %199 = vector.broadcast %191 : vector<1x8xf32> to vector<16x8xf32>
    %200 = arith.addf %199, %198 : vector<16x8xf32>
    %201 = vector.shape_cast %167 : vector<2x8x4xf32> to vector<2x1x8x4xf32>
    %202 = vector.broadcast %201 : vector<2x1x8x4xf32> to vector<2x8x8x4xf32>
    %203 = arith.mulf %188, %202 : vector<2x8x8x4xf32>
    %cst_60 = arith.constant dense<0.000000e+00> : vector<2x8x4xf32>
    %204 = vector.multi_reduction <add>, %203, %cst_60 [2] : vector<2x8x8x4xf32> to vector<2x8x4xf32>
    %205 = vector.shape_cast %204 : vector<2x8x4xf32> to vector<16x4xf32>
    %206 = vector.extract_strided_slice %190 {offsets = [4, 0], sizes = [4, 8], strides = [1, 1]} : vector<9x8xf32> to vector<4x8xf32>
    %cst_61 = arith.constant dense<0.000000e+00> : vector<16x8xf32>
    %207 = tpu.matmul %205, %206, %cst_61 {dimension_numbers = #tpu.dot_dimension_numbers<[1], [0], [0], [1], [0, 0, 1, 1], [], []>} : vector<16x4xf32>, vector<4x8xf32>, vector<16x8xf32> -> vector<16x8xf32>
    %208 = arith.addf %200, %207 : vector<16x8xf32>
    %c1_62 = arith.constant 1 : index
    %c0_63 = arith.constant 0 : index
    %c0_64 = arith.constant 0 : index
    %209 = vector.load %arg10[%c1_62, %c0_63, %c0_64] : memref<2x4x8xf32, #tpu.memory_space<vmem>>, vector<1x4x8xf32>
    %210 = vector.shape_cast %209 : vector<1x4x8xf32> to vector<4x8xf32>
    %211 = arith.addf %144, %208 : vector<16x8xf32>
    %212 = vector.extract_strided_slice %210 {offsets = [0, 0], sizes = [1, 8], strides = [1, 1]} : vector<4x8xf32> to vector<1x8xf32>
    %213 = vector.extract_strided_slice %210 {offsets = [1, 0], sizes = [1, 8], strides = [1, 1]} : vector<4x8xf32> to vector<1x8xf32>
    %cst_65 = arith.constant dense<0.000000e+00> : vector<16xf32>
    %214 = vector.multi_reduction <add>, %211, %cst_65 [1] : vector<16x8xf32> to vector<16xf32>
    %215 = vector.shape_cast %214 : vector<16xf32> to vector<16x1xf32>
    %cst_66 = arith.constant 8.000000e+00 : f32
    %216 = vector.broadcast %cst_66 : f32 to vector<16x1xf32>
    %217 = arith.divf %215, %216 : vector<16x1xf32>
    %218 = vector.broadcast %217 : vector<16x1xf32> to vector<16x8xf32>
    %219 = arith.subf %211, %218 : vector<16x8xf32>
    %220 = arith.mulf %219, %219 : vector<16x8xf32>
    %cst_67 = arith.constant dense<0.000000e+00> : vector<16xf32>
    %221 = vector.multi_reduction <add>, %220, %cst_67 [1] : vector<16x8xf32> to vector<16xf32>
    %222 = vector.shape_cast %221 : vector<16xf32> to vector<16x1xf32>
    %cst_68 = arith.constant 8.000000e+00 : f32
    %223 = vector.broadcast %cst_68 : f32 to vector<16x1xf32>
    %224 = arith.divf %222, %223 : vector<16x1xf32>
    %225 = vector.broadcast %217 : vector<16x1xf32> to vector<16x8xf32>
    %226 = arith.subf %211, %225 : vector<16x8xf32>
    %cst_69 = arith.constant 9.99999974E-6 : f32
    %227 = vector.broadcast %cst_69 : f32 to vector<16x1xf32>
    %228 = arith.addf %224, %227 : vector<16x1xf32>
    %229 = math.rsqrt %228 : vector<16x1xf32>
    %230 = vector.broadcast %229 : vector<16x1xf32> to vector<16x8xf32>
    %231 = arith.mulf %226, %230 : vector<16x8xf32>
    %232 = vector.broadcast %212 : vector<1x8xf32> to vector<16x8xf32>
    %233 = arith.mulf %231, %232 : vector<16x8xf32>
    %234 = vector.broadcast %213 : vector<1x8xf32> to vector<16x8xf32>
    %235 = arith.addf %233, %234 : vector<16x8xf32>
    %c1_70 = arith.constant 1 : index
    %c0_71 = arith.constant 0 : index
    %c0_72 = arith.constant 0 : index
    %236 = vector.load %arg6[%c1_70, %c0_71, %c0_72] : memref<2x8x2048xf32, #tpu.memory_space<vmem>>, vector<1x8x2048xf32>
    %237 = vector.shape_cast %236 : vector<1x8x2048xf32> to vector<8x2048xf32>
    %cst_73 = arith.constant dense<0.000000e+00> : vector<16x2048xf32>
    %238 = tpu.matmul %235, %237, %cst_73 {dimension_numbers = #tpu.dot_dimension_numbers<[1], [0], [0], [1], [0, 0, 1, 1], [], []>} : vector<16x8xf32>, vector<8x2048xf32>, vector<16x2048xf32> -> vector<16x2048xf32>
    %c1_74 = arith.constant 1 : index
    %c0_75 = arith.constant 0 : index
    %c0_76 = arith.constant 0 : index
    %239 = vector.load %arg7[%c1_74, %c0_75, %c0_76] : memref<2x1x2048xf32, #tpu.memory_space<vmem>>, vector<1x1x2048xf32>
    %240 = vector.shape_cast %239 : vector<1x1x2048xf32> to vector<1x2048xf32>
    %241 = vector.broadcast %240 : vector<1x2048xf32> to vector<16x2048xf32>
    %242 = arith.addf %238, %241 : vector<16x2048xf32>
    %cst_77 = arith.constant 0.000000e+00 : f32
    %243 = vector.broadcast %cst_77 : f32 to vector<16x2048xf32>
    %244 = arith.maximumf %242, %243 : vector<16x2048xf32>
    %c1_78 = arith.constant 1 : index
    %c0_79 = arith.constant 0 : index
    %c0_80 = arith.constant 0 : index
    %245 = vector.load %arg8[%c1_78, %c0_79, %c0_80] : memref<2x2048x8xf32, #tpu.memory_space<vmem>>, vector<1x2048x8xf32>
    %246 = vector.shape_cast %245 : vector<1x2048x8xf32> to vector<2048x8xf32>
    %cst_81 = arith.constant dense<0.000000e+00> : vector<16x8xf32>
    %247 = tpu.matmul %244, %246, %cst_81 {dimension_numbers = #tpu.dot_dimension_numbers<[1], [0], [0], [1], [0, 0, 1, 1], [], []>} : vector<16x2048xf32>, vector<2048x8xf32>, vector<16x8xf32> -> vector<16x8xf32>
    %c1_82 = arith.constant 1 : index
    %c0_83 = arith.constant 0 : index
    %c0_84 = arith.constant 0 : index
    %248 = vector.load %arg9[%c1_82, %c0_83, %c0_84] : memref<2x1x8xf32, #tpu.memory_space<vmem>>, vector<1x1x8xf32>
    %249 = vector.shape_cast %248 : vector<1x1x8xf32> to vector<1x8xf32>
    %250 = vector.broadcast %249 : vector<1x8xf32> to vector<16x8xf32>
    %251 = arith.addf %247, %250 : vector<16x8xf32>
    %252 = arith.addf %235, %251 : vector<16x8xf32>
    %253 = vector.extract_strided_slice %210 {offsets = [2, 0], sizes = [1, 8], strides = [1, 1]} : vector<4x8xf32> to vector<1x8xf32>
    %254 = vector.extract_strided_slice %210 {offsets = [3, 0], sizes = [1, 8], strides = [1, 1]} : vector<4x8xf32> to vector<1x8xf32>
    %cst_85 = arith.constant dense<0.000000e+00> : vector<16xf32>
    %255 = vector.multi_reduction <add>, %252, %cst_85 [1] : vector<16x8xf32> to vector<16xf32>
    %256 = vector.shape_cast %255 : vector<16xf32> to vector<16x1xf32>
    %cst_86 = arith.constant 8.000000e+00 : f32
    %257 = vector.broadcast %cst_86 : f32 to vector<16x1xf32>
    %258 = arith.divf %256, %257 : vector<16x1xf32>
    %259 = vector.broadcast %258 : vector<16x1xf32> to vector<16x8xf32>
    %260 = arith.subf %252, %259 : vector<16x8xf32>
    %261 = arith.mulf %260, %260 : vector<16x8xf32>
    %cst_87 = arith.constant dense<0.000000e+00> : vector<16xf32>
    %262 = vector.multi_reduction <add>, %261, %cst_87 [1] : vector<16x8xf32> to vector<16xf32>
    %263 = vector.shape_cast %262 : vector<16xf32> to vector<16x1xf32>
    %cst_88 = arith.constant 8.000000e+00 : f32
    %264 = vector.broadcast %cst_88 : f32 to vector<16x1xf32>
    %265 = arith.divf %263, %264 : vector<16x1xf32>
    %266 = vector.broadcast %258 : vector<16x1xf32> to vector<16x8xf32>
    %267 = arith.subf %252, %266 : vector<16x8xf32>
    %cst_89 = arith.constant 9.99999974E-6 : f32
    %268 = vector.broadcast %cst_89 : f32 to vector<16x1xf32>
    %269 = arith.addf %265, %268 : vector<16x1xf32>
    %270 = math.rsqrt %269 : vector<16x1xf32>
    %271 = vector.broadcast %270 : vector<16x1xf32> to vector<16x8xf32>
    %272 = arith.mulf %267, %271 : vector<16x8xf32>
    %273 = vector.broadcast %253 : vector<1x8xf32> to vector<16x8xf32>
    %274 = arith.mulf %272, %273 : vector<16x8xf32>
    %275 = vector.broadcast %254 : vector<1x8xf32> to vector<16x8xf32>
    %276 = arith.addf %274, %275 : vector<16x8xf32>
    %c0_90 = arith.constant 0 : index
    %c0_91 = arith.constant 0 : index
    %277 = vector.load %arg13[%c0_90, %c0_91] : memref<16x8xf32, #tpu.memory_space<vmem>>, vector<16x8xf32>
    tpu.vector_store %arg13[%c0_90, %c0_91], %276 {strides = array<i32>} : memref<16x8xf32, #tpu.memory_space<vmem>>, vector<16x8xf32>,
    %c7 = arith.constant 7 : index
    %c0_92 = arith.constant 0 : index
    %278 = tpu.strided_load %arg13[%c7, %c0_92] {strides = array<i32: 8, 1>} : memref<16x8xf32, #tpu.memory_space<vmem>>, vector<2x8xf32>
    %c0_93 = arith.constant 0 : index
    %c0_94 = arith.constant 0 : index
    %279 = vector.load %arg11[%c0_93, %c0_94] : memref<10x128xf32, #tpu.memory_space<vmem>>, vector<10x128xf32>
    %280 = vector.extract_strided_slice %279 {offsets = [0, 0], sizes = [8, 128], strides = [1, 1]} : vector<10x128xf32> to vector<8x128xf32>
    %cst_95 = arith.constant dense<0.000000e+00> : vector<2x128xf32>
    %281 = tpu.matmul %278, %280, %cst_95 {dimension_numbers = #tpu.dot_dimension_numbers<[1], [0], [0], [1], [0, 0, 1, 1], [], []>} : vector<2x8xf32>, vector<8x128xf32>, vector<2x128xf32> -> vector<2x128xf32>
    %c0_96 = arith.constant 0 : index
    %c0_97 = arith.constant 0 : index
    %282 = vector.load %arg1[%c0_96, %c0_97] : memref<2x1xf32, #tpu.memory_space<vmem>>, vector<2x1xf32>
    %283 = vector.extract_strided_slice %279 {offsets = [8, 0], sizes = [1, 128], strides = [1, 1]} : vector<10x128xf32> to vector<1x128xf32>
    %284 = vector.broadcast %282 : vector<2x1xf32> to vector<2x128xf32>
    %285 = vector.broadcast %283 : vector<1x128xf32> to vector<2x128xf32>
    %286 = arith.mulf %284, %285 : vector<2x128xf32>
    %287 = arith.addf %281, %286 : vector<2x128xf32>
    %288 = vector.extract_strided_slice %279 {offsets = [9, 0], sizes = [1, 128], strides = [1, 1]} : vector<10x128xf32> to vector<1x128xf32>
    %289 = vector.broadcast %288 : vector<1x128xf32> to vector<2x128xf32>
    %290 = arith.addf %287, %289 : vector<2x128xf32>
    %c0_98 = arith.constant 0 : index
    %c0_99 = arith.constant 0 : index
    %291 = vector.load %arg12[%c0_98, %c0_99] : memref<2x128xf32, #tpu.memory_space<vmem>>, vector<2x128xf32>
    tpu.vector_store %arg12[%c0_98, %c0_99], %290 {strides = array<i32>} : memref<2x128xf32, #tpu.memory_space<vmem>>, vector<2x128xf32>,
    return
  }
}

</mosaic_0001>

<bundles_post_ra>
// kernel: transformer_forward.1
= control target key start
LH: loop header
LB: loop body
LE: loop exit
PB: predicated region body
PF: predicated region fallthrough
CT: control target
= control target key end

     0   :  { %vm53_vm0 = vcmask 1045504   ;;  %vm46_vm1 = vcmask 48128   ;;  %s7909_s0 = inlined_call_operand.vmem [shape: f32[16,6], index: 0, kind: input, shape index: {}]   ;;  %s7910_s1 = inlined_call_operand.vmem [shape: f32[2,1], index: 1, kind: input, shape index: {}]   ;;  %s7911_s2 = inlined_call_operand.vmem [shape: f32[8,8], index: 2, kind: input, shape index: {}]   ;;  %s7912_s3 = inlined_call_operand.vmem [shape: f32[7,8], index: 3, kind: input, shape index: {}]   ;;  %s7913_s4 = inlined_call_operand.vmem [shape: f32[2,9,24], index: 4, kind: input, shape index: {}]   ;;  %s7914_s5 = inlined_call_operand.vmem [shape: f32[2,9,8], index: 5, kind: input, shape index: {}]   ;;  %s7915_s6 = inlined_call_operand.vmem [shape: f32[2,8,2048], index: 6, kind: input, shape index: {}]   ;;  %s7916_s7 = inlined_call_operand.vmem [shape: f32[2,1,2048], index: 7, kind: input, shape index: {}]   ;;  %s7917_s8 = inlined_call_operand.vmem [shape: f32[2,2048,8], index: 8, kind: input, shape index: {}]   ;;  %s7918_s9 = inlined_call_operand.vmem [shape: f32[2,1,8], index: 9, kind: input, shape index: {}]   ;;  %s7919_s10 = inlined_call_operand.vmem [shape: f32[2,4,8], index: 10, kind: input, shape index: {}]   ;;  %s7920_s11 = inlined_call_operand.vmem [shape: f32[10,128], index: 11, kind: input, shape index: {}]   ;;  %s7921_s12 = inlined_call_operand.hbm [shape: f32[2,128], index: 12, kind: output, shape index: {}]  }
   0x1   :  { %v42_v0 = vld [vmem:[%s7912_s3] sm:$0x7f] }
   0x2   :  { %v43_v1 = vld [vmem:[%s7909_s0] sm:$0xff]  ;;  %4315 = vmatpush.msk.msra.mxu0 %vm53_vm0, %v42_v0 }
   0x3   :  { %4316 = vmatmul.msk.f32.vlgmr.msra.gmra.mxu0 %vm46_vm1, %v43_v1 }
   0x4   :  { %17 = vsyncpa [#allocation4], 0  ;;  %v44_v2 = vld [vmem:[%s7909_s0 + $0x8] sm:$0xff]  ;;  %v83_v3 = vld [vmem:[%s7913_s4] sm:$0xff]  ;;  %v45_v4 = vperm.slane %v42_v0, 6  ;;  %vm86_vm2 = vcmask 64512  }
   0x5   :  { %108 = vmatpush.msra.mxu1 %v83_v3  ;;  %v80_v6 = vld [vmem:[%s7911_s2] sm:$0xff]  ;;  %v4687_v12 = vld [vmem:[%s7913_s4 + $0x8] ss:$0 sm:$0xff]  ;;  %s4867_s2 = smov 120   ;;  %s4868_s13 = smov 124   ;;  %vm270_vm3 = vcmask 31744  }
   0x6   :  { %s4869_s14 = smov 112   ;;  %s4870_s15 = smov 108   ;;  %vm752_vm4 = vcmask 1043456   ;;  %vm727_vm5 = vcmask 1041409   ;;  %vm729_vm6 = vcmask 1042434   ;;  %vm731_vm7 = vcmask 1043459  }
   0x7   :  { %vm733_vm8 = vcmask 1044484   ;;  %vm735_vm9 = vcmask 1045509   ;;  %vm737_vm10 = vcmask 1046534   ;;  %vm739_vm11 = vcmask 1047559   ;;  %s4306_s19 = sshll.u32 %s7921_s12, 4  ;;  %s4307_s19 = int_to_ptr.hbm [resolvable:$true] %s4306_s19 }
   0xb   :  { %4317 = vmatmul.msk.f32.gmra.mxu0 %vm46_vm1, %v44_v2 }
  0x80   :  { %v74_v5 = vpop.f32.mrf.mxu0 }
  0x81   :  { %v75_v7 = vadd.f32 %v74_v5, %v45_v4 }
  0x83   :  { %v4954_v8 = vadd.f32 %v80_v6, %v75_v7 }
  0x85   :  { %4318 = vmatmul.msk.f32.vlgmr.msra.gmra.mxu1 %vm86_vm2, %v4954_v8 }
  0x88   :  { %v77_v9 = vpop.f32.mrf.mxu0 }
  0x89   :  { %v78_v10 = vadd.f32 %v77_v9, %v45_v4 }
  0x8b   :  { %v4958_v11 = vadd.f32 %v80_v6, %v78_v10 }
  0x8d   :  { %4319 = vmatmul.msk.f32.gmra.mxu1 %vm86_vm2, %v4958_v11 }
 0x102   :  { %v110_v13 = vpop.f32.mrf.mxu1 }
 0x103   :  { %v4965_v14 = vadd.f32 %v4687_v12, %v110_v13 }
 0x105   :  { %168 = vrot.lane.b32.xlu0 %v4965_v14, %s4867_s2  ;;  %v116_v17 = vmul.f32 0.70710677, %v4965_v14 }
 0x107   :  { %v123_v18 = vrot.slane %v116_v17, 4  ;;  %v121_v19 = vrot.slane %v116_v17, 2  ;;  %v134_v20 = vperm.slane %v116_v17, 0  ;;  %v126_v27 = vrot.slane %v116_v17, 7 }
 0x108   :  { %v120_v28 = vrot.slane %v116_v17, 1  ;;  %v122_v29 = vrot.slane %v116_v17, 3  ;;  %v124_v38 = vrot.slane %v116_v17, 5  ;;  %v125_v39 = vrot.slane %v116_v17, 6 }
 0x109   :  { %v138_v21 = vperm.slane %v123_v18, 0  ;;  %v136_v22 = vperm.slane %v121_v19, 0  ;;  %v141_v31 = vperm.slane %v126_v27, 0 }
 0x10a   :  { %v113_v15 = vpop.f32.mrf.mxu1  ;;  %v135_v32 = vperm.slane %v120_v28, 0  ;;  %v137_v33 = vperm.slane %v122_v29, 0  ;;  %v139_v42 = vperm.slane %v124_v38, 0  ;;  %v140_v43 = vperm.slane %v125_v39, 0 }
 0x10b   :  { %v4969_v16 = vadd.f32 %v4687_v12, %v113_v15 }
 0x10d   :  { %170 = vrot.lane.b32.xlu0 %v4969_v16, %s4867_s2  ;;  %v117_v30 = vmul.f32 0.70710677, %v4969_v16 }
 0x10f   :  { %v128_v37 = vrot.slane %v117_v30, 2  ;;  %v131_v47 = vrot.slane %v117_v30, 5  ;;  %v127_v48 = vrot.slane %v117_v30, 1  ;;  %v142_v50 = vperm.slane %v117_v30, 0 }
 0x110   :  { %v129_v55 = vrot.slane %v117_v30, 3  ;;  %v130_v56 = vrot.slane %v117_v30, 4  ;;  %v132_v61 = vrot.slane %v117_v30, 6  ;;  %v133_v62 = vrot.slane %v117_v30, 7 }
 0x111   :  { %v144_v41 = vperm.slane %v128_v37, 0  ;;  %v147_v49 = vperm.slane %v131_v47, 0  ;;  %v143_v51 = vperm.slane %v127_v48, 0 }
 0x112   :  { %v145_v57 = vperm.slane %v129_v55, 0  ;;  %v146_v58 = vperm.slane %v130_v56, 0  ;;  %v148_v63 = vperm.slane %v132_v61, 0  ;;  %v149_v0 = vperm.slane %v133_v62, 0 }
 0x177   :  { %v169_v23 = vpop.permute.xlu0 %168 }
 0x178   :  { %v4974_v24 = vmul.f32 %v169_v23, %v134_v20  ;;  %v4976_v25 = vmul.f32 %v169_v23, %v138_v21  ;;  %v4978_v26 = vmul.f32 %v169_v23, %v136_v22  ;;  %v4987_v34 = vmul.f32 %v169_v23, %v141_v31 }
 0x179   :  { %v4989_v35 = vmul.f32 %v169_v23, %v135_v32  ;;  %v177_v36 = vmul.f32 %v169_v23, %v137_v33  ;;  %v4998_v45 = vmul.f32 %v169_v23, %v139_v42  ;;  %v180_v46 = vmul.f32 %v169_v23, %v140_v43 }
 0x17a   :  { %206 = vrot.lane.b32.xlu1 %v4974_v24, %s4868_s13  ;;  %214 = vrot.lane.b32.xlu0 %v4976_v25, %s4868_s13 }
 0x17b   :  { %210 = vrot.lane.b32.xlu2 %v4978_v26, %s4868_s13 }
 0x17f   :  { %v171_v40 = vpop.permute.xlu0 %170 }
 0x180   :  { %v4996_v44 = vmul.f32 %v171_v40, %v144_v41  ;;  %v5005_v52 = vmul.f32 %v171_v40, %v147_v49  ;;  %v5007_v53 = vmul.f32 %v171_v40, %v142_v50  ;;  %v183_v54 = vmul.f32 %v171_v40, %v143_v51 }
 0x181   :  { %v5014_v59 = vmul.f32 %v171_v40, %v145_v57  ;;  %v5016_v60 = vmul.f32 %v171_v40, %v146_v58  ;;  %v5024_v1 = vmul.f32 %v171_v40, %v148_v63  ;;  %v5026_v2 = vmul.f32 %v171_v40, %v149_v0 }
 0x182   :  { %220 = vrot.lane.b32.xlu0 %v4987_v34, %s4868_s13  ;;  %208 = vrot.lane.b32.xlu1 %v4989_v35, %s4868_s13 }
 0x183   :  { %212 = vrot.lane.b32.xlu2 %v177_v36, %s4868_s13 }
 0x18a   :  { %226 = vrot.lane.b32.xlu0 %v4996_v44, %s4868_s13  ;;  %216 = vrot.lane.b32.xlu1 %v4998_v45, %s4868_s13 }
 0x18b   :  { %218 = vrot.lane.b32.xlu2 %v180_v46, %s4868_s13 }
 0x192   :  { %232 = vrot.lane.b32.xlu0 %v5005_v52, %s4868_s13  ;;  %222 = vrot.lane.b32.xlu1 %v5007_v53, %s4868_s13 }
 0x193   :  { %224 = vrot.lane.b32.xlu2 %v183_v54, %s4868_s13 }
 0x19a   :  { %577 = vrot.lane.b32.xlu0 %v4965_v14, %s4869_s14  ;;  %228 = vrot.lane.b32.xlu1 %v5014_v59, %s4868_s13 }
 0x19b   :  { %230 = vrot.lane.b32.xlu2 %v5016_v60, %s4868_s13 }
 0x1a2   :  { %784 = vrot.lane.b32.xlu0 %v4969_v16, %s4870_s15  ;;  %234 = vrot.lane.b32.xlu1 %v5024_v1, %s4868_s13 }
 0x1a3   :  { %236 = vrot.lane.b32.xlu2 %v5026_v2, %s4868_s13 }
 0x1aa   :  { %782 = vrot.lane.b32.xlu1 %v4965_v14, %s4870_s15 }
 0x1ab   :  { %579 = vrot.lane.b32.xlu2 %v4969_v16, %s4869_s14 }
 0x1d5   :  { %v211_v3 = vpop.permute.xlu2 %210 }
 0x1d6   :  { %v256_v4 = vadd.f32 %v211_v3, %v4978_v26 }
 0x1d8   :  { %v285_v5 = vsel %vm270_vm3, %v256_v4, -inf }
 0x1d9   :  { %v286_v6 = vrot.slane %v285_v5, 4 }
 0x1db   :  { %v287_v7 = vmax.f32 %v285_v5, %v286_v6 }
 0x1dd   :  { %v288_v9 = vrot.slane %v287_v7, 2  ;;  %v213_v10 = vpop.permute.xlu2 %212 }
 0x1de   :  { %v257_v12 = vadd.f32 %v213_v10, %v177_v36 }
 0x1df   :  { %v289_v13 = vmax.f32 %v287_v7, %v288_v9 }
 0x1e0   :  { %v292_v15 = vsel %vm270_vm3, %v257_v12, -inf }
 0x1e1   :  { %v290_v17 = vrot.slane %v289_v13, 1  ;;  %v293_v18 = vrot.slane %v292_v15, 4 }
 0x1e3   :  { %v291_v14 = vmax.f32 %v289_v13, %v290_v17  ;;  %v294_v19 = vmax.f32 %v292_v15, %v293_v18 }
 0x1e5   :  { %v385_v20 = vsub.f32 %v256_v4, %v291_v14  ;;  %v295_v16 = vrot.slane %v294_v19, 2  ;;  %v219_v21 = vpop.permute.xlu2 %218 }
 0x1e6   :  { %v260_v22 = vadd.f32 %v219_v21, %v180_v46 }
 0x1e7   :  { %v403_v23 = vmul.f32 1.442695, %v385_v20  ;;  %v296_v26 = vmax.f32 %v294_v19, %v295_v16 }
 0x1e8   :  { %v313_v27 = vsel %vm270_vm3, %v260_v22, -inf }
 0x1e9   :  { %4693 = vpow2.f32 %v403_v23  ;;  %v297_v28 = vrot.slane %v296_v26, 1  ;;  %v314_v29 = vrot.slane %v313_v27, 4 }
 0x1eb   :  { %v298_v30 = vmax.f32 %v296_v26, %v297_v28  ;;  %v315_v31 = vmax.f32 %v313_v27, %v314_v29 }
 0x1ec   :  { %v207_v32 = vpop.permute.xlu1 %206  ;;  %v215_v33 = vpop.permute.xlu0 %214 }
 0x1ed   :  { %v386_v36 = vsub.f32 %v257_v12, %v298_v30  ;;  %v316_v37 = vrot.slane %v315_v31, 2  ;;  %v5043_v38 = vadd.f32 %v207_v32, %v4974_v24  ;;  %v5046_v39 = vadd.f32 %v215_v33, %v4976_v25  ;;  %v225_v40 = vpop.permute.xlu2 %224 }
 0x1ee   :  { %v5048_v41 = vadd.f32 %v225_v40, %v183_v54 }
 0x1ef   :  { %v5050_v42 = vpop.eup %4693  ;;  %v405_v43 = vmul.f32 1.442695, %v386_v36  ;;  %v317_v46 = vmax.f32 %v315_v31, %v316_v37  ;;  %v271_v47 = vsel %vm270_vm3, %v5043_v38, -inf  ;;  %v299_v48 = vsel %vm270_vm3, %v5046_v39, -inf }
 0x1f0   :  { %v445_v24 = vsel %vm270_vm3, %v5050_v42, 0.0  ;;  %v272_v49 = vrot.slane %v271_v47, 4  ;;  %v300_v50 = vrot.slane %v299_v48, 4  ;;  %v334_v25 = vsel %vm270_vm3, %v5048_v41, -inf }
 0x1f1   :  { %v446_v51 = vrot.slane %v445_v24, 4  ;;  %4695 = vpow2.f32 %v405_v43  ;;  %v318_v54 = vrot.slane %v317_v46, 1  ;;  %v335_v55 = vrot.slane %v334_v25, 4 }
 0x1f2   :  { %v273_v56 = vmax.f32 %v271_v47, %v272_v49  ;;  %v301_v57 = vmax.f32 %v299_v48, %v300_v50 }
 0x1f3   :  { %v447_v58 = vadd.f32 %v446_v51, %v445_v24  ;;  %v319_v61 = vmax.f32 %v317_v46, %v318_v54  ;;  %v336_v62 = vmax.f32 %v334_v25, %v335_v55 }
 0x1f4   :  { %v274_v63 = vrot.slane %v273_v56, 2  ;;  %v302_v0 = vrot.slane %v301_v57, 2  ;;  %v221_v3 = vpop.permute.xlu0 %220  ;;  %v209_v4 = vpop.permute.xlu1 %208 }
 0x1f5   :  { %v448_v5 = vrot.slane %v447_v58, 2  ;;  %v389_v6 = vsub.f32 %v260_v22, %v319_v61  ;;  %v337_v7 = vrot.slane %v336_v62, 2  ;;  %v5061_v9 = vadd.f32 %v221_v3, %v4987_v34  ;;  %v231_v10 = vpop.permute.xlu2 %230 }
 0x1f6   :  { %v275_v12 = vmax.f32 %v273_v56, %v274_v63  ;;  %v303_v13 = vmax.f32 %v301_v57, %v302_v0  ;;  %v5064_v15 = vadd.f32 %v231_v10, %v5016_v60  ;;  %v5067_v17 = vadd.f32 %v209_v4, %v4989_v35 }
 0x1f7   :  { %v5069_v18 = vpop.eup %4695  ;;  %v449_v14 = vadd.f32 %v448_v5, %v447_v58  ;;  %v411_v19 = vmul.f32 1.442695, %v389_v6  ;;  %v338_v20 = vmax.f32 %v336_v62, %v337_v7  ;;  %v320_v16 = vsel %vm270_vm3, %v5061_v9, -inf }
 0x1f8   :  { %v452_v34 = vsel %vm270_vm3, %v5069_v18, 0.0  ;;  %v276_v21 = vrot.slane %v275_v12, 1  ;;  %v304_v22 = vrot.slane %v303_v13, 1  ;;  %v321_v23 = vrot.slane %v320_v16, 4 }
 0x1f9   :  { %v450_v26 = vrot.slane %v449_v14, 1  ;;  %v453_v60 = vrot.slane %v452_v34, 4  ;;  %4697 = vpow2.f32 %v411_v19  ;;  %v339_v27 = vrot.slane %v338_v20, 1 }
 0x1fa   :  { %v277_v35 = vmax.f32 %v275_v12, %v276_v21  ;;  %v305_v28 = vmax.f32 %v303_v13, %v304_v22  ;;  %v322_v29 = vmax.f32 %v320_v16, %v321_v23  ;;  %v355_v30 = vsel %vm270_vm3, %v5064_v15, -inf }
 0x1fb   :  { %v451_v31 = vadd.f32 %v450_v26, %v449_v14  ;;  %v454_v32 = vadd.f32 %v453_v60, %v452_v34  ;;  %v340_v33 = vmax.f32 %v338_v20, %v339_v27  ;;  %v356_v36 = vrot.slane %v355_v30, 4 }
 0x1fc   :  { %v383_v37 = vsub.f32 %v5043_v38, %v277_v35  ;;  %v387_v40 = vsub.f32 %v5046_v39, %v305_v28  ;;  %v323_v43 = vrot.slane %v322_v29, 2  ;;  %v278_v46 = vsel %vm270_vm3, %v5067_v17, -inf  ;;  %v227_v47 = vpop.permute.xlu0 %226  ;;  %v217_v14 = vpop.permute.xlu1 %216 }
 0x1fd   :  { %4699 = vrcp.f32 %v451_v31  ;;  %v455_v48 = vrot.slane %v454_v32, 2  ;;  %v392_v24 = vsub.f32 %v5048_v41, %v340_v33  ;;  %v357_v49 = vmax.f32 %v355_v30, %v356_v36  ;;  %v237_v3 = vpop.permute.xlu2 %236 }
 0x1fe   :  { %v399_v50 = vmul.f32 1.442695, %v383_v37  ;;  %v407_v25 = vmul.f32 1.442695, %v387_v40  ;;  %v324_v51 = vmax.f32 %v322_v29, %v323_v43  ;;  %v279_v54 = vrot.slane %v278_v46, 4 }
 0x1ff   :  { %v5082_v55 = vpop.eup %4697  ;;  %v456_v56 = vadd.f32 %v455_v48, %v454_v32  ;;  %v417_v38 = vmul.f32 1.442695, %v392_v24  ;;  %v358_v57 = vrot.slane %v357_v49, 2  ;;  %v5085_v39 = vadd.f32 %v227_v47, %v4996_v44 }
 0x200   :  { %v473_v58 = vsel %vm270_vm3, %v5082_v55, 0.0  ;;  %4701 = vpow2.f32 %v399_v50  ;;  %v325_v61 = vrot.slane %v324_v51, 1  ;;  %v280_v62 = vmax.f32 %v278_v46, %v279_v54 }
 0x201   :  { %v457_v41 = vrot.slane %v456_v56, 1  ;;  %v474_v63 = vrot.slane %v473_v58, 4  ;;  %4703 = vpow2.f32 %v407_v25  ;;  %v359_v0 = vmax.f32 %v357_v49, %v358_v57 }
 0x202   :  { %4705 = vpow2.f32 %v417_v38  ;;  %v326_v4 = vmax.f32 %v324_v51, %v325_v61  ;;  %v281_v5 = vrot.slane %v280_v62, 2  ;;  %v341_v6 = vsel %vm270_vm3, %v5085_v39, -inf }
 0x203   :  { %v4700_v7 = vpop.eup %4699  ;;  %v458_v44 = vadd.f32 %v457_v41, %v456_v56  ;;  %v475_v10 = vadd.f32 %v474_v63, %v473_v58  ;;  %v360_v12 = vrot.slane %v359_v0, 1  ;;  %v342_v13 = vrot.slane %v341_v6, 4 }
 0x204   :  { %v390_v19 = vsub.f32 %v5061_v9, %v326_v4  ;;  %v282_v20 = vmax.f32 %v280_v62, %v281_v5  ;;  %v5093_v16 = vadd.f32 %v237_v3, %v5026_v2  ;;  %v5100_v35 = vadd.f32 %v217_v14, %v4998_v45 }
 0x205   :  { %4707 = vrcp.f32 %v458_v44  ;;  %v476_v34 = vrot.slane %v475_v10, 2  ;;  %v361_v21 = vmax.f32 %v359_v0, %v360_v12  ;;  %v343_v22 = vmax.f32 %v341_v6, %v342_v13  ;;  %v233_v0 = vpop.permute.xlu0 %232  ;;  %v223_v6 = vpop.permute.xlu1 %222 }
 0x206   :  { %v5095_v23 = vpop.eup %4701  ;;  %v413_v26 = vmul.f32 1.442695, %v390_v19  ;;  %v283_v60 = vrot.slane %v282_v20, 1  ;;  %v376_v27 = vsel %vm270_vm3, %v5093_v16, -inf  ;;  %v5115_v51 = vmul.f32 %v4700_v7, %v5050_v42 }
 0x207   :  { %v5102_v28 = vpop.eup %4703  ;;  %v477_v9 = vadd.f32 %v476_v34, %v475_v10  ;;  %v431_v2 = vsel %vm270_vm3, %v5095_v23, 0.0  ;;  %v395_v29 = vsub.f32 %v5064_v15, %v361_v21  ;;  %v344_v30 = vrot.slane %v343_v22, 2 }
 0x208   :  { %v5107_v31 = vpop.eup %4705  ;;  %v432_v32 = vrot.slane %v431_v2, 4  ;;  %v459_v33 = vsel %vm270_vm3, %v5102_v28, 0.0  ;;  %4709 = vpow2.f32 %v413_v26  ;;  %v284_v36 = vmax.f32 %v282_v20, %v283_v60 }
 0x209   :  { %v478_v37 = vrot.slane %v477_v9, 1  ;;  %v460_v45 = vrot.slane %v459_v33, 4  ;;  %v494_v40 = vsel %vm270_vm3, %v5107_v31, 0.0  ;;  %v423_v43 = vmul.f32 1.442695, %v395_v29 }
 0x20a   :  { %v433_v46 = vadd.f32 %v432_v32, %v431_v2  ;;  %v495_v47 = vrot.slane %v494_v40, 4  ;;  %v384_v48 = vsub.f32 %v5067_v17, %v284_v36  ;;  %v345_v15 = vmax.f32 %v343_v22, %v344_v30 }
 0x20b   :  { %v4708_v24 = vpop.eup %4707  ;;  %v479_v49 = vadd.f32 %v478_v37, %v477_v9  ;;  %v461_v50 = vadd.f32 %v460_v45, %v459_v33  ;;  %4711 = vpow2.f32 %v423_v43  ;;  %v377_v25 = vrot.slane %v376_v27, 4 }
 0x20c   :  { %v434_v54 = vrot.slane %v433_v46, 2  ;;  %v496_v56 = vadd.f32 %v495_v47, %v494_v40  ;;  %v401_v38 = vmul.f32 1.442695, %v384_v48  ;;  %v346_v58 = vrot.slane %v345_v15, 1 }
 0x20d   :  { %4713 = vrcp.f32 %v479_v49  ;;  %v462_v57 = vrot.slane %v461_v50, 2  ;;  %v378_v61 = vmax.f32 %v376_v27, %v377_v25  ;;  %v306_v63 = vsel %vm270_vm3, %v5100_v35, -inf  ;;  %v5141_v25 = vpop.permute.xlu0 %577 }
 0x20e   :  { %v5117_v62 = vpop.eup %4709  ;;  %v435_v41 = vadd.f32 %v434_v54, %v433_v46  ;;  %v497_v17 = vrot.slane %v496_v56, 2  ;;  %4715 = vpow2.f32 %v401_v38  ;;  %v347_v4 = vmax.f32 %v345_v15, %v346_v58  ;;  %v229_v58 = vpop.permute.xlu1 %228 }
 0x20f   :  { %v463_v3 = vadd.f32 %v462_v57, %v461_v50  ;;  %v480_v42 = vsel %vm270_vm3, %v5117_v62, 0.0  ;;  %v379_v5 = vrot.slane %v378_v61, 2  ;;  %v307_v12 = vrot.slane %v306_v63, 4 }
 0x210   :  { %v436_v7 = vrot.slane %v435_v41, 1  ;;  %v498_v44 = vadd.f32 %v497_v17, %v496_v56  ;;  %v481_v10 = vrot.slane %v480_v42, 4  ;;  %v393_v19 = vsub.f32 %v5085_v39, %v347_v4 }
 0x211   :  { %v5123_v13 = vpop.eup %4711  ;;  %v464_v14 = vrot.slane %v463_v3, 1  ;;  %v380_v20 = vmax.f32 %v378_v61, %v379_v5  ;;  %v5127_v34 = vadd.f32 %v233_v0, %v5005_v52  ;;  %v5134_v33 = vmul.f32 %v4708_v24, %v5069_v18 }
 0x212   :  { %v437_v21 = vadd.f32 %v436_v7, %v435_v41  ;;  %v499_v22 = vrot.slane %v498_v44, 1  ;;  %v482_v26 = vadd.f32 %v481_v10, %v480_v42  ;;  %v515_v60 = vsel %vm270_vm3, %v5123_v13, 0.0 }
 0x213   :  { %v4714_v27 = vpop.eup %4713  ;;  %v465_v9 = vadd.f32 %v464_v14, %v463_v3  ;;  %v516_v2 = vrot.slane %v515_v60, 4  ;;  %v419_v29 = vmul.f32 1.442695, %v393_v19  ;;  %v381_v30 = vrot.slane %v380_v20, 1 }
 0x214   :  { %v5131_v32 = vpop.eup %4715  ;;  %4717 = vrcp.f32 %v437_v21  ;;  %v500_v39 = vadd.f32 %v499_v22, %v498_v44  ;;  %v483_v52 = vrot.slane %v482_v26, 2  ;;  %v308_v46 = vmax.f32 %v306_v63, %v307_v12  ;;  %v5166_v22 = vpop.permute.xlu2 %579 }
 0x215   :  { %4719 = vrcp.f32 %v465_v9  ;;  %v517_v36 = vadd.f32 %v516_v2, %v515_v60  ;;  %v438_v37 = vsel %vm270_vm3, %v5131_v32, 0.0  ;;  %v382_v45 = vmax.f32 %v380_v20, %v381_v30 }
 0x216   :  { %4721 = vrcp.f32 %v500_v39  ;;  %v484_v40 = vadd.f32 %v483_v52, %v482_v26  ;;  %v439_v43 = vrot.slane %v438_v37, 4  ;;  %v362_v18 = vsel %vm270_vm3, %v5127_v34, -inf }
 0x217   :  { %v518_v47 = vrot.slane %v517_v36, 2  ;;  %4723 = vpow2.f32 %v419_v29  ;;  %v398_v48 = vsub.f32 %v5093_v16, %v382_v45  ;;  %v309_v49 = vrot.slane %v308_v46, 2 }
 0x218   :  { %v485_v15 = vrot.slane %v484_v40, 1  ;;  %v440_v24 = vadd.f32 %v439_v43, %v438_v37  ;;  %v363_v50 = vrot.slane %v362_v18, 4  ;;  %v5144_v54 = vmul.f32 %v4714_v27, %v5082_v55 }
 0x219   :  { %v519_v56 = vadd.f32 %v518_v47, %v517_v36  ;;  %v429_v38 = vmul.f32 1.442695, %v398_v48  ;;  %v5147_v57 = vadd.f32 %v223_v6, %v5007_v53  ;;  %v310_v17 = vmax.f32 %v308_v46, %v309_v49 }
 0x21a   :  { %v4718_v61 = vpop.eup %4717  ;;  %v486_v16 = vadd.f32 %v485_v15, %v484_v40  ;;  %v441_v41 = vrot.slane %v440_v24, 2  ;;  %v364_v63 = vmax.f32 %v362_v18, %v363_v50  ;;  %v585_v55 = vmul.f32 %v5141_v25, %v5115_v51  ;;  %v235_v18 = vpop.permute.xlu1 %234 }
 0x21b   :  { %v4720_v0 = vpop.eup %4719  ;;  %v520_v3 = vrot.slane %v519_v56, 1  ;;  %4725 = vpow2.f32 %v429_v38  ;;  %v327_v42 = vsel %vm270_vm3, %v5147_v57, -inf  ;;  %v5154_v5 = vmul.f32 %v4718_v61, %v5095_v23 }
 0x21c   :  { %v4722_v4 = vpop.eup %4721  ;;  %4727 = vrcp.f32 %v486_v16  ;;  %v442_v53 = vadd.f32 %v441_v41, %v440_v24  ;;  %v311_v6 = vrot.slane %v310_v17, 1  ;;  %v365_v12 = vrot.slane %v364_v63, 2 }
 0x21d   :  { %v5156_v7 = vpop.eup %4723  ;;  %v5159_v44 = vmul.f32 %v4722_v4, %v5107_v31  ;;  %v521_v10 = vadd.f32 %v520_v3, %v519_v56  ;;  %v328_v14 = vrot.slane %v327_v42, 4  ;;  %v5162_v19 = vmul.f32 %v4720_v0, %v5102_v28 }
 0x21e   :  { %v443_v20 = vrot.slane %v442_v53, 1  ;;  %v501_v21 = vsel %vm270_vm3, %v5156_v7, 0.0  ;;  %v312_v23 = vmax.f32 %v310_v17, %v311_v6  ;;  %v366_v60 = vmax.f32 %v364_v63, %v365_v12 }
 0x21f   :  { %4729 = vrcp.f32 %v521_v10  ;;  %v502_v26 = vrot.slane %v501_v21, 4  ;;  %v592_v31 = vmul.f32 %v5166_v22, %v5159_v44  ;;  %v329_v2 = vmax.f32 %v327_v42, %v328_v14  ;;  %v5208_v14 = vpop.permute.xlu0 %784 }
 0x220   :  { %v444_v27 = vadd.f32 %v443_v20, %v442_v53  ;;  %v388_v9 = vsub.f32 %v5100_v35, %v312_v23  ;;  %v583_v28 = vmul.f32 %v5141_v25, %v5154_v5  ;;  %v367_v39 = vrot.slane %v366_v60, 1 }
 0x221   :  { %v5173_v29 = vpop.eup %4725  ;;  %v503_v30 = vadd.f32 %v502_v26, %v501_v21  ;;  %v662_v52 = vsel %vm270_vm3, %v592_v31, 0.0  ;;  %v5178_v36 = vmul.f32 %v5141_v25, %v5134_v33  ;;  %v5184_v48 = vmul.f32 %v5141_v25, %v5162_v19 }
 0x222   :  { %v4728_v37 = vpop.eup %4727  ;;  %4731 = vrcp.f32 %v444_v27  ;;  %v536_v45 = vsel %vm270_vm3, %v5173_v29, 0.0  ;;  %v409_v35 = vmul.f32 1.442695, %v388_v9  ;;  %v663_v40 = vrot.slane %v662_v52, 4 }
 0x223   :  { %v504_v43 = vrot.slane %v503_v30, 2  ;;  %v537_v46 = vrot.slane %v536_v45, 4  ;;  %v368_v47 = vmax.f32 %v366_v60, %v367_v39  ;;  %v5187_v15 = vmul.f32 %v4728_v37, %v5117_v62 }
 0x224   :  { %4733 = vpow2.f32 %v409_v35  ;;  %v330_v24 = vrot.slane %v329_v2, 2  ;;  %v599_v49 = vsel %vm270_vm3, %v583_v28, 0.0  ;;  %v5192_v17 = vadd.f32 %v663_v40, %v662_v52 }
 0x225   :  { %v4730_v50 = vpop.eup %4729  ;;  %v505_v56 = vadd.f32 %v504_v43, %v503_v30  ;;  %v538_v38 = vadd.f32 %v537_v46, %v536_v45  ;;  %v396_v61 = vsub.f32 %v5127_v34, %v368_v47  ;;  %v600_v16 = vrot.slane %v599_v49, 4 }
 0x226   :  { %v571_v41 = vmul.f32 %v4730_v50, %v5123_v13  ;;  %v331_v63 = vmax.f32 %v329_v2, %v330_v24  ;;  %v5195_v0 = vadd.f32 %v229_v58, %v5014_v59  ;;  %v5198_v4 = vsel %vm270_vm3, %v585_v55, 0.0 }
 0x227   :  { %v506_v62 = vrot.slane %v505_v56, 1  ;;  %v539_v3 = vrot.slane %v538_v38, 2  ;;  %v425_v42 = vmul.f32 1.442695, %v396_v61  ;;  %v5203_v10 = vadd.f32 %v600_v16, %v599_v49 }
 0x228   :  { %v4732_v53 = vpop.eup %4731  ;;  %v5201_v6 = vmul.f32 %v5166_v22, %v571_v41  ;;  %v332_v34 = vrot.slane %v331_v63, 1  ;;  %v348_v13 = vsel %vm270_vm3, %v5195_v0, -inf  ;;  %v614_v21 = vrot.slane %v5198_v4, 4 }
 0x229   :  { %v560_v12 = vmul.f32 %v4732_v53, %v5131_v32  ;;  %v507_v59 = vadd.f32 %v506_v62, %v505_v56  ;;  %v540_v58 = vadd.f32 %v539_v3, %v538_v38  ;;  %4735 = vpow2.f32 %v425_v42 }
 0x22a   :  { %v5210_v20 = vpop.eup %4733  ;;  %v333_v55 = vmax.f32 %v331_v63, %v332_v34  ;;  %v349_v23 = vrot.slane %v348_v13, 4  ;;  %v797_v26 = vmul.f32 %v5208_v14, %v5159_v44  ;;  %v5222_v37 = vadd.f32 %v235_v18, %v5024_v1  ;;  %v5224_v44 = vpop.permute.xlu1 %782 }
 0x22b   :  { %4737 = vrcp.f32 %v507_v59  ;;  %v541_v60 = vrot.slane %v540_v58, 1  ;;  %v466_v31 = vsel %vm270_vm3, %v5210_v20, 0.0  ;;  %v584_v32 = vmul.f32 %v5141_v25, %v560_v12 }
 0x22c   :  { %v467_v27 = vrot.slane %v466_v31, 4  ;;  %v391_v9 = vsub.f32 %v5147_v57, %v333_v55  ;;  %v350_v2 = vmax.f32 %v348_v13, %v349_v23  ;;  %v867_v28 = vsel %vm270_vm3, %v797_v26, 0.0 }
 0x22d   :  { %v542_v30 = vadd.f32 %v541_v60, %v540_v58  ;;  %v606_v39 = vsel %vm270_vm3, %v584_v32, 0.0  ;;  %v868_v52 = vrot.slane %v867_v28, 4  ;;  %v5229_v57 = vmul.f32 %v5208_v14, %v571_v41 }
 0x22e   :  { %v468_v45 = vadd.f32 %v467_v27, %v466_v31  ;;  %v415_v35 = vmul.f32 1.442695, %v391_v9  ;;  %v607_v40 = vrot.slane %v606_v39, 4  ;;  %v351_v43 = vrot.slane %v350_v2, 2 }
 0x22f   :  { %v5226_v46 = vpop.eup %4735  ;;  %4739 = vrcp.f32 %v542_v30  ;;  %v5231_v47 = vadd.f32 %v868_v52, %v867_v28  ;;  %v369_v24 = vsel %vm270_vm3, %v5222_v37, -inf  ;;  %v788_v18 = vmul.f32 %v5224_v44, %v5154_v5 }
 0x230   :  { %v469_v49 = vrot.slane %v468_v45, 2  ;;  %v522_v1 = vsel %vm270_vm3, %v5226_v46, 0.0  ;;  %4741 = vpow2.f32 %v415_v35  ;;  %v5239_v38 = vadd.f32 %v607_v40, %v606_v39 }
 0x231   :  { %v4738_v50 = vpop.eup %4737  ;;  %v523_v56 = vrot.slane %v522_v1, 4  ;;  %v352_v61 = vmax.f32 %v350_v2, %v351_v43  ;;  %v370_v16 = vrot.slane %v369_v24, 4  ;;  %v789_v62 = vmul.f32 %v5224_v44, %v560_v12 }
 0x232   :  { %v569_v41 = vmul.f32 %v4738_v50, %v5156_v7  ;;  %v470_v63 = vadd.f32 %v469_v49, %v468_v45  ;;  %v790_v3 = vmul.f32 %v5224_v44, %v5115_v51  ;;  %v5247_v5 = vmul.f32 %v5224_v44, %v5134_v33 }
 0x233   :  { %v524_v42 = vadd.f32 %v523_v56, %v522_v1  ;;  %v353_v53 = vrot.slane %v352_v61, 1  ;;  %v371_v34 = vmax.f32 %v369_v24, %v370_v16  ;;  %v804_v7 = vsel %vm270_vm3, %v788_v18, 0.0 }
 0x234   :  { %v471_v13 = vrot.slane %v470_v63, 1  ;;  %v593_v59 = vmul.f32 %v5166_v22, %v569_v41  ;;  %v798_v58 = vmul.f32 %v5208_v14, %v569_v41  ;;  %v5254_v51 = vmul.f32 %v5224_v44, %v5162_v19 }
 0x235   :  { %v4740_v55 = vpop.eup %4739  ;;  %v525_v23 = vrot.slane %v524_v42, 2  ;;  %v354_v12 = vmax.f32 %v352_v61, %v353_v53  ;;  %v372_v26 = vrot.slane %v371_v34, 2  ;;  %v805_v27 = vrot.slane %v804_v7, 4 }
 0x236   :  { %v5256_v60 = vpop.eup %4741  ;;  %v472_v31 = vadd.f32 %v471_v13, %v470_v63  ;;  %v5259_v33 = vsel %vm270_vm3, %v593_v59, 0.0  ;;  %v5262_v32 = vsel %vm270_vm3, %v798_v58, 0.0  ;;  %v5265_v9 = vmul.f32 %v4740_v55, %v5173_v29  ;;  %v575_v29 = vld [vmem:[%s7914_s5] sm:$0xff] }
 0x237   :  { %v526_v2 = vadd.f32 %v525_v23, %v524_v42  ;;  %v487_v28 = vsel %vm270_vm3, %v5256_v60, 0.0  ;;  %v394_v19 = vsub.f32 %v5195_v0, %v354_v12  ;;  %v670_v30 = vrot.slane %v5259_v33, 4  ;;  %4320 = vmatpush.msk.msra.mxu2 %vm752_vm4, %v575_v29 }
 0x238   :  { %4743 = vrcp.f32 %v472_v31  ;;  %v488_v39 = vrot.slane %v487_v28, 4  ;;  %v373_v52 = vmax.f32 %v371_v34, %v372_v26  ;;  %v875_v40 = vrot.slane %v5262_v32, 4 }
 0x239   :  { %v527_v45 = vrot.slane %v526_v2, 1  ;;  %v421_v35 = vmul.f32 1.442695, %v394_v19  ;;  %v811_v43 = vsel %vm270_vm3, %v789_v62, 0.0  ;;  %v5277_v0 = vsel %vm270_vm3, %v790_v3, 0.0 }
 0x23a   :  { %v489_v24 = vadd.f32 %v488_v39, %v487_v28  ;;  %v374_v49 = vrot.slane %v373_v52, 1  ;;  %v812_v1 = vrot.slane %v811_v43, 4  ;;  %v5279_v50 = vadd.f32 %v805_v27, %v804_v7 }
 0x23b   :  { %v528_v18 = vadd.f32 %v527_v45, %v526_v2  ;;  %4745 = vpow2.f32 %v421_v35  ;;  %v819_v16 = vrot.slane %v5277_v0, 4  ;;  %v946_v41 = vrot.slane %v575_v29, 4 }
 0x23c   :  { %v490_v56 = vrot.slane %v489_v24, 2  ;;  %v375_v61 = vmax.f32 %v373_v52, %v374_v49  ;;  %v5283_v63 = vadd.f32 %v812_v1, %v811_v43  ;;  %v589_v62 = vmul.f32 %v5141_v25, %v5144_v54 }
 0x23d   :  { %4747 = vrcp.f32 %v528_v18  ;;  %v602_v3 = vrot.slane %v5203_v10, 2  ;;  %4323 = vmatpush.msk.msra.mxu3 %vm752_vm4, %v946_v41  ;;  %v609_v13 = vrot.slane %v5239_v38, 2  ;;  %v615_v59 = vadd.f32 %v614_v21, %v5198_v4 }
 0x23e   :  { %v4744_v42 = vpop.eup %4743  ;;  %v491_v53 = vadd.f32 %v490_v56, %v489_v24  ;;  %v397_v34 = vsub.f32 %v5222_v37, %v375_v61  ;;  %v620_v55 = vsel %vm270_vm3, %v5178_v36, 0.0  ;;  %v627_v23 = vsel %vm270_vm3, %v5184_v48, 0.0 }
 0x23f   :  { %v5295_v58 = vmul.f32 %v4744_v42, %v5210_v20  ;;  %v603_v7 = vadd.f32 %v602_v3, %v5203_v10  ;;  %v610_v26 = vadd.f32 %v609_v13, %v5239_v38  ;;  %v616_v31 = vrot.slane %v615_v59, 2 }
 0x240   :  { %v492_v37 = vrot.slane %v491_v53, 1  ;;  %v427_v12 = vmul.f32 1.442695, %v397_v34  ;;  %v621_v21 = vrot.slane %v620_v55, 4  ;;  %v628_v2 = vrot.slane %v627_v23, 4 }
 0x241   :  { %v5303_v27 = vpop.eup %4745  ;;  %v588_v4 = vmul.f32 %v5141_v25, %v5295_v58  ;;  %v604_v20 = vrot.slane %v603_v7, 1  ;;  %v590_v48 = vmul.f32 %v5141_v25, %v5187_v15  ;;  %v611_v38 = vrot.slane %v610_v26, 1 }
 0x242   :  { %v493_v10 = vadd.f32 %v492_v37, %v491_v53  ;;  %v508_v36 = vsel %vm270_vm3, %v5303_v27, 0.0  ;;  %4749 = vpow2.f32 %v427_v12  ;;  %v617_v39 = vadd.f32 %v616_v31, %v615_v59 }
 0x243   :  { %v4748_v28 = vpop.eup %4747  ;;  %v509_v19 = vrot.slane %v508_v36, 4  ;;  %v622_v52 = vadd.f32 %v621_v21, %v620_v55  ;;  %v605_v35 = vadd.f32 %v604_v20, %v603_v7  ;;  %v629_v43 = vadd.f32 %v628_v2, %v627_v23 }
 0x244   :  { %v5312_v45 = vmul.f32 %v4748_v28, %v5226_v46  ;;  %4751 = vrcp.f32 %v493_v10  ;;  %v618_v24 = vrot.slane %v617_v39, 1  ;;  %v634_v1 = vsel %vm270_vm3, %v588_v4, 0.0 }
 0x245   :  { %v510_v29 = vadd.f32 %v509_v19, %v508_v36  ;;  %v623_v49 = vrot.slane %v622_v52, 2  ;;  %v630_v18 = vrot.slane %v629_v43, 2  ;;  %v635_v56 = vrot.slane %v634_v1, 4 }
 0x246   :  { %v641_v25 = vsel %vm270_vm3, %v589_v62, 0.0  ;;  %v648_v61 = vsel %vm270_vm3, %v590_v48, 0.0  ;;  %v612_v3 = vadd.f32 %v611_v38, %v610_v26  ;;  %v619_v34 = vadd.f32 %v618_v24, %v617_v39 }
 0x247   :  { %v511_v41 = vrot.slane %v510_v29, 2  ;;  %v624_v42 = vadd.f32 %v623_v49, %v622_v52  ;;  %v642_v53 = vrot.slane %v641_v25, 4  ;;  %v631_v13 = vadd.f32 %v630_v18, %v629_v43 }
 0x248   :  { %v5317_v46 = vpop.eup %4749  ;;  %v636_v59 = vadd.f32 %v635_v56, %v634_v1  ;;  %v649_v7 = vrot.slane %v648_v61, 4  ;;  %v728_v1 = vsel %vm727_vm5, %v612_v3, %v605_v35 }
 0x249   :  { %v512_v55 = vadd.f32 %v511_v41, %v510_v29  ;;  %v529_v23 = vsel %vm270_vm3, %v5317_v46, 0.0  ;;  %v625_v37 = vrot.slane %v624_v42, 1  ;;  %v643_v12 = vadd.f32 %v642_v53, %v641_v25 }
 0x24a   :  { %v4752_v31 = vpop.eup %4751  ;;  %v530_v62 = vrot.slane %v529_v23, 4  ;;  %v637_v4 = vrot.slane %v636_v59, 2  ;;  %v650_v20 = vadd.f32 %v649_v7, %v648_v61  ;;  %v632_v2 = vrot.slane %v631_v13, 1 }
 0x24b   :  { %v567_v26 = vmul.f32 %v4752_v31, %v5256_v60  ;;  %v513_v21 = vrot.slane %v512_v55, 1  ;;  %v644_v10 = vrot.slane %v643_v12, 2  ;;  %v626_v48 = vadd.f32 %v625_v37, %v624_v42 }
 0x24c   :  { %v531_v36 = vadd.f32 %v530_v62, %v529_v23  ;;  %v638_v28 = vadd.f32 %v637_v4, %v636_v59  ;;  %v651_v19 = vrot.slane %v650_v20, 2  ;;  %v633_v42 = vadd.f32 %v632_v2, %v631_v13 }
 0x24d   :  { %v591_v38 = vmul.f32 %v5166_v22, %v567_v26  ;;  %v514_v39 = vadd.f32 %v513_v21, %v512_v55  ;;  %v796_v52 = vmul.f32 %v5208_v14, %v567_v26  ;;  %v645_v43 = vadd.f32 %v644_v10, %v643_v12 }
 0x24e   :  { %v532_v29 = vrot.slane %v531_v36, 2  ;;  %v639_v24 = vrot.slane %v638_v28, 1  ;;  %v652_v49 = vadd.f32 %v651_v19, %v650_v20  ;;  %v730_v37 = vsel %vm729_vm6, %v619_v34, %v728_v1 }
 0x24f   :  { %v655_v60 = vsel %vm270_vm3, %v591_v38, 0.0  ;;  %4753 = vrcp.f32 %v514_v39  ;;  %v860_v18 = vsel %vm270_vm3, %v796_v52, 0.0  ;;  %v646_v56 = vrot.slane %v645_v43, 1 }
 0x250   :  { %v656_v25 = vrot.slane %v655_v60, 4  ;;  %v861_v61 = vrot.slane %v860_v18, 4  ;;  %v533_v41 = vadd.f32 %v532_v29, %v531_v36  ;;  %v640_v53 = vadd.f32 %v639_v24, %v638_v28 }
 0x251   :  { %v653_v59 = vrot.slane %v652_v49, 1  ;;  %v647_v23 = vadd.f32 %v646_v56, %v645_v43  ;;  %v732_v3 = vsel %vm731_vm7, %v626_v48, %v730_v37  ;;  %v793_v26 = vmul.f32 %v5224_v44, %v5295_v58 }
 0x252   :  { %v657_v7 = vadd.f32 %v656_v25, %v655_v60  ;;  %v534_v55 = vrot.slane %v533_v41, 1  ;;  %v5328_v35 = vadd.f32 %v861_v61, %v860_v18  ;;  %v734_v62 = vsel %vm733_vm8, %v633_v42, %v732_v3 }
 0x253   :  { %v654_v4 = vadd.f32 %v653_v59, %v652_v49  ;;  %v736_v20 = vsel %vm735_vm9, %v640_v53, %v734_v62  ;;  %v794_v36 = vmul.f32 %v5224_v44, %v5144_v54  ;;  %v807_v48 = vrot.slane %v5279_v50, 2 }
 0x254   :  { %v658_v12 = vrot.slane %v657_v7, 2  ;;  %v535_v31 = vadd.f32 %v534_v55, %v533_v41  ;;  %v738_v2 = vsel %vm737_vm10, %v647_v23, %v736_v20  ;;  %v814_v28 = vrot.slane %v5283_v63, 2 }
 0x255   :  { %v4754_v13 = vpop.eup %4753  ;;  %v740_v10 = vsel %vm739_vm11, %v654_v4, %v738_v2  ;;  %v795_v58 = vmul.f32 %v5224_v44, %v5187_v15  ;;  %v808_v39 = vadd.f32 %v807_v48, %v5279_v50  ;;  %v825_v52 = vsel %vm270_vm3, %v5247_v5, 0.0 }
 0x256   :  { %v659_v34 = vadd.f32 %v658_v12, %v657_v7  ;;  %v570_v21 = vmul.f32 %v4754_v13, %v5303_v27  ;;  %4755 = vrcp.f32 %v535_v31  ;;  %4321 = vmatmul.msk.f32.vlgmr.msra.gmra.mxu2 %vm270_vm3, %v740_v10  ;;  %v820_v27 = vadd.f32 %v819_v16, %v5277_v0 }
 0x257   :  { %v815_v54 = vadd.f32 %v814_v28, %v5283_v63  ;;  %v832_v43 = vsel %vm270_vm3, %v5254_v51, 0.0  ;;  %v826_v44 = vrot.slane %v825_v52, 4  ;;  %v809_v1 = vrot.slane %v808_v39, 1 }
 0x258   :  { %v660_v19 = vrot.slane %v659_v34, 1  ;;  %v594_v38 = vmul.f32 %v5166_v22, %v570_v21  ;;  %v5357_v24 = vmul.f32 %v5208_v14, %v570_v21  ;;  %v821_v15 = vrot.slane %v820_v27, 2 }
 0x259   :  { %v816_v0 = vrot.slane %v815_v54, 1  ;;  %v833_v16 = vrot.slane %v832_v43, 4  ;;  %v827_v63 = vadd.f32 %v826_v44, %v825_v52  ;;  %v839_v18 = vsel %vm270_vm3, %v793_v26, 0.0 }
 0x25a   :  { %v676_v29 = vsel %vm270_vm3, %v594_v38, 0.0  ;;  %v822_v60 = vadd.f32 %v821_v15, %v820_v27  ;;  %v846_v5 = vsel %vm270_vm3, %v794_v36, 0.0  ;;  %v5361_v56 = vadd.f32 %v660_v19, %v659_v34 }
 0x25b   :  { %v677_v49 = vrot.slane %v676_v29, 4  ;;  %v817_v61 = vadd.f32 %v816_v0, %v815_v54  ;;  %v828_v42 = vrot.slane %v827_v63, 2  ;;  %v834_v53 = vadd.f32 %v833_v16, %v832_v43 }
 0x25c   :  { %v4756_v50 = vpop.eup %4755  ;;  %v823_v41 = vrot.slane %v822_v60, 1  ;;  %v840_v59 = vrot.slane %v839_v18, 4  ;;  %v810_v23 = vadd.f32 %v809_v1, %v808_v39  ;;  %v847_v37 = vrot.slane %v846_v5, 4 }
 0x25d   :  { %v678_v51 = vadd.f32 %v677_v49, %v676_v29  ;;  %v5364_v25 = vmul.f32 %v4756_v50, %v5317_v46  ;;  %v829_v12 = vadd.f32 %v828_v42, %v827_v63  ;;  %v835_v31 = vrot.slane %v834_v53, 2 }
 0x25e   :  { %v824_v3 = vadd.f32 %v823_v41, %v822_v60  ;;  %v841_v62 = vadd.f32 %v840_v59, %v839_v18  ;;  %v848_v13 = vadd.f32 %v847_v37, %v846_v5  ;;  %v853_v4 = vsel %vm270_vm3, %v795_v58, 0.0 }
 0x25f   :  { %v679_v7 = vrot.slane %v678_v51, 2  ;;  %v597_v55 = vmul.f32 %v5166_v22, %v5364_v25  ;;  %v932_v46 = vsel %vm727_vm5, %v817_v61, %v810_v23  ;;  %v596_v20 = vmul.f32 %v5166_v22, %v5312_v45 }
 0x260   :  { %v830_v26 = vrot.slane %v829_v12, 1  ;;  %v836_v34 = vadd.f32 %v835_v31, %v834_v53  ;;  %v842_v21 = vrot.slane %v841_v62, 2  ;;  %v854_v2 = vrot.slane %v853_v4, 4 }
 0x261   :  { %v849_v10 = vrot.slane %v848_v13, 2  ;;  %v933_v36 = vsel %vm729_vm6, %v824_v3, %v932_v46  ;;  %v598_v48 = vmul.f32 %v5166_v22, %v5265_v9  ;;  %v665_v28 = vrot.slane %v5192_v17, 2 }
 0x262   :  { %v831_v19 = vadd.f32 %v830_v26, %v829_v12  ;;  %v837_v38 = vrot.slane %v836_v34, 1  ;;  %v843_v58 = vadd.f32 %v842_v21, %v841_v62  ;;  %v855_v27 = vadd.f32 %v854_v2, %v853_v4 }
 0x263   :  { %v850_v39 = vadd.f32 %v849_v10, %v848_v13  ;;  %v666_v54 = vadd.f32 %v665_v28, %v5192_v17  ;;  %v671_v52 = vadd.f32 %v670_v30, %v5259_v33  ;;  %v680_v43 = vadd.f32 %v679_v7, %v678_v51 }
 0x264   :  { %v838_v29 = vadd.f32 %v837_v38, %v836_v34  ;;  %v844_v15 = vrot.slane %v843_v58, 1  ;;  %v856_v44 = vrot.slane %v855_v27, 2  ;;  %v934_v49 = vsel %vm731_vm7, %v831_v19, %v933_v36 }
 0x265   :  { %v851_v22 = vrot.slane %v850_v39, 1  ;;  %v667_v1 = vrot.slane %v666_v54, 1  ;;  %v672_v0 = vrot.slane %v671_v52, 2  ;;  %v681_v16 = vrot.slane %v680_v43, 1 }
 0x266   :  { %v845_v50 = vadd.f32 %v844_v15, %v843_v58  ;;  %v857_v60 = vadd.f32 %v856_v44, %v855_v27  ;;  %v935_v63 = vsel %vm733_vm8, %v838_v29, %v934_v49  ;;  %v683_v17 = vsel %vm270_vm3, %v5201_v6, 0.0 }
 0x267   :  { %v852_v18 = vadd.f32 %v851_v22, %v850_v39  ;;  %v668_v5 = vadd.f32 %v667_v1, %v666_v54  ;;  %v673_v33 = vadd.f32 %v672_v0, %v671_v52  ;;  %v682_v30 = vadd.f32 %v681_v16, %v680_v43 }
 0x268   :  { %v858_v51 = vrot.slane %v857_v60, 1  ;;  %v936_v61 = vsel %vm735_vm9, %v845_v50, %v935_v63  ;;  %v684_v41 = vrot.slane %v683_v17, 4  ;;  %v690_v42 = vsel %vm270_vm3, %v596_v20, 0.0 }
 0x269   :  { %v937_v53 = vsel %vm737_vm10, %v852_v18, %v936_v61  ;;  %v674_v59 = vrot.slane %v673_v33, 1  ;;  %v691_v7 = vrot.slane %v690_v42, 4  ;;  %v697_v23 = vsel %vm270_vm3, %v597_v55, 0.0 }
 0x26a   :  { %v859_v37 = vadd.f32 %v858_v51, %v857_v60  ;;  %v685_v3 = vadd.f32 %v684_v41, %v683_v17  ;;  %v698_v12 = vrot.slane %v697_v23, 4  ;;  %v704_v6 = vsel %vm270_vm3, %v598_v48, 0.0 }
 0x26b   :  { %v675_v31 = vadd.f32 %v674_v59, %v673_v33  ;;  %v692_v62 = vadd.f32 %v691_v7, %v690_v42  ;;  %v705_v13 = vrot.slane %v704_v6, 4  ;;  %v741_v4 = vsel %vm727_vm5, %v668_v5, %v5361_v56 }
 0x26c   :  { %v802_v46 = vmul.f32 %v5208_v14, %v5364_v25  ;;  %v938_v20 = vsel %vm739_vm11, %v859_v37, %v937_v53  ;;  %v686_v26 = vrot.slane %v685_v3, 2  ;;  %v699_v34 = vadd.f32 %v698_v12, %v697_v23 }
 0x26d   :  { %4324 = vmatmul.msk.f32.vlgmr.msra.gmra.mxu3 %vm270_vm3, %v938_v20  ;;  %v693_v55 = vrot.slane %v692_v62, 2  ;;  %v706_v21 = vadd.f32 %v705_v13, %v704_v6  ;;  %v742_v2 = vsel %vm729_vm6, %v675_v31, %v741_v4  ;;  %v801_v10 = vmul.f32 %v5208_v14, %v5312_v45 }
 0x26e   :  { %v687_v36 = vadd.f32 %v686_v26, %v685_v3  ;;  %v700_v48 = vrot.slane %v699_v34, 2  ;;  %v743_v56 = vsel %vm731_vm7, %v682_v30, %v742_v2  ;;  %v863_v28 = vrot.slane %v5328_v35, 2 }
 0x26f   :  { %v694_v25 = vadd.f32 %v693_v55, %v692_v62  ;;  %v707_v19 = vrot.slane %v706_v21, 2  ;;  %v870_v38 = vrot.slane %v5231_v47, 2  ;;  %v876_v58 = vadd.f32 %v875_v40, %v5262_v32 }
 0x270   :  { %v688_v27 = vrot.slane %v687_v36, 1  ;;  %v701_v39 = vadd.f32 %v700_v48, %v699_v34  ;;  %v864_v54 = vadd.f32 %v863_v28, %v5328_v35  ;;  %v881_v45 = vsel %vm270_vm3, %v5357_v24, 0.0 }
 0x271   :  { %v695_v52 = vrot.slane %v694_v25, 1  ;;  %v708_v43 = vadd.f32 %v707_v19, %v706_v21  ;;  %v871_v29 = vadd.f32 %v870_v38, %v5231_v47  ;;  %v877_v15 = vrot.slane %v876_v58, 2 }
 0x272   :  { %v689_v44 = vadd.f32 %v688_v27, %v687_v36  ;;  %v702_v49 = vrot.slane %v701_v39, 1  ;;  %v865_v22 = vrot.slane %v864_v54, 1  ;;  %v882_v1 = vrot.slane %v881_v45, 4 }
 0x273   :  { %v696_v0 = vadd.f32 %v695_v52, %v694_v25  ;;  %v709_v16 = vrot.slane %v708_v43, 1  ;;  %v803_v32 = vmul.f32 %v5208_v14, %v5265_v9  ;;  %v872_v40 = vrot.slane %v871_v29, 1 }
 0x274   :  { %v703_v50 = vadd.f32 %v702_v49, %v701_v39  ;;  %v744_v35 = vsel %vm733_vm8, %v689_v44, %v743_v56  ;;  %v878_v60 = vadd.f32 %v877_v15, %v876_v58  ;;  %v883_v24 = vadd.f32 %v882_v1, %v881_v45 }
 0x275   :  { %v710_v63 = vadd.f32 %v709_v16, %v708_v43  ;;  %v745_v17 = vsel %vm735_vm9, %v696_v0, %v744_v35  ;;  %v866_v47 = vadd.f32 %v865_v22, %v864_v54  ;;  %v888_v33 = vsel %vm270_vm3, %v5229_v57, 0.0  ;;  %v4688_v43 = vld [vmem:[%s7914_s5 + $0x8] ss:$0 sm:$0xff] }
 0x276   :  { %v746_v18 = vsel %vm737_vm10, %v703_v50, %v745_v17  ;;  %v884_v5 = vrot.slane %v883_v24, 2  ;;  %v895_v30 = vsel %vm270_vm3, %v801_v10, 0.0  ;;  %v873_v9 = vadd.f32 %v872_v40, %v871_v29 }
 0x277   :  { %v747_v14 = vsel %vm739_vm11, %v710_v63, %v746_v18  ;;  %v889_v51 = vrot.slane %v888_v33, 4  ;;  %v896_v61 = vrot.slane %v895_v30, 4  ;;  %v879_v41 = vrot.slane %v878_v60, 1 }
 0x278   :  { %4322 = vmatmul.msk.f32.gmra.mxu2 %vm270_vm3, %v747_v14  ;;  %v885_v42 = vadd.f32 %v884_v5, %v883_v24  ;;  %v902_v53 = vsel %vm270_vm3, %v802_v46, 0.0  ;;  %v909_v59 = vsel %vm270_vm3, %v803_v32, 0.0  ;;  %v939_v12 = vsel %vm727_vm5, %v873_v9, %v866_v47 }
 0x279   :  { %v890_v7 = vadd.f32 %v889_v51, %v888_v33  ;;  %v897_v23 = vadd.f32 %v896_v61, %v895_v30  ;;  %v903_v37 = vrot.slane %v902_v53, 4  ;;  %v910_v3 = vrot.slane %v909_v59, 4 }
 0x27a   :  { %v886_v57 = vrot.slane %v885_v42, 1  ;;  %v880_v4 = vadd.f32 %v879_v41, %v878_v60  ;;  %v4871_v60 = vmov 8.0  }
 0x27b   :  { %v891_v6 = vrot.slane %v890_v7, 2  ;;  %v898_v31 = vrot.slane %v897_v23, 2  ;;  %v904_v62 = vadd.f32 %v903_v37, %v902_v53  ;;  %v911_v13 = vadd.f32 %v910_v3, %v909_v59 }
 0x27c   :  { %v887_v20 = vadd.f32 %v886_v57, %v885_v42  ;;  %v940_v46 = vsel %vm729_vm6, %v880_v4, %v939_v12  ;;  %4757 = vrcp.f32 %v4871_v60  ;;  %v978_v12 = vld [vmem:[%s7919_s10] sm:$0xf]  ;;  %v1039_v4 = vld [vmem:[%s7915_s6 + $0x8] sm:$0xff]  ;;  %v1543_v60 = vld [vmem:[%s7917_s8 + $0x178] sm:$0xff] }
 0x27d   :  { %v892_v26 = vadd.f32 %v891_v6, %v890_v7  ;;  %v899_v34 = vadd.f32 %v898_v31, %v897_v23  ;;  %v905_v55 = vrot.slane %v904_v62, 2  ;;  %v912_v21 = vrot.slane %v911_v13, 2  ;;  %1134 = vmatpush.msrb.mxu1 %v1039_v4  ;;  %v1536_v4 = vld [vmem:[%s7917_s8 + $0x140] sm:$0xff] }
 0x27e   :  { %v941_v56 = vsel %vm731_vm7, %v887_v20, %v940_v46  ;;  %v1040_v20 = vld [vmem:[%s7915_s6 + $0x10] sm:$0xff]  ;;  %v1035_v46 = vperm.slane %v978_v12, 1 }
 0x27f   :  { %v893_v2 = vrot.slane %v892_v26, 1  ;;  %v900_v10 = vrot.slane %v899_v34, 1  ;;  %v906_v36 = vadd.f32 %v905_v55, %v904_v62  ;;  %v913_v48 = vadd.f32 %v912_v21, %v911_v13  ;;  %v1038_v13 = vld [vmem:[%s7915_s6] sm:$0xff]  ;;  %v1044_v55 = vld [vmem:[%s7915_s6 + $0x30] sm:$0xff]  ;;  %v1045_v21 = vld [vmem:[%s7915_s6 + $0x38] sm:$0xff]  ;;  %1157 = vmatpush.msrb.mxu2 %v1040_v20 }
 0x280   :  { %v1032_v62 = vperm.slane %v978_v12, 0  ;;  %1111 = vmatpush.msrb.mxu0 %v1038_v13  ;;  %v1521_v12 = vld [vmem:[%s7917_s8 + $0xc8] sm:$0xff]  ;;  %v1520_v13 = vld [vmem:[%s7917_s8 + $0xc0] sm:$0xff] }
 0x281   :  { %v894_v28 = vadd.f32 %v893_v2, %v892_v26  ;;  %v907_v25 = vrot.slane %v906_v36, 1  ;;  %v914_v19 = vrot.slane %v913_v48, 1  ;;  %v901_v38 = vadd.f32 %v900_v10, %v899_v34  ;;  %v1041_v34 = vld [vmem:[%s7915_s6 + $0x18] sm:$0xff]  ;;  %1249 = vmatpush.msra.mxu2 %v1044_v55  ;;  %v1042_v10 = vld [vmem:[%s7915_s6 + $0x20] sm:$0xff] }
 0x282   :  { %v4758_v24 = vpop.eup %4757  ;;  %1180 = vmatpush.msrb.mxu3 %v1041_v34  ;;  %1203 = vmatpush.msra.mxu0 %v1042_v10  ;;  %v1552_v20 = vld [vmem:[%s7917_s8 + $0x1c0] sm:$0xff]  ;;  %v1519_v34 = vld [vmem:[%s7917_s8 + $0xb8] sm:$0xff]  ;;  %v1534_v10 = vld [vmem:[%s7917_s8 + $0x130] sm:$0xff] }
 0x283   :  { %v908_v58 = vadd.f32 %v907_v25, %v906_v36  ;;  %v942_v27 = vsel %vm733_vm8, %v894_v28, %v941_v56  ;;  %v915_v39 = vadd.f32 %v914_v19, %v913_v48  ;;  %v988_v63 = vmul.f32 8.0, %v4758_v24  ;;  %v1043_v36 = vld [vmem:[%s7915_s6 + $0x28] sm:$0xff]  ;;  %v1535_v55 = vld [vmem:[%s7917_s8 + $0x138] sm:$0xff] }
 0x284   :  { %v943_v54 = vsel %vm735_vm9, %v901_v38, %v942_v27  ;;  %vm992_vm12 = vweird.f32 %v4758_v24  ;;  %1272 = vmatpush.msra.mxu3 %v1045_v21  ;;  %1226 = vmatpush.msra.mxu1 %v1043_v36  ;;  %v1048_v38 = vld [vmem:[%s7915_s6 + $0x50] sm:$0xff]  ;;  %v1551_v21 = vld [vmem:[%s7917_s8 + $0x1b8] sm:$0xff] }
 0x285   :  { %v944_v45 = vsel %vm737_vm10, %v908_v58, %v943_v54  ;;  %v989_v17 = vsub.f32 1.0, %v988_v63  ;;  %v1049_v58 = vld [vmem:[%s7915_s6 + $0x58] sm:$0xff]  ;;  %v1510_v63 = vld [vmem:[%s7917_s8 + $0x70] sm:$0xff] }
 0x286   :  { %v945_v52 = vsel %vm739_vm11, %v915_v39, %v944_v45  ;;  %v1046_v45 = vld [vmem:[%s7915_s6 + $0x40] sm:$0xff]  ;;  %v1550_v36 = vld [vmem:[%s7917_s8 + $0x1b0] sm:$0xff] }
 0x287   :  { %4325 = vmatmul.msk.f32.gmra.mxu3 %vm270_vm3, %v945_v52  ;;  %v990_v47 = vmul.f32 %v4758_v24, %v989_v17  ;;  %v1047_v52 = vld [vmem:[%s7915_s6 + $0x48] sm:$0xff]  ;;  %v1526_v17 = vld [vmem:[%s7917_s8 + $0xf0] sm:$0xff] }
 0x289   :  { %v991_v18 = vadd.f32 %v4758_v24, %v990_v47  ;;  %v1542_v47 = vld [vmem:[%s7917_s8 + $0x170] sm:$0xff] }
 0x2d9   :  { %v773_v29 = vpop.f32.mrf.mxu2 }
 0x2da   :  { %v780_v15 = vadd.f32 %v4688_v43, %v773_v29 }
 0x2f0   :  { %v970_v44 = vpop.f32.mrf.mxu3 }
 0x2f1   :  { %v976_v49 = vadd.f32 %v970_v44, %v780_v15 }
 0x2f3   :  { %v979_v22 = vadd.f32 %v976_v49, %v4954_v8  ;;  %v5435_v8 = vsel %vm992_vm12, %v4758_v24, %v991_v18  ;;  %v1559_v24 = vld [vmem:[%s7917_s8 + $0x1f8] sm:$0xff]  ;;  %v1558_v18 = vld [vmem:[%s7917_s8 + $0x1f0] sm:$0xff] }
 0x2f5   :  { %v981_v1 = vsel %vm86_vm2, %v979_v22, 0.0 }
 0x2f6   :  { %982 = vadd.xlane.f32.xlu1 %v981_v1 }
 0x2fb   :  { %v776_v0 = vpop.f32.mrf.mxu2 }
 0x2fc   :  { %v781_v16 = vadd.f32 %v4688_v43, %v776_v0  ;;  %v1052_v0 = vld [vmem:[%s7915_s6 + $0x70] sm:$0xff] }
 0x30a   :  { %v973_v32 = vpop.f32.mrf.mxu3 }
 0x30b   :  { %v977_v40 = vadd.f32 %v973_v32, %v781_v16  ;;  %v1053_v16 = vld [vmem:[%s7915_s6 + $0x78] sm:$0xff]  ;;  %v1050_v32 = vld [vmem:[%s7915_s6 + $0x60] sm:$0xff] }
 0x30d   :  { %v980_v50 = vadd.f32 %v977_v40, %v4958_v11  ;;  %v1051_v40 = vld [vmem:[%s7915_s6 + $0x68] sm:$0xff] }
 0x30f   :  { %v984_v35 = vsel %vm86_vm2, %v980_v50, 0.0 }
 0x310   :  { %985 = vadd.xlane.f32.xlu2 %v984_v35  ;;  %v1527_v35 = vld [vmem:[%s7917_s8 + $0xf8] sm:$0xff] }
 0x369   :  { %v983_v5 = vpop.xlane.xlu1 %982 }
 0x36a   :  { %v994_v33 = vmul.f32 %v5435_v8, %v983_v5  ;;  %v1509_v5 = vld [vmem:[%s7917_s8 + $0x68] sm:$0xff] }
 0x36c   :  { %v996_v30 = vsub.f32 %v979_v22, %v994_v33  ;;  %v1525_v33 = vld [vmem:[%s7917_s8 + $0xe8] sm:$0xff] }
 0x36e   :  { %v998_v14 = vmul.f32 %v996_v30, %v996_v30 }
 0x370   :  { %v1000_v11 = vsel %vm86_vm2, %v998_v14, 0.0  ;;  %v1557_v14 = vld [vmem:[%s7917_s8 + $0x1e8] sm:$0xff] }
 0x371   :  { %1001 = vadd.xlane.f32.xlu0 %v1000_v11  ;;  %v1508_v11 = vld [vmem:[%s7917_s8 + $0x60] sm:$0xff] }
 0x383   :  { %v986_v9 = vpop.xlane.xlu2 %985 }
 0x384   :  { %v995_v51 = vmul.f32 %v5435_v8, %v986_v9  ;;  %v1524_v9 = vld [vmem:[%s7917_s8 + $0xe0] sm:$0xff] }
 0x386   :  { %v5440_v61 = vsub.f32 %v980_v50, %v995_v51  ;;  %v1511_v50 = vld [vmem:[%s7917_s8 + $0x78] sm:$0xff]  ;;  %v1540_v51 = vld [vmem:[%s7917_s8 + $0x160] sm:$0xff] }
 0x388   :  { %v999_v41 = vmul.f32 %v5440_v61, %v5440_v61 }
 0x38a   :  { %v1003_v42 = vsel %vm86_vm2, %v999_v41, 0.0  ;;  %v1507_v41 = vld [vmem:[%s7917_s8 + $0x58] sm:$0xff] }
 0x38b   :  { %1004 = vadd.xlane.f32.xlu2 %v1003_v42  ;;  %v1523_v42 = vld [vmem:[%s7917_s8 + $0xd8] sm:$0xff] }
 0x3e4   :  { %v1002_v53 = vpop.xlane.xlu0 %1001 }
 0x3e5   :  { %v1006_v59 = vmul.f32 %v1002_v53, %v5435_v8  ;;  %v1539_v53 = vld [vmem:[%s7917_s8 + $0x158] sm:$0xff] }
 0x3e7   :  { %v1008_v7 = vadd.f32 1e-05, %v1006_v59  ;;  %v1555_v59 = vld [vmem:[%s7917_s8 + $0x1d8] sm:$0xff] }
 0x3e9   :  { %4759 = vrsqrt.f32 %v1008_v7  ;;  %vm1016_vm14 = vweird.f32 %v1008_v7 }
 0x3ef   :  { %v4760_v23 = vpop.eup %4759 }
 0x3f0   :  { %v1011_v37 = vmul.f32 %v4760_v23, %v1008_v7  ;;  %vm1017_vm13 = vweird.f32 %v4760_v23  ;;  %v1506_v7 = vld [vmem:[%s7917_s8 + $0x50] sm:$0xff] }
 0x3f1   :  { %vm1018_vm15 = vmor %vm1016_vm14, %vm1017_vm13 }
 0x3f2   :  { %v1012_v3 = vmul.f32 %v4760_v23, %v1011_v37  ;;  %v1538_v37 = vld [vmem:[%s7917_s8 + $0x150] sm:$0xff] }
 0x3f4   :  { %v1013_v57 = vmul.f32 0.5, %v1012_v3  ;;  %v1554_v3 = vld [vmem:[%s7917_s8 + $0x1d0] sm:$0xff] }
 0x3f6   :  { %v1014_v6 = vsub.f32 1.5, %v1013_v57  ;;  %v1505_v57 = vld [vmem:[%s7917_s8 + $0x48] sm:$0xff] }
 0x3f8   :  { %v1015_v31 = vmul.f32 %v4760_v23, %v1014_v6  ;;  %v1537_v6 = vld [vmem:[%s7917_s8 + $0x148] sm:$0xff] }
 0x3fa   :  { %v1019_v26 = vsel %vm1018_vm15, %v4760_v23, %v1015_v31  ;;  %v1522_v23 = vld [vmem:[%s7917_s8 + $0xd0] sm:$0xff]  ;;  %v1553_v31 = vld [vmem:[%s7917_s8 + $0x1c8] sm:$0xff] }
 0x3fb   :  { %v1030_v2 = vmul.f32 %v1019_v26, %v996_v30  ;;  %v1541_v30 = vld [vmem:[%s7917_s8 + $0x168] sm:$0xff]  ;;  %v1503_v26 = vld [vmem:[%s7917_s8 + $0x38] sm:$0xff] }
 0x3fd   :  { %v1033_v48 = vmul.f32 %v1032_v62, %v1030_v2  ;;  %v1518_v2 = vld [vmem:[%s7917_s8 + $0xb0] sm:$0xff] }
 0x3fe   :  { %v1005_v56 = vpop.xlane.xlu2 %1004 }
 0x3ff   :  { %v5473_v28 = vadd.f32 %v1035_v46, %v1033_v48  ;;  %v1007_v25 = vmul.f32 %v1005_v56, %v5435_v8  ;;  %v1501_v48 = vld [vmem:[%s7917_s8 + $0x28] sm:$0xff] }
 0x400   :  { %v1517_v56 = vld [vmem:[%s7917_s8 + $0xa8] sm:$0xff] }
 0x401   :  { %v1009_v19 = vadd.f32 1e-05, %v1007_v25  ;;  %4326 = vmatmul.msk.f32.vlgmr.msrb.gmra.mxu0 %vm86_vm2, %v5473_v28  ;;  %4328 = vmatmul.msk.f32.vlgmr.msrb.gmra.mxu1 %vm86_vm2, %v5473_v28  ;;  %v1533_v25 = vld [vmem:[%s7917_s8 + $0x128] sm:$0xff] }
 0x402   :  { %4330 = vmatmul.msk.f32.vlgmr.msrb.gmra.mxu2 %vm86_vm2, %v5473_v28  ;;  %4332 = vmatmul.msk.f32.vlgmr.msrb.gmra.mxu3 %vm86_vm2, %v5473_v28 }
 0x403   :  { %4761 = vrsqrt.f32 %v1009_v19  ;;  %1341 = vmatpush.msrb.mxu2 %v1048_v38  ;;  %1364 = vmatpush.msrb.mxu3 %v1049_v58  ;;  %vm1026_vm1 = vweird.f32 %v1009_v19  ;;  %v1500_v38 = vld [vmem:[%s7917_s8 + $0x20] sm:$0xff] }
 0x404   :  { %1295 = vmatpush.msrb.mxu0 %v1046_v45  ;;  %1318 = vmatpush.msrb.mxu1 %v1047_v52  ;;  %v1516_v58 = vld [vmem:[%s7917_s8 + $0xa0] sm:$0xff]  ;;  %v1515_v45 = vld [vmem:[%s7917_s8 + $0x98] sm:$0xff] }
 0x405   :  { %v1531_v52 = vld [vmem:[%s7917_s8 + $0x118] sm:$0xff] }
 0x409   :  { %v4762_v27 = vpop.eup %4761 }
 0x40a   :  { %v1021_v39 = vmul.f32 %v4762_v27, %v1009_v19  ;;  %vm1027_vm0 = vweird.f32 %v4762_v27  ;;  %v1549_v19 = vld [vmem:[%s7917_s8 + $0x1a8] sm:$0xff] }
 0x40b   :  { %vm1028_vm12 = vmor %vm1026_vm1, %vm1027_vm0 }
 0x40c   :  { %v1022_v54 = vmul.f32 %v4762_v27, %v1021_v39  ;;  %v1548_v39 = vld [vmem:[%s7917_s8 + $0x1a0] sm:$0xff] }
 0x40e   :  { %v1023_v43 = vmul.f32 0.5, %v1022_v54  ;;  %v1499_v54 = vld [vmem:[%s7917_s8 + $0x18] sm:$0xff] }
 0x410   :  { %v1024_v29 = vsub.f32 1.5, %v1023_v43  ;;  %v1547_v43 = vld [vmem:[%s7917_s8 + $0x198] sm:$0xff] }
 0x412   :  { %v1025_v15 = vmul.f32 %v4762_v27, %v1024_v29  ;;  %v1498_v29 = vld [vmem:[%s7917_s8 + $0x10] sm:$0xff] }
 0x414   :  { %v1029_v44 = vsel %vm1028_vm12, %v4762_v27, %v1025_v15  ;;  %v1532_v27 = vld [vmem:[%s7917_s8 + $0x120] sm:$0xff]  ;;  %v1514_v15 = vld [vmem:[%s7917_s8 + $0x90] sm:$0xff] }
 0x415   :  { %v1031_v49 = vmul.f32 %v1029_v44, %v5440_v61  ;;  %v1556_v61 = vld [vmem:[%s7917_s8 + $0x1e0] sm:$0xff]  ;;  %v1530_v44 = vld [vmem:[%s7917_s8 + $0x110] sm:$0xff] }
 0x417   :  { %v1034_v22 = vmul.f32 %v1032_v62, %v1031_v49  ;;  %v1504_v62 = vld [vmem:[%s7917_s8 + $0x40] sm:$0xff]  ;;  %v1546_v49 = vld [vmem:[%s7917_s8 + $0x190] sm:$0xff] }
 0x419   :  { %v5497_v1 = vadd.f32 %v1035_v46, %v1034_v22  ;;  %v1502_v46 = vld [vmem:[%s7917_s8 + $0x30] sm:$0xff]  ;;  %v1497_v22 = vld [vmem:[%s7917_s8 + $0x8] sm:$0xff] }
 0x41b   :  { %4327 = vmatmul.msk.f32.gmra.mxu0 %vm86_vm2, %v5497_v1  ;;  %4329 = vmatmul.msk.f32.gmra.mxu1 %vm86_vm2, %v5497_v1 }
 0x41c   :  { %4331 = vmatmul.msk.f32.gmra.mxu2 %vm86_vm2, %v5497_v1  ;;  %4333 = vmatmul.msk.f32.gmra.mxu3 %vm86_vm2, %v5497_v1 }
 0x423   :  { %4334 = vmatmul.msk.f32.vlgmr.msra.gmra.mxu0 %vm86_vm2, %v5473_v28  ;;  %4336 = vmatmul.msk.f32.vlgmr.msra.gmra.mxu1 %vm86_vm2, %v5473_v28 }
 0x424   :  { %4338 = vmatmul.msk.f32.vlgmr.msra.gmra.mxu2 %vm86_vm2, %v5473_v28  ;;  %4340 = vmatmul.msk.f32.vlgmr.msra.gmra.mxu3 %vm86_vm2, %v5473_v28 }
 0x425   :  { %1433 = vmatpush.msra.mxu2 %v1052_v0  ;;  %1456 = vmatpush.msra.mxu3 %v1053_v16  ;;  %v1513_v0 = vld [vmem:[%s7917_s8 + $0x88] sm:$0xff] }
 0x426   :  { %1387 = vmatpush.msra.mxu0 %v1050_v32  ;;  %1410 = vmatpush.msra.mxu1 %v1051_v40  ;;  %v1529_v16 = vld [vmem:[%s7917_s8 + $0x108] sm:$0xff]  ;;  %v1496_v40 = vld [vmem:[%s7917_s8] sm:$0xff] }
 0x427   :  { %v1545_v32 = vld [vmem:[%s7917_s8 + $0x188] sm:$0xff] }
 0x42b   :  { %4335 = vmatmul.msk.f32.gmra.mxu0 %vm86_vm2, %v5497_v1  ;;  %4337 = vmatmul.msk.f32.gmra.mxu1 %vm86_vm2, %v5497_v1 }
 0x42c   :  { %4339 = vmatmul.msk.f32.gmra.mxu2 %vm86_vm2, %v5497_v1  ;;  %4341 = vmatmul.msk.f32.gmra.mxu3 %vm86_vm2, %v5497_v1 }
 0x433   :  { %4342 = vmatmul.msk.f32.vlgmr.msrb.gmra.mxu0 %vm86_vm2, %v5473_v28  ;;  %4344 = vmatmul.msk.f32.vlgmr.msrb.gmra.mxu1 %vm86_vm2, %v5473_v28 }
 0x434   :  { %4346 = vmatmul.msk.f32.vlgmr.msrb.gmra.mxu2 %vm86_vm2, %v5473_v28  ;;  %4348 = vmatmul.msk.f32.vlgmr.msrb.gmra.mxu3 %vm86_vm2, %v5473_v28 }
 0x435   :  { %1756 = vmatpush.msrb.mxu0 %v1511_v50  ;;  %1779 = vmatpush.msrb.mxu1 %v1527_v35  ;;  %v1512_v50 = vld [vmem:[%s7917_s8 + $0x80] sm:$0xff]  ;;  %v1575_v35 = vld [vmem:[%s7917_s8 + $0x278] sm:$0xff] }
 0x436   :  { %1802 = vmatpush.msrb.mxu2 %v1543_v60  ;;  %1825 = vmatpush.msrb.mxu3 %v1559_v24  ;;  %v1591_v60 = vld [vmem:[%s7917_s8 + $0x2f8] sm:$0xff]  ;;  %v1528_v24 = vld [vmem:[%s7917_s8 + $0x100] sm:$0xff] }
 0x437   :  { %1757 = vmatpush.msrb.mxu0 %v1510_v63  ;;  %1780 = vmatpush.msrb.mxu1 %v1526_v17  ;;  %v1544_v63 = vld [vmem:[%s7917_s8 + $0x180] sm:$0xff]  ;;  %v1574_v17 = vld [vmem:[%s7917_s8 + $0x270] sm:$0xff] }
 0x438   :  { %1803 = vmatpush.msrb.mxu2 %v1542_v47  ;;  %1826 = vmatpush.msrb.mxu3 %v1558_v18  ;;  %v1590_v47 = vld [vmem:[%s7917_s8 + $0x2f0] sm:$0xff]  ;;  %v1607_v18 = vld [vmem:[%s7917_s8 + $0x378] sm:$0xff] }
 0x439   :  { %1758 = vmatpush.msrb.mxu0 %v1509_v5  ;;  %1781 = vmatpush.msrb.mxu1 %v1525_v33  ;;  %v1623_v5 = vld [vmem:[%s7917_s8 + $0x3f8] sm:$0xff]  ;;  %v1573_v33 = vld [vmem:[%s7917_s8 + $0x268] sm:$0xff] }
 0x43a   :  { %1804 = vmatpush.msrb.mxu2 %v1541_v30  ;;  %1827 = vmatpush.msrb.mxu3 %v1557_v14  ;;  %v1589_v30 = vld [vmem:[%s7917_s8 + $0x2e8] sm:$0xff]  ;;  %v1606_v14 = vld [vmem:[%s7917_s8 + $0x370] sm:$0xff] }
 0x43b   :  { %4343 = vmatmul.msk.f32.gmra.mxu0 %vm86_vm2, %v5497_v1  ;;  %4345 = vmatmul.msk.f32.gmra.mxu1 %vm86_vm2, %v5497_v1 }
 0x43c   :  { %4347 = vmatmul.msk.f32.gmra.mxu2 %vm86_vm2, %v5497_v1  ;;  %4349 = vmatmul.msk.f32.gmra.mxu3 %vm86_vm2, %v5497_v1 }
 0x43d   :  { %1759 = vmatpush.msrb.mxu0 %v1508_v11  ;;  %1782 = vmatpush.msrb.mxu1 %v1524_v9  ;;  %v1622_v11 = vld [vmem:[%s7917_s8 + $0x3f0] sm:$0xff]  ;;  %v1572_v9 = vld [vmem:[%s7917_s8 + $0x260] sm:$0xff] }
 0x43e   :  { %1805 = vmatpush.msrb.mxu2 %v1540_v51  ;;  %1828 = vmatpush.msrb.mxu3 %v1556_v61  ;;  %v1588_v51 = vld [vmem:[%s7917_s8 + $0x2e0] sm:$0xff]  ;;  %v1605_v61 = vld [vmem:[%s7917_s8 + $0x368] sm:$0xff] }
 0x43f   :  { %1760 = vmatpush.msrb.mxu0 %v1507_v41  ;;  %1783 = vmatpush.msrb.mxu1 %v1523_v42  ;;  %v1621_v41 = vld [vmem:[%s7917_s8 + $0x3e8] sm:$0xff]  ;;  %v1571_v42 = vld [vmem:[%s7917_s8 + $0x258] sm:$0xff] }
 0x440   :  { %1806 = vmatpush.msrb.mxu2 %v1539_v53  ;;  %1829 = vmatpush.msrb.mxu3 %v1555_v59  ;;  %v1587_v53 = vld [vmem:[%s7917_s8 + $0x2d8] sm:$0xff]  ;;  %v1604_v59 = vld [vmem:[%s7917_s8 + $0x360] sm:$0xff] }
 0x441   :  { %1761 = vmatpush.msrb.mxu0 %v1506_v7  ;;  %1784 = vmatpush.msrb.mxu1 %v1522_v23  ;;  %v1620_v7 = vld [vmem:[%s7917_s8 + $0x3e0] sm:$0xff]  ;;  %v1570_v23 = vld [vmem:[%s7917_s8 + $0x250] sm:$0xff] }
 0x442   :  { %1807 = vmatpush.msrb.mxu2 %v1538_v37  ;;  %1830 = vmatpush.msrb.mxu3 %v1554_v3  ;;  %v1586_v37 = vld [vmem:[%s7917_s8 + $0x2d0] sm:$0xff]  ;;  %v1603_v3 = vld [vmem:[%s7917_s8 + $0x358] sm:$0xff] }
 0x443   :  { %4350 = vmatmul.msk.f32.vlgmr.msra.gmra.mxu0 %vm86_vm2, %v5473_v28  ;;  %4352 = vmatmul.msk.f32.vlgmr.msra.gmra.mxu1 %vm86_vm2, %v5473_v28 }
 0x444   :  { %4354 = vmatmul.msk.f32.vlgmr.msra.gmra.mxu2 %vm86_vm2, %v5473_v28  ;;  %4356 = vmatmul.msk.f32.vlgmr.msra.gmra.mxu3 %vm86_vm2, %v5473_v28 }
 0x445   :  { %1762 = vmatpush.msrb.mxu0 %v1505_v57  ;;  %1785 = vmatpush.msrb.mxu1 %v1521_v12  ;;  %v1619_v57 = vld [vmem:[%s7917_s8 + $0x3d8] sm:$0xff]  ;;  %v1569_v12 = vld [vmem:[%s7917_s8 + $0x248] sm:$0xff] }
 0x446   :  { %1808 = vmatpush.msrb.mxu2 %v1537_v6  ;;  %1831 = vmatpush.msrb.mxu3 %v1553_v31  ;;  %v1585_v6 = vld [vmem:[%s7917_s8 + $0x2c8] sm:$0xff]  ;;  %v1602_v31 = vld [vmem:[%s7917_s8 + $0x350] sm:$0xff] }
 0x447   :  { %1763 = vmatpush.msrb.mxu0 %v1504_v62  ;;  %1786 = vmatpush.msrb.mxu1 %v1520_v13  ;;  %v1618_v62 = vld [vmem:[%s7917_s8 + $0x3d0] sm:$0xff]  ;;  %v1568_v13 = vld [vmem:[%s7917_s8 + $0x240] sm:$0xff] }
 0x448   :  { %1809 = vmatpush.msrb.mxu2 %v1536_v4  ;;  %1832 = vmatpush.msrb.mxu3 %v1552_v20  ;;  %v1584_v4 = vld [vmem:[%s7917_s8 + $0x2c0] sm:$0xff]  ;;  %v1601_v20 = vld [vmem:[%s7917_s8 + $0x348] sm:$0xff] }
 0x449   :  { %1764 = vmatpush.msrb.mxu0 %v1503_v26  ;;  %1787 = vmatpush.msrb.mxu1 %v1519_v34  ;;  %v1617_v26 = vld [vmem:[%s7917_s8 + $0x3c8] sm:$0xff]  ;;  %v1567_v34 = vld [vmem:[%s7917_s8 + $0x238] sm:$0xff] }
 0x44a   :  { %1810 = vmatpush.msrb.mxu2 %v1535_v55  ;;  %1833 = vmatpush.msrb.mxu3 %v1551_v21  ;;  %v1583_v55 = vld [vmem:[%s7917_s8 + $0x2b8] sm:$0xff]  ;;  %v1600_v21 = vld [vmem:[%s7917_s8 + $0x340] sm:$0xff] }
 0x44b   :  { %4351 = vmatmul.msk.f32.gmra.mxu0 %vm86_vm2, %v5497_v1  ;;  %4353 = vmatmul.msk.f32.gmra.mxu1 %vm86_vm2, %v5497_v1 }
 0x44c   :  { %4355 = vmatmul.msk.f32.gmra.mxu2 %vm86_vm2, %v5497_v1  ;;  %4357 = vmatmul.msk.f32.gmra.mxu3 %vm86_vm2, %v5497_v1 }
 0x44d   :  { %1765 = vmatpush.msrb.mxu0 %v1502_v46  ;;  %1788 = vmatpush.msrb.mxu1 %v1518_v2  ;;  %v1616_v46 = vld [vmem:[%s7917_s8 + $0x3c0] sm:$0xff]  ;;  %v1566_v2 = vld [vmem:[%s7917_s8 + $0x230] sm:$0xff] }
 0x44e   :  { %1811 = vmatpush.msrb.mxu2 %v1534_v10  ;;  %1834 = vmatpush.msrb.mxu3 %v1550_v36  ;;  %v1582_v10 = vld [vmem:[%s7917_s8 + $0x2b0] sm:$0xff]  ;;  %v1599_v36 = vld [vmem:[%s7917_s8 + $0x338] sm:$0xff] }
 0x44f   :  { %1766 = vmatpush.msrb.mxu0 %v1501_v48  ;;  %1789 = vmatpush.msrb.mxu1 %v1517_v56  ;;  %v1615_v48 = vld [vmem:[%s7917_s8 + $0x3b8] sm:$0xff]  ;;  %v1565_v56 = vld [vmem:[%s7917_s8 + $0x228] sm:$0xff] }
 0x450   :  { %1812 = vmatpush.msrb.mxu2 %v1533_v25  ;;  %1835 = vmatpush.msrb.mxu3 %v1549_v19  ;;  %v1581_v25 = vld [vmem:[%s7917_s8 + $0x2a8] sm:$0xff]  ;;  %v1598_v19 = vld [vmem:[%s7917_s8 + $0x330] sm:$0xff] }
 0x451   :  { %1767 = vmatpush.msrb.mxu0 %v1500_v38  ;;  %1790 = vmatpush.msrb.mxu1 %v1516_v58  ;;  %v1614_v38 = vld [vmem:[%s7917_s8 + $0x3b0] sm:$0xff]  ;;  %v1564_v58 = vld [vmem:[%s7917_s8 + $0x220] sm:$0xff] }
 0x452   :  { %1813 = vmatpush.msrb.mxu2 %v1532_v27  ;;  %1836 = vmatpush.msrb.mxu3 %v1548_v39  ;;  %v1580_v27 = vld [vmem:[%s7917_s8 + $0x2a0] sm:$0xff]  ;;  %v1597_v39 = vld [vmem:[%s7917_s8 + $0x328] sm:$0xff] }
 0x453   :  { %1768 = vmatpush.msrb.mxu0 %v1499_v54  ;;  %1791 = vmatpush.msrb.mxu1 %v1515_v45  ;;  %v1613_v54 = vld [vmem:[%s7917_s8 + $0x3a8] sm:$0xff]  ;;  %v1563_v45 = vld [vmem:[%s7917_s8 + $0x218] sm:$0xff] }
 0x454   :  { %1814 = vmatpush.msrb.mxu2 %v1531_v52  ;;  %1837 = vmatpush.msrb.mxu3 %v1547_v43  ;;  %v1579_v52 = vld [vmem:[%s7917_s8 + $0x298] sm:$0xff]  ;;  %v1596_v43 = vld [vmem:[%s7917_s8 + $0x320] sm:$0xff] }
 0x455   :  { %1769 = vmatpush.msrb.mxu0 %v1498_v29  ;;  %1792 = vmatpush.msrb.mxu1 %v1514_v15  ;;  %v1612_v29 = vld [vmem:[%s7917_s8 + $0x3a0] sm:$0xff]  ;;  %v1562_v15 = vld [vmem:[%s7917_s8 + $0x210] sm:$0xff] }
 0x456   :  { %1815 = vmatpush.msrb.mxu2 %v1530_v44  ;;  %1838 = vmatpush.msrb.mxu3 %v1546_v49  ;;  %v1578_v44 = vld [vmem:[%s7917_s8 + $0x290] sm:$0xff]  ;;  %v1595_v49 = vld [vmem:[%s7917_s8 + $0x318] sm:$0xff] }
 0x457   :  { %1770 = vmatpush.msrb.mxu0 %v1497_v22  ;;  %1793 = vmatpush.msrb.mxu1 %v1513_v0  ;;  %v1611_v22 = vld [vmem:[%s7917_s8 + $0x398] sm:$0xff]  ;;  %v1561_v0 = vld [vmem:[%s7917_s8 + $0x208] sm:$0xff] }
 0x458   :  { %1816 = vmatpush.msrb.mxu2 %v1529_v16  ;;  %1839 = vmatpush.msrb.mxu3 %v1545_v32  ;;  %v1577_v16 = vld [vmem:[%s7917_s8 + $0x288] sm:$0xff]  ;;  %v1594_v32 = vld [vmem:[%s7917_s8 + $0x310] sm:$0xff] }
 0x459   :  { %1771 = vmatpush.msrb.mxu0 %v1496_v40  ;;  %1794 = vmatpush.msrb.mxu1 %v1512_v50  ;;  %v1610_v40 = vld [vmem:[%s7917_s8 + $0x390] sm:$0xff]  ;;  %v1560_v50 = vld [vmem:[%s7917_s8 + $0x200] sm:$0xff] }
 0x45a   :  { %1817 = vmatpush.msrb.mxu2 %v1528_v24  ;;  %1840 = vmatpush.msrb.mxu3 %v1544_v63  ;;  %v1609_v24 = vld [vmem:[%s7917_s8 + $0x388] sm:$0xff]  ;;  %v5948_v63 = vld [vmem:[%s7916_s7] sm:$0xff] }
 0x45b   :  { %1848 = vmatpush.msra.mxu0 %v1575_v35  ;;  %1871 = vmatpush.msra.mxu1 %v1591_v60  ;;  %v1576_v35 = vld [vmem:[%s7917_s8 + $0x280] sm:$0xff]  ;;  %v1593_v60 = vld [vmem:[%s7917_s8 + $0x308] sm:$0xff] }
 0x45c   :  { %1894 = vmatpush.msra.mxu2 %v1607_v18  ;;  %1917 = vmatpush.msra.mxu3 %v1623_v5  ;;  %v1058_v18 = vperm.slane %v5948_v63, 0  ;;  %v1059_v5 = vperm.slane %v5948_v63, 1 }
 0x45d   :  { %1849 = vmatpush.msra.mxu0 %v1574_v17  ;;  %1872 = vmatpush.msra.mxu1 %v1590_v47  ;;  %v1592_v17 = vld [vmem:[%s7917_s8 + $0x300] sm:$0xff] }
 0x45e   :  { %1895 = vmatpush.msra.mxu2 %v1606_v14  ;;  %1918 = vmatpush.msra.mxu3 %v1622_v11  ;;  %v1608_v47 = vld [vmem:[%s7917_s8 + $0x380] sm:$0xff] }
 0x45f   :  { %1850 = vmatpush.msra.mxu0 %v1573_v33  ;;  %1873 = vmatpush.msra.mxu1 %v1589_v30 }
 0x460   :  { %1896 = vmatpush.msra.mxu2 %v1605_v61  ;;  %1919 = vmatpush.msra.mxu3 %v1621_v41  ;;  %v1639_v61 = vld [vmem:[%s7917_s8 + $0x478] sm:$0xff] }
 0x461   :  { %1851 = vmatpush.msra.mxu0 %v1572_v9  ;;  %1874 = vmatpush.msra.mxu1 %v1588_v51  ;;  %v1655_v41 = vld [vmem:[%s7917_s8 + $0x4f8] sm:$0xff] }
 0x462   :  { %1897 = vmatpush.msra.mxu2 %v1604_v59  ;;  %1920 = vmatpush.msra.mxu3 %v1620_v7  ;;  %v1638_v59 = vld [vmem:[%s7917_s8 + $0x470] sm:$0xff] }
 0x463   :  { %1852 = vmatpush.msra.mxu0 %v1571_v42  ;;  %1875 = vmatpush.msra.mxu1 %v1587_v53  ;;  %v1060_v42 = vperm.slane %v5948_v63, 2  ;;  %v1061_v53 = vperm.slane %v5948_v63, 3  ;;  %v1654_v7 = vld [vmem:[%s7917_s8 + $0x4f0] sm:$0xff] }
 0x464   :  { %1898 = vmatpush.msra.mxu2 %v1603_v3  ;;  %1921 = vmatpush.msra.mxu3 %v1619_v57  ;;  %v1637_v3 = vld [vmem:[%s7917_s8 + $0x468] sm:$0xff] }
 0x465   :  { %1853 = vmatpush.msra.mxu0 %v1570_v23  ;;  %1876 = vmatpush.msra.mxu1 %v1586_v37  ;;  %v1653_v57 = vld [vmem:[%s7917_s8 + $0x4e8] sm:$0xff] }
 0x466   :  { %1899 = vmatpush.msra.mxu2 %v1602_v31  ;;  %1922 = vmatpush.msra.mxu3 %v1618_v62 }
 0x467   :  { %1854 = vmatpush.msra.mxu0 %v1569_v12  ;;  %1877 = vmatpush.msra.mxu1 %v1585_v6 }
 0x468   :  { %1900 = vmatpush.msra.mxu2 %v1601_v20  ;;  %1923 = vmatpush.msra.mxu3 %v1617_v26  ;;  %v1671_v20 = vld [vmem:[%s7917_s8 + $0x578] sm:$0xff] }
 0x469   :  { %1855 = vmatpush.msra.mxu0 %v1568_v13  ;;  %1878 = vmatpush.msra.mxu1 %v1584_v4  ;;  %v1636_v13 = vld [vmem:[%s7917_s8 + $0x460] sm:$0xff]  ;;  %v1687_v26 = vld [vmem:[%s7917_s8 + $0x5f8] sm:$0xff] }
 0x46a   :  { %1901 = vmatpush.msra.mxu2 %v1600_v21  ;;  %1924 = vmatpush.msra.mxu3 %v1616_v46  ;;  %v1652_v4 = vld [vmem:[%s7917_s8 + $0x4e0] sm:$0xff]  ;;  %v1670_v21 = vld [vmem:[%s7917_s8 + $0x570] sm:$0xff] }
 0x46b   :  { %1856 = vmatpush.msra.mxu0 %v1567_v34  ;;  %1879 = vmatpush.msra.mxu1 %v1583_v55  ;;  %v1635_v34 = vld [vmem:[%s7917_s8 + $0x458] sm:$0xff]  ;;  %v1686_v46 = vld [vmem:[%s7917_s8 + $0x5f0] sm:$0xff] }
 0x46c   :  { %1902 = vmatpush.msra.mxu2 %v1599_v36  ;;  %1925 = vmatpush.msra.mxu3 %v1615_v48  ;;  %v1651_v55 = vld [vmem:[%s7917_s8 + $0x4d8] sm:$0xff]  ;;  %v1669_v36 = vld [vmem:[%s7917_s8 + $0x568] sm:$0xff] }
 0x46d   :  { %1857 = vmatpush.msra.mxu0 %v1566_v2  ;;  %1880 = vmatpush.msra.mxu1 %v1582_v10  ;;  %v1634_v2 = vld [vmem:[%s7917_s8 + $0x450] sm:$0xff]  ;;  %v1685_v48 = vld [vmem:[%s7917_s8 + $0x5e8] sm:$0xff] }
 0x46e   :  { %1903 = vmatpush.msra.mxu2 %v1598_v19  ;;  %1926 = vmatpush.msra.mxu3 %v1614_v38  ;;  %v1650_v10 = vld [vmem:[%s7917_s8 + $0x4d0] sm:$0xff]  ;;  %v1668_v19 = vld [vmem:[%s7917_s8 + $0x560] sm:$0xff] }
 0x46f   :  { %1858 = vmatpush.msra.mxu0 %v1565_v56  ;;  %1881 = vmatpush.msra.mxu1 %v1581_v25  ;;  %v1633_v56 = vld [vmem:[%s7917_s8 + $0x448] sm:$0xff]  ;;  %v1684_v38 = vld [vmem:[%s7917_s8 + $0x5e0] sm:$0xff] }
 0x470   :  { %1904 = vmatpush.msra.mxu2 %v1597_v39  ;;  %1927 = vmatpush.msra.mxu3 %v1613_v54  ;;  %v1649_v25 = vld [vmem:[%s7917_s8 + $0x4c8] sm:$0xff]  ;;  %v1667_v39 = vld [vmem:[%s7917_s8 + $0x558] sm:$0xff] }
 0x471   :  { %1859 = vmatpush.msra.mxu0 %v1564_v58  ;;  %1882 = vmatpush.msra.mxu1 %v1580_v27  ;;  %v1632_v58 = vld [vmem:[%s7917_s8 + $0x440] sm:$0xff]  ;;  %v1683_v54 = vld [vmem:[%s7917_s8 + $0x5d8] sm:$0xff] }
 0x472   :  { %1905 = vmatpush.msra.mxu2 %v1596_v43  ;;  %1928 = vmatpush.msra.mxu3 %v1612_v29  ;;  %v1648_v27 = vld [vmem:[%s7917_s8 + $0x4c0] sm:$0xff]  ;;  %v1666_v43 = vld [vmem:[%s7917_s8 + $0x550] sm:$0xff] }
 0x473   :  { %1860 = vmatpush.msra.mxu0 %v1563_v45  ;;  %1883 = vmatpush.msra.mxu1 %v1579_v52  ;;  %v1631_v45 = vld [vmem:[%s7917_s8 + $0x438] sm:$0xff]  ;;  %v1682_v29 = vld [vmem:[%s7917_s8 + $0x5d0] sm:$0xff] }
 0x474   :  { %1906 = vmatpush.msra.mxu2 %v1595_v49  ;;  %1929 = vmatpush.msra.mxu3 %v1611_v22  ;;  %v1647_v52 = vld [vmem:[%s7917_s8 + $0x4b8] sm:$0xff]  ;;  %v1665_v49 = vld [vmem:[%s7917_s8 + $0x548] sm:$0xff] }
 0x475   :  { %1861 = vmatpush.msra.mxu0 %v1562_v15  ;;  %1884 = vmatpush.msra.mxu1 %v1578_v44  ;;  %v1630_v15 = vld [vmem:[%s7917_s8 + $0x430] sm:$0xff]  ;;  %v1681_v22 = vld [vmem:[%s7917_s8 + $0x5c8] sm:$0xff] }
 0x476   :  { %1907 = vmatpush.msra.mxu2 %v1594_v32  ;;  %1930 = vmatpush.msra.mxu3 %v1610_v40  ;;  %v1646_v44 = vld [vmem:[%s7917_s8 + $0x4b0] sm:$0xff]  ;;  %v1664_v32 = vld [vmem:[%s7917_s8 + $0x540] sm:$0xff] }
 0x477   :  { %1862 = vmatpush.msra.mxu0 %v1561_v0  ;;  %1885 = vmatpush.msra.mxu1 %v1577_v16  ;;  %v1629_v0 = vld [vmem:[%s7917_s8 + $0x428] sm:$0xff]  ;;  %v1680_v40 = vld [vmem:[%s7917_s8 + $0x5c0] sm:$0xff] }
 0x478   :  { %1908 = vmatpush.msra.mxu2 %v1593_v60  ;;  %1931 = vmatpush.msra.mxu3 %v1609_v24  ;;  %v1645_v16 = vld [vmem:[%s7917_s8 + $0x4a8] sm:$0xff]  ;;  %v1628_v60 = vld [vmem:[%s7917_s8 + $0x420] sm:$0xff] }
 0x479   :  { %1863 = vmatpush.msra.mxu0 %v1560_v50  ;;  %1886 = vmatpush.msra.mxu1 %v1576_v35  ;;  %v1644_v24 = vld [vmem:[%s7917_s8 + $0x4a0] sm:$0xff] }
 0x47a   :  { %1909 = vmatpush.msra.mxu2 %v1592_v17  ;;  %1932 = vmatpush.msra.mxu3 %v1608_v47 }
 0x47e   :  { %v1113_v33 = vpop.f32.mrf.mxu0  ;;  %v1136_v30 = vpop.f32.mrf.mxu1 }
 0x47f   :  { %v1114_v14 = vadd.f32 %v1113_v33, %v1058_v18  ;;  %v1137_v11 = vadd.f32 %v1136_v30, %v1059_v5  ;;  %v1663_v33 = vld [vmem:[%s7917_s8 + $0x538] sm:$0xff] }
 0x480   :  { %v1679_v30 = vld [vmem:[%s7917_s8 + $0x5b8] sm:$0xff] }
 0x481   :  { %v1464_v9 = vmax.f32 %v1114_v14, 0.0  ;;  %v1465_v51 = vmax.f32 %v1137_v11, 0.0 }
 0x483   :  { %1772 = vmatmul.f32.vlgmr.msrb.gmra.mxu0 %v1464_v9  ;;  %1795 = vmatmul.f32.vlgmr.msrb.gmra.mxu1 %v1465_v51  ;;  %v1662_v9 = vld [vmem:[%s7917_s8 + $0x530] sm:$0xff] }
 0x484   :  { %1940 = vmatpush.msrb.mxu0 %v1639_v61  ;;  %1963 = vmatpush.msrb.mxu1 %v1655_v41  ;;  %v1678_v51 = vld [vmem:[%s7917_s8 + $0x5b0] sm:$0xff]  ;;  %v1062_v61 = vperm.slane %v5948_v63, 4  ;;  %v1063_v41 = vperm.slane %v5948_v63, 5 }
 0x485   :  { %v1159_v23 = vpop.f32.mrf.mxu2  ;;  %v1182_v37 = vpop.f32.mrf.mxu3 }
 0x486   :  { %v1160_v12 = vadd.f32 %v1159_v23, %v1060_v42  ;;  %v1183_v6 = vadd.f32 %v1182_v37, %v1061_v53  ;;  %1941 = vmatpush.msrb.mxu0 %v1638_v59  ;;  %1964 = vmatpush.msrb.mxu1 %v1654_v7  ;;  %v1626_v59 = vld [vmem:[%s7917_s8 + $0x410] sm:$0xff]  ;;  %v1661_v23 = vld [vmem:[%s7917_s8 + $0x528] sm:$0xff] }
 0x487   :  { %v1642_v7 = vld [vmem:[%s7917_s8 + $0x490] sm:$0xff]  ;;  %v1677_v37 = vld [vmem:[%s7917_s8 + $0x5a8] sm:$0xff] }
 0x488   :  { %v1466_v31 = vmax.f32 %v1160_v12, 0.0  ;;  %v1467_v62 = vmax.f32 %v1183_v6, 0.0  ;;  %1942 = vmatpush.msrb.mxu0 %v1637_v3  ;;  %1965 = vmatpush.msrb.mxu1 %v1653_v57  ;;  %v1625_v12 = vld [vmem:[%s7917_s8 + $0x408] sm:$0xff] }
 0x489   :  { %v1641_v6 = vld [vmem:[%s7917_s8 + $0x488] sm:$0xff] }
 0x48a   :  { %1818 = vmatmul.f32.vlgmr.msrb.gmra.mxu2 %v1466_v31  ;;  %1841 = vmatmul.f32.vlgmr.msrb.gmra.mxu3 %v1467_v62 }
 0x48b   :  { %1943 = vmatpush.msrb.mxu0 %v1636_v13  ;;  %1966 = vmatpush.msrb.mxu1 %v1652_v4 }
 0x48c   :  { %1986 = vmatpush.msrb.mxu2 %v1671_v20  ;;  %2009 = vmatpush.msrb.mxu3 %v1687_v26  ;;  %v1660_v20 = vld [vmem:[%s7917_s8 + $0x520] sm:$0xff] }
 0x48d   :  { %1944 = vmatpush.msrb.mxu0 %v1635_v34  ;;  %1967 = vmatpush.msrb.mxu1 %v1651_v55  ;;  %v1676_v26 = vld [vmem:[%s7917_s8 + $0x5a0] sm:$0xff] }
 0x48e   :  { %1987 = vmatpush.msrb.mxu2 %v1670_v21  ;;  %2010 = vmatpush.msrb.mxu3 %v1686_v46 }
 0x48f   :  { %1945 = vmatpush.msrb.mxu0 %v1634_v2  ;;  %1968 = vmatpush.msrb.mxu1 %v1650_v10  ;;  %v1624_v2 = vld [vmem:[%s7917_s8 + $0x400] sm:$0xff] }
 0x490   :  { %1988 = vmatpush.msrb.mxu2 %v1669_v36  ;;  %2011 = vmatpush.msrb.mxu3 %v1685_v48  ;;  %v1640_v10 = vld [vmem:[%s7917_s8 + $0x480] sm:$0xff]  ;;  %v1659_v36 = vld [vmem:[%s7917_s8 + $0x518] sm:$0xff] }
 0x491   :  { %1946 = vmatpush.msrb.mxu0 %v1633_v56  ;;  %1969 = vmatpush.msrb.mxu1 %v1649_v25  ;;  %v1675_v48 = vld [vmem:[%s7917_s8 + $0x598] sm:$0xff]  ;;  %v1064_v56 = vperm.slane %v5948_v63, 6  ;;  %v1065_v25 = vperm.slane %v5948_v63, 7  ;;  %v1672_v63 = vld [vmem:[%s7917_s8 + $0x580] sm:$0xff] }
 0x492   :  { %1989 = vmatpush.msrb.mxu2 %v1668_v19  ;;  %2012 = vmatpush.msrb.mxu3 %v1684_v38  ;;  %v1703_v19 = vld [vmem:[%s7917_s8 + $0x678] sm:$0xff] }
 0x493   :  { %1947 = vmatpush.msrb.mxu0 %v1632_v58  ;;  %1970 = vmatpush.msrb.mxu1 %v1648_v27  ;;  %v1719_v38 = vld [vmem:[%s7917_s8 + $0x6f8] sm:$0xff]  ;;  %v1658_v58 = vld [vmem:[%s7917_s8 + $0x510] sm:$0xff] }
 0x494   :  { %1990 = vmatpush.msrb.mxu2 %v1667_v39  ;;  %2013 = vmatpush.msrb.mxu3 %v1683_v54  ;;  %v1674_v27 = vld [vmem:[%s7917_s8 + $0x590] sm:$0xff] }
 0x495   :  { %1948 = vmatpush.msrb.mxu0 %v1631_v45  ;;  %1971 = vmatpush.msrb.mxu1 %v1647_v52  ;;  %v1702_v45 = vld [vmem:[%s7917_s8 + $0x670] sm:$0xff] }
 0x496   :  { %1991 = vmatpush.msrb.mxu2 %v1666_v43  ;;  %2014 = vmatpush.msrb.mxu3 %v1682_v29  ;;  %v1718_v52 = vld [vmem:[%s7917_s8 + $0x6f0] sm:$0xff] }
 0x497   :  { %1949 = vmatpush.msrb.mxu0 %v1630_v15  ;;  %1972 = vmatpush.msrb.mxu1 %v1646_v44 }
 0x498   :  { %v1116_v50 = vpop.f32.mrf.mxu0  ;;  %v1139_v35 = vpop.f32.mrf.mxu1  ;;  %1992 = vmatpush.msrb.mxu2 %v1665_v49  ;;  %2015 = vmatpush.msrb.mxu3 %v1681_v22  ;;  %v1657_v49 = vld [vmem:[%s7917_s8 + $0x508] sm:$0xff] }
 0x499   :  { %v1117_v17 = vadd.f32 %v1116_v50, %v1058_v18  ;;  %v1140_v47 = vadd.f32 %v1139_v35, %v1059_v5  ;;  %1950 = vmatpush.msrb.mxu0 %v1629_v0  ;;  %1973 = vmatpush.msrb.mxu1 %v1645_v16  ;;  %v1627_v18 = vld [vmem:[%s7917_s8 + $0x418] sm:$0xff]  ;;  %v1673_v22 = vld [vmem:[%s7917_s8 + $0x588] sm:$0xff] }
 0x49a   :  { %1993 = vmatpush.msrb.mxu2 %v1664_v32  ;;  %2016 = vmatpush.msrb.mxu3 %v1680_v40  ;;  %v1643_v5 = vld [vmem:[%s7917_s8 + $0x498] sm:$0xff]  ;;  %v1701_v32 = vld [vmem:[%s7917_s8 + $0x668] sm:$0xff] }
 0x49b   :  { %v1480_v14 = vmax.f32 %v1117_v17, 0.0  ;;  %v1481_v11 = vmax.f32 %v1140_v47, 0.0  ;;  %1951 = vmatpush.msrb.mxu0 %v1628_v60  ;;  %1974 = vmatpush.msrb.mxu1 %v1644_v24  ;;  %v1717_v40 = vld [vmem:[%s7917_s8 + $0x6e8] sm:$0xff]  ;;  %v1656_v60 = vld [vmem:[%s7917_s8 + $0x500] sm:$0xff] }
 0x49c   :  { %1994 = vmatpush.msrb.mxu2 %v1663_v33  ;;  %2017 = vmatpush.msrb.mxu3 %v1679_v30  ;;  %v1700_v24 = vld [vmem:[%s7917_s8 + $0x660] sm:$0xff]  ;;  %v6207_v47 = vld [vmem:[%s7916_s7 + $0x8] sm:$0xff]  ;;  %v1735_v33 = vld [vmem:[%s7917_s8 + $0x778] sm:$0xff] }
 0x49d   :  { %1775 = vmatmul.f32.gmra.mxu0 %v1480_v14  ;;  %1798 = vmatmul.f32.gmra.mxu1 %v1481_v11  ;;  %v1716_v17 = vld [vmem:[%s7917_s8 + $0x6e0] sm:$0xff]  ;;  %v1751_v30 = vld [vmem:[%s7917_s8 + $0x7f8] sm:$0xff] }
 0x49e   :  { %1952 = vmatpush.msrb.mxu0 %v1627_v18  ;;  %1975 = vmatpush.msrb.mxu1 %v1643_v5 }
 0x49f   :  { %v1162_v3 = vpop.f32.mrf.mxu2  ;;  %v1185_v57 = vpop.f32.mrf.mxu3  ;;  %1995 = vmatpush.msrb.mxu2 %v1662_v9  ;;  %2018 = vmatpush.msrb.mxu3 %v1678_v51  ;;  %v1699_v9 = vld [vmem:[%s7917_s8 + $0x658] sm:$0xff] }
 0x4a0   :  { %v1163_v31 = vadd.f32 %v1162_v3, %v1060_v42  ;;  %v1186_v62 = vadd.f32 %v1185_v57, %v1061_v53  ;;  %v1205_v13 = vpop.f32.mrf.mxu0  ;;  %v1228_v4 = vpop.f32.mrf.mxu1  ;;  %1953 = vmatpush.msrb.mxu0 %v1626_v59  ;;  %1976 = vmatpush.msrb.mxu1 %v1642_v7  ;;  %v1715_v51 = vld [vmem:[%s7917_s8 + $0x6d8] sm:$0xff] }
 0x4a1   :  { %v1206_v34 = vadd.f32 %v1205_v13, %v1062_v61  ;;  %v1229_v42 = vadd.f32 %v1228_v4, %v1063_v41  ;;  %1996 = vmatpush.msrb.mxu2 %v1661_v23  ;;  %2019 = vmatpush.msrb.mxu3 %v1677_v37  ;;  %v1734_v23 = vld [vmem:[%s7917_s8 + $0x770] sm:$0xff] }
 0x4a2   :  { %v1482_v53 = vmax.f32 %v1163_v31, 0.0  ;;  %v1483_v55 = vmax.f32 %v1186_v62, 0.0  ;;  %1954 = vmatpush.msrb.mxu0 %v1625_v12  ;;  %1977 = vmatpush.msrb.mxu1 %v1641_v6  ;;  %v1750_v37 = vld [vmem:[%s7917_s8 + $0x7f0] sm:$0xff]  ;;  %v1733_v31 = vld [vmem:[%s7917_s8 + $0x768] sm:$0xff] }
 0x4a3   :  { %v1468_v21 = vmax.f32 %v1206_v34, 0.0  ;;  %v1469_v46 = vmax.f32 %v1229_v42, 0.0  ;;  %1997 = vmatpush.msrb.mxu2 %v1660_v20  ;;  %2020 = vmatpush.msrb.mxu3 %v1676_v26  ;;  %v1698_v12 = vld [vmem:[%s7917_s8 + $0x650] sm:$0xff]  ;;  %v1749_v62 = vld [vmem:[%s7917_s8 + $0x7e8] sm:$0xff]  ;;  %v1732_v34 = vld [vmem:[%s7917_s8 + $0x760] sm:$0xff] }
 0x4a4   :  { %1821 = vmatmul.f32.gmra.mxu2 %v1482_v53  ;;  %1844 = vmatmul.f32.gmra.mxu3 %v1483_v55  ;;  %v1714_v6 = vld [vmem:[%s7917_s8 + $0x6d0] sm:$0xff]  ;;  %v1697_v20 = vld [vmem:[%s7917_s8 + $0x648] sm:$0xff]  ;;  %v1748_v42 = vld [vmem:[%s7917_s8 + $0x7e0] sm:$0xff] }
 0x4a5   :  { %1864 = vmatmul.f32.vlgmr.msra.gmra.mxu0 %v1468_v21  ;;  %1887 = vmatmul.f32.vlgmr.msra.gmra.mxu1 %v1469_v46  ;;  %v1713_v26 = vld [vmem:[%s7917_s8 + $0x6c8] sm:$0xff]  ;;  %v1696_v21 = vld [vmem:[%s7917_s8 + $0x640] sm:$0xff] }
 0x4a6   :  { %1955 = vmatpush.msrb.mxu0 %v1624_v2  ;;  %1978 = vmatpush.msrb.mxu1 %v1640_v10  ;;  %v1712_v46 = vld [vmem:[%s7917_s8 + $0x6c0] sm:$0xff]  ;;  %v1068_v2 = vperm.slane %v6207_v47, 2  ;;  %v1069_v10 = vperm.slane %v6207_v47, 3 }
 0x4a7   :  { %1998 = vmatpush.msrb.mxu2 %v1659_v36  ;;  %2021 = vmatpush.msrb.mxu3 %v1675_v48  ;;  %v1251_v39 = vpop.f32.mrf.mxu2  ;;  %v1274_v54 = vpop.f32.mrf.mxu3 }
 0x4a8   :  { %v1252_v43 = vadd.f32 %v1251_v39, %v1064_v56  ;;  %v1275_v29 = vadd.f32 %v1274_v54, %v1065_v25  ;;  %2032 = vmatpush.msra.mxu0 %v1703_v19  ;;  %2055 = vmatpush.msra.mxu1 %v1719_v38  ;;  %v1208_v15 = vpop.f32.mrf.mxu0  ;;  %v1231_v44 = vpop.f32.mrf.mxu1  ;;  %v1695_v39 = vld [vmem:[%s7917_s8 + $0x638] sm:$0xff] }
 0x4a9   :  { %1999 = vmatpush.msrb.mxu2 %v1658_v58  ;;  %2022 = vmatpush.msrb.mxu3 %v1674_v27  ;;  %v1209_v0 = vadd.f32 %v1208_v15, %v1062_v61  ;;  %v1232_v16 = vadd.f32 %v1231_v44, %v1063_v41  ;;  %v1066_v61 = vperm.slane %v6207_v47, 0  ;;  %v1067_v41 = vperm.slane %v6207_v47, 1  ;;  %v1711_v54 = vld [vmem:[%s7917_s8 + $0x6b8] sm:$0xff]  ;;  %v1694_v15 = vld [vmem:[%s7917_s8 + $0x630] sm:$0xff] }
 0x4aa   :  { %v1470_v50 = vmax.f32 %v1252_v43, 0.0  ;;  %v1471_v35 = vmax.f32 %v1275_v29, 0.0  ;;  %2033 = vmatpush.msra.mxu0 %v1702_v45  ;;  %2056 = vmatpush.msra.mxu1 %v1718_v52  ;;  %v1730_v43 = vld [vmem:[%s7917_s8 + $0x750] sm:$0xff] }
 0x4ab   :  { %2000 = vmatpush.msrb.mxu2 %v1657_v49  ;;  %2023 = vmatpush.msrb.mxu3 %v1673_v22  ;;  %v1484_v14 = vmax.f32 %v1209_v0, 0.0  ;;  %v1485_v11 = vmax.f32 %v1232_v16, 0.0  ;;  %v1746_v29 = vld [vmem:[%s7917_s8 + $0x7d0] sm:$0xff]  ;;  %v1729_v49 = vld [vmem:[%s7917_s8 + $0x748] sm:$0xff] }
 0x4ac   :  { %2034 = vmatpush.msra.mxu0 %v1701_v32  ;;  %2057 = vmatpush.msra.mxu1 %v1717_v40  ;;  %v1710_v44 = vld [vmem:[%s7917_s8 + $0x6b0] sm:$0xff]  ;;  %v1745_v22 = vld [vmem:[%s7917_s8 + $0x7c8] sm:$0xff] }
 0x4ad   :  { %1910 = vmatmul.f32.vlgmr.msra.gmra.mxu2 %v1470_v50  ;;  %1933 = vmatmul.f32.vlgmr.msra.gmra.mxu3 %v1471_v35  ;;  %v1693_v32 = vld [vmem:[%s7917_s8 + $0x628] sm:$0xff] }
 0x4ae   :  { %2001 = vmatpush.msrb.mxu2 %v1656_v60  ;;  %2024 = vmatpush.msrb.mxu3 %v1672_v63  ;;  %v1709_v40 = vld [vmem:[%s7917_s8 + $0x6a8] sm:$0xff]  ;;  %v1728_v60 = vld [vmem:[%s7917_s8 + $0x740] sm:$0xff] }
 0x4af   :  { %2035 = vmatpush.msra.mxu0 %v1700_v24  ;;  %2058 = vmatpush.msra.mxu1 %v1716_v17  ;;  %v1254_v18 = vpop.f32.mrf.mxu2  ;;  %v1277_v5 = vpop.f32.mrf.mxu3  ;;  %v1744_v63 = vld [vmem:[%s7917_s8 + $0x7c0] sm:$0xff] }
 0x4b0   :  { %2078 = vmatpush.msra.mxu2 %v1735_v33  ;;  %2101 = vmatpush.msra.mxu3 %v1751_v30  ;;  %v1255_v59 = vadd.f32 %v1254_v18, %v1064_v56  ;;  %v1278_v7 = vadd.f32 %v1277_v5, %v1065_v25  ;;  %v1297_v3 = vpop.f32.mrf.mxu0  ;;  %v1320_v57 = vpop.f32.mrf.mxu1  ;;  %v1731_v56 = vld [vmem:[%s7917_s8 + $0x758] sm:$0xff]  ;;  %v1692_v33 = vld [vmem:[%s7917_s8 + $0x620] sm:$0xff] }
 0x4b1   :  { %1867 = vmatmul.f32.gmra.mxu0 %v1484_v14  ;;  %1890 = vmatmul.f32.gmra.mxu1 %v1485_v11  ;;  %v1298_v13 = vadd.f32 %v1297_v3, %v1066_v61  ;;  %v1321_v4 = vadd.f32 %v1320_v57, %v1067_v41  ;;  %v1747_v25 = vld [vmem:[%s7917_s8 + $0x7d8] sm:$0xff]  ;;  %v1708_v30 = vld [vmem:[%s7917_s8 + $0x6a0] sm:$0xff]  ;;  %v1726_v3 = vld [vmem:[%s7917_s8 + $0x730] sm:$0xff] }
 0x4b2   :  { %2036 = vmatpush.msra.mxu0 %v1699_v9  ;;  %2059 = vmatpush.msra.mxu1 %v1715_v51  ;;  %v1486_v53 = vmax.f32 %v1255_v59, 0.0  ;;  %v1487_v55 = vmax.f32 %v1278_v7, 0.0  ;;  %v1727_v14 = vld [vmem:[%s7917_s8 + $0x738] sm:$0xff]  ;;  %v1070_v59 = vperm.slane %v6207_v47, 4  ;;  %v1071_v7 = vperm.slane %v6207_v47, 5  ;;  %v1742_v57 = vld [vmem:[%s7917_s8 + $0x7b0] sm:$0xff] }
 0x4b3   :  { %2079 = vmatpush.msra.mxu2 %v1734_v23  ;;  %2102 = vmatpush.msra.mxu3 %v1750_v37  ;;  %v1472_v36 = vmax.f32 %v1298_v13, 0.0  ;;  %v1473_v48 = vmax.f32 %v1321_v4, 0.0  ;;  %v1743_v11 = vld [vmem:[%s7917_s8 + $0x7b8] sm:$0xff] }
 0x4b4   :  { %2037 = vmatpush.msra.mxu0 %v1698_v12  ;;  %2060 = vmatpush.msra.mxu1 %v1714_v6  ;;  %v1690_v12 = vld [vmem:[%s7917_s8 + $0x610] sm:$0xff] }
 0x4b5   :  { %2080 = vmatpush.msra.mxu2 %v1733_v31  ;;  %2103 = vmatpush.msra.mxu3 %v1749_v62  ;;  %v1706_v6 = vld [vmem:[%s7917_s8 + $0x690] sm:$0xff]  ;;  %v1725_v31 = vld [vmem:[%s7917_s8 + $0x728] sm:$0xff] }
 0x4b6   :  { %2038 = vmatpush.msra.mxu0 %v1697_v20  ;;  %2061 = vmatpush.msra.mxu1 %v1713_v26  ;;  %v1741_v62 = vld [vmem:[%s7917_s8 + $0x7a8] sm:$0xff] }
 0x4b7   :  { %2081 = vmatpush.msra.mxu2 %v1732_v34  ;;  %2104 = vmatpush.msra.mxu3 %v1748_v42  ;;  %v1343_v19 = vpop.f32.mrf.mxu2  ;;  %v1366_v38 = vpop.f32.mrf.mxu3  ;;  %v1689_v20 = vld [vmem:[%s7917_s8 + $0x608] sm:$0xff]  ;;  %v1724_v34 = vld [vmem:[%s7917_s8 + $0x720] sm:$0xff] }
 0x4b8   :  { %1913 = vmatmul.f32.gmra.mxu2 %v1486_v53  ;;  %1936 = vmatmul.f32.gmra.mxu3 %v1487_v55  ;;  %v1300_v58 = vpop.f32.mrf.mxu0  ;;  %v1323_v27 = vpop.f32.mrf.mxu1  ;;  %v1344_v45 = vadd.f32 %v1343_v19, %v1068_v2  ;;  %v1367_v52 = vadd.f32 %v1366_v38, %v1069_v10  ;;  %v1705_v26 = vld [vmem:[%s7917_s8 + $0x688] sm:$0xff]  ;;  %v1740_v42 = vld [vmem:[%s7917_s8 + $0x7a0] sm:$0xff]  ;;  %v1723_v19 = vld [vmem:[%s7917_s8 + $0x718] sm:$0xff] }
 0x4b9   :  { %2039 = vmatpush.msra.mxu0 %v1696_v21  ;;  %2062 = vmatpush.msra.mxu1 %v1712_v46  ;;  %v1301_v0 = vadd.f32 %v1300_v58, %v1066_v61  ;;  %v1324_v16 = vadd.f32 %v1323_v27, %v1067_v41  ;;  %v1691_v61 = vld [vmem:[%s7917_s8 + $0x618] sm:$0xff] }
 0x4ba   :  { %2082 = vmatpush.msra.mxu2 %v1731_v56  ;;  %2105 = vmatpush.msra.mxu3 %v1747_v25  ;;  %v1474_v50 = vmax.f32 %v1344_v45, 0.0  ;;  %v1475_v35 = vmax.f32 %v1367_v52, 0.0  ;;  %v1707_v41 = vld [vmem:[%s7917_s8 + $0x698] sm:$0xff]  ;;  %v1738_v45 = vld [vmem:[%s7917_s8 + $0x790] sm:$0xff] }
 0x4bb   :  { %1956 = vmatmul.f32.vlgmr.msrb.gmra.mxu0 %v1472_v36  ;;  %1979 = vmatmul.f32.vlgmr.msrb.gmra.mxu1 %v1473_v48  ;;  %v1488_v18 = vmax.f32 %v1301_v0, 0.0  ;;  %v1489_v5 = vmax.f32 %v1324_v16, 0.0  ;;  %v1688_v36 = vld [vmem:[%s7917_s8 + $0x600] sm:$0xff] }
 0x4bc   :  { %2040 = vmatpush.msra.mxu0 %v1695_v39  ;;  %2063 = vmatpush.msra.mxu1 %v1711_v54  ;;  %v1704_v48 = vld [vmem:[%s7917_s8 + $0x680] sm:$0xff]  ;;  %v1722_v54 = vld [vmem:[%s7917_s8 + $0x710] sm:$0xff] }
 0x4bd   :  { %2083 = vmatpush.msra.mxu2 %v1730_v43  ;;  %2106 = vmatpush.msra.mxu3 %v1746_v29  ;;  %v1721_v29 = vld [vmem:[%s7917_s8 + $0x708] sm:$0xff]  ;;  %v1736_v0 = vld [vmem:[%s7917_s8 + $0x780] sm:$0xff] }
 0x4be   :  { %2041 = vmatpush.msra.mxu0 %v1694_v15  ;;  %2064 = vmatpush.msra.mxu1 %v1710_v44  ;;  %v1737_v15 = vld [vmem:[%s7917_s8 + $0x788] sm:$0xff] }
 0x4bf   :  { %2084 = vmatpush.msra.mxu2 %v1729_v49  ;;  %2107 = vmatpush.msra.mxu3 %v1745_v22  ;;  %v1346_v24 = vpop.f32.mrf.mxu2  ;;  %v1369_v17 = vpop.f32.mrf.mxu3  ;;  %v1720_v22 = vld [vmem:[%s7917_s8 + $0x700] sm:$0xff] }
 0x4c0   :  { %2042 = vmatpush.msra.mxu0 %v1693_v32  ;;  %2065 = vmatpush.msra.mxu1 %v1709_v40  ;;  %v1389_v9 = vpop.f32.mrf.mxu0  ;;  %v1412_v51 = vpop.f32.mrf.mxu1  ;;  %v1347_v23 = vadd.f32 %v1346_v24, %v1068_v2  ;;  %v1370_v37 = vadd.f32 %v1369_v17, %v1069_v10  ;;  %v1072_v2 = vperm.slane %v6207_v47, 6  ;;  %v1073_v10 = vperm.slane %v6207_v47, 7  ;;  %v1739_v47 = vld [vmem:[%s7917_s8 + $0x798] sm:$0xff] }
 0x4c1   :  { %2085 = vmatpush.msra.mxu2 %v1728_v60  ;;  %2108 = vmatpush.msra.mxu3 %v1744_v63  ;;  %v1390_v13 = vadd.f32 %v1389_v9, %v1070_v59  ;;  %v1413_v4 = vadd.f32 %v1412_v51, %v1071_v7  ;;  %v4689_v9 = vld [vmem:[%s7918_s9] ss:$0 sm:$0xff] }
 0x4c2   :  { %2002 = vmatmul.f32.vlgmr.msrb.gmra.mxu2 %v1474_v50  ;;  %2025 = vmatmul.f32.vlgmr.msrb.gmra.mxu3 %v1475_v35  ;;  %v1490_v53 = vmax.f32 %v1347_v23, 0.0  ;;  %v1491_v55 = vmax.f32 %v1370_v37, 0.0 }
 0x4c3   :  { %2043 = vmatpush.msra.mxu0 %v1692_v33  ;;  %2066 = vmatpush.msra.mxu1 %v1708_v30  ;;  %v1476_v56 = vmax.f32 %v1390_v13, 0.0  ;;  %v1477_v25 = vmax.f32 %v1413_v4, 0.0 }
 0x4c4   :  { %2086 = vmatpush.msra.mxu2 %v1727_v14  ;;  %2109 = vmatpush.msra.mxu3 %v1743_v11 }
 0x4c5   :  { %1959 = vmatmul.f32.gmra.mxu0 %v1488_v18  ;;  %1982 = vmatmul.f32.gmra.mxu1 %v1489_v5 }
 0x4c6   :  { %2044 = vmatpush.msra.mxu0 %v1691_v61  ;;  %2067 = vmatpush.msra.mxu1 %v1707_v41 }
 0x4c7   :  { %2087 = vmatpush.msra.mxu2 %v1726_v3  ;;  %2110 = vmatpush.msra.mxu3 %v1742_v57  ;;  %v1435_v21 = vpop.f32.mrf.mxu2  ;;  %v1458_v46 = vpop.f32.mrf.mxu3 }
 0x4c8   :  { %2045 = vmatpush.msra.mxu0 %v1690_v12  ;;  %2068 = vmatpush.msra.mxu1 %v1706_v6  ;;  %v1392_v38 = vpop.f32.mrf.mxu0  ;;  %v1415_v58 = vpop.f32.mrf.mxu1  ;;  %v1436_v27 = vadd.f32 %v1435_v21, %v1072_v2  ;;  %v1459_v39 = vadd.f32 %v1458_v46, %v1073_v10 }
 0x4c9   :  { %2088 = vmatpush.msra.mxu2 %v1725_v31  ;;  %2111 = vmatpush.msra.mxu3 %v1741_v62  ;;  %v1393_v52 = vadd.f32 %v1392_v38, %v1070_v59  ;;  %v1416_v43 = vadd.f32 %v1415_v58, %v1071_v7 }
 0x4ca   :  { %2046 = vmatpush.msra.mxu0 %v1689_v20  ;;  %2069 = vmatpush.msra.mxu1 %v1705_v26  ;;  %v1478_v44 = vmax.f32 %v1436_v27, 0.0  ;;  %v1479_v49 = vmax.f32 %v1459_v39, 0.0 }
 0x4cb   :  { %2089 = vmatpush.msra.mxu2 %v1724_v34  ;;  %2112 = vmatpush.msra.mxu3 %v1740_v42  ;;  %v1492_v40 = vmax.f32 %v1393_v52, 0.0  ;;  %v1493_v50 = vmax.f32 %v1416_v43, 0.0 }
 0x4cc   :  { %2005 = vmatmul.f32.gmra.mxu2 %v1490_v53  ;;  %2028 = vmatmul.f32.gmra.mxu3 %v1491_v55 }
 0x4cd   :  { %2047 = vmatpush.msra.mxu0 %v1688_v36  ;;  %2070 = vmatpush.msra.mxu1 %v1704_v48 }
 0x4ce   :  { %2090 = vmatpush.msra.mxu2 %v1723_v19  ;;  %2113 = vmatpush.msra.mxu3 %v1739_v47 }
 0x4cf   :  { %2048 = vmatmul.f32.vlgmr.msra.gmra.mxu0 %v1476_v56  ;;  %2071 = vmatmul.f32.vlgmr.msra.gmra.mxu1 %v1477_v25  ;;  %v1438_v16 = vpop.f32.mrf.mxu2  ;;  %v1461_v32 = vpop.f32.mrf.mxu3 }
 0x4d0   :  { %2091 = vmatpush.msra.mxu2 %v1722_v54  ;;  %2114 = vmatpush.msra.mxu3 %v1738_v45  ;;  %v1439_v35 = vadd.f32 %v1438_v16, %v1072_v2  ;;  %v1462_v60 = vadd.f32 %v1461_v32, %v1073_v10 }
 0x4d2   :  { %2092 = vmatpush.msra.mxu2 %v1721_v29  ;;  %2115 = vmatpush.msra.mxu3 %v1737_v15  ;;  %v1494_v63 = vmax.f32 %v1439_v35, 0.0  ;;  %v1495_v24 = vmax.f32 %v1462_v60, 0.0 }
 0x4d4   :  { %2093 = vmatpush.msra.mxu2 %v1720_v22  ;;  %2116 = vmatpush.msra.mxu3 %v1736_v0 }
 0x4d5   :  { %2094 = vmatmul.f32.vlgmr.msra.gmra.mxu2 %v1478_v44  ;;  %2117 = vmatmul.f32.vlgmr.msra.gmra.mxu3 %v1479_v49 }
 0x4d7   :  { %2051 = vmatmul.f32.gmra.mxu0 %v1492_v40  ;;  %2074 = vmatmul.f32.gmra.mxu1 %v1493_v50 }
 0x4dd   :  { %2097 = vmatmul.f32.gmra.mxu2 %v1494_v63  ;;  %2120 = vmatmul.f32.gmra.mxu3 %v1495_v24 }
 0x500   :  { %v1773_v17 = vpop.f32.mrf.mxu0  ;;  %v1796_v33 = vpop.f32.mrf.mxu1 }
 0x501   :  { %v1774_v41 = vadd.f32 %v4689_v9, %v1773_v17 }
 0x503   :  { %v1797_v7 = vadd.f32 %v1796_v33, %v1774_v41 }
 0x50d   :  { %v1819_v14 = vpop.f32.mrf.mxu2  ;;  %v1842_v11 = vpop.f32.mrf.mxu3 }
 0x50e   :  { %v1820_v37 = vadd.f32 %v1819_v14, %v1797_v7 }
 0x510   :  { %v1843_v6 = vadd.f32 %v1842_v11, %v1820_v37 }
 0x51a   :  { %v1776_v30 = vpop.f32.mrf.mxu0  ;;  %v1799_v18 = vpop.f32.mrf.mxu1 }
 0x51b   :  { %v1777_v3 = vadd.f32 %v4689_v9, %v1776_v30 }
 0x51d   :  { %v1800_v31 = vadd.f32 %v1799_v18, %v1777_v3 }
 0x522   :  { %v1865_v5 = vpop.f32.mrf.mxu0  ;;  %v1888_v59 = vpop.f32.mrf.mxu1 }
 0x523   :  { %v1866_v13 = vadd.f32 %v1865_v5, %v1843_v6 }
 0x525   :  { %v1889_v26 = vadd.f32 %v1888_v59, %v1866_v13 }
 0x527   :  { %v1822_v51 = vpop.f32.mrf.mxu2  ;;  %v1845_v61 = vpop.f32.mrf.mxu3 }
 0x528   :  { %v1823_v4 = vadd.f32 %v1822_v51, %v1800_v31 }
 0x52a   :  { %v1846_v34 = vadd.f32 %v1845_v61, %v1823_v4 }
 0x52e   :  { %v1868_v23 = vpop.f32.mrf.mxu0  ;;  %v1891_v62 = vpop.f32.mrf.mxu1 }
 0x52f   :  { %v1869_v21 = vadd.f32 %v1868_v23, %v1846_v34 }
 0x530   :  { %v1911_v57 = vpop.f32.mrf.mxu2  ;;  %v1934_v12 = vpop.f32.mrf.mxu3 }
 0x531   :  { %v1912_v55 = vadd.f32 %v1911_v57, %v1889_v26  ;;  %v1892_v10 = vadd.f32 %v1891_v62, %v1869_v21 }
 0x533   :  { %v1935_v2 = vadd.f32 %v1934_v12, %v1912_v55 }
 0x538   :  { %v1957_v20 = vpop.f32.mrf.mxu0  ;;  %v1980_v46 = vpop.f32.mrf.mxu1 }
 0x539   :  { %v1958_v48 = vadd.f32 %v1957_v20, %v1935_v2  ;;  %v4839_v2 = vld [vmem:[%s7919_s10] sm:$0xf] }
 0x53b   :  { %v1914_v42 = vpop.f32.mrf.mxu2  ;;  %v1937_v53 = vpop.f32.mrf.mxu3  ;;  %v1981_v47 = vadd.f32 %v1980_v46, %v1958_v48 }
 0x53c   :  { %v1915_v56 = vadd.f32 %v1914_v42, %v1892_v10  ;;  %v2170_v10 = vperm.slane %v4839_v2, 2 }
 0x53e   :  { %v1938_v38 = vadd.f32 %v1937_v53, %v1915_v56 }
 0x542   :  { %v1960_v36 = vpop.f32.mrf.mxu0  ;;  %v1983_v58 = vpop.f32.mrf.mxu1 }
 0x543   :  { %v1961_v39 = vadd.f32 %v1960_v36, %v1938_v38 }
 0x545   :  { %v2003_v25 = vpop.f32.mrf.mxu2  ;;  %v2026_v19 = vpop.f32.mrf.mxu3  ;;  %v1984_v29 = vadd.f32 %v1983_v58, %v1961_v39 }
 0x546   :  { %v2004_v27 = vadd.f32 %v2003_v25, %v1981_v47  ;;  %v2173_v25 = vperm.slane %v4839_v2, 3 }
 0x548   :  { %v2027_v45 = vadd.f32 %v2026_v19, %v2004_v27 }
 0x54c   :  { %v2049_v54 = vpop.f32.mrf.mxu0  ;;  %v2072_v49 = vpop.f32.mrf.mxu1 }
 0x54d   :  { %v2050_v15 = vadd.f32 %v2049_v54, %v2027_v45 }
 0x54f   :  { %v2006_v52 = vpop.f32.mrf.mxu2  ;;  %v2029_v43 = vpop.f32.mrf.mxu3  ;;  %v2073_v22 = vadd.f32 %v2072_v49, %v2050_v15 }
 0x550   :  { %v2007_v44 = vadd.f32 %v2006_v52, %v1984_v29 }
 0x552   :  { %v2030_v0 = vadd.f32 %v2029_v43, %v2007_v44  ;;  %v4690_v43 = vld [vmem:[%s7913_s4 + $0x18] ss:$0 sm:$0xff] }
 0x554   :  { %v2052_v16 = vpop.f32.mrf.mxu0  ;;  %v2075_v24 = vpop.f32.mrf.mxu1 }
 0x555   :  { %v2053_v35 = vadd.f32 %v2052_v16, %v2030_v0 }
 0x557   :  { %v2076_v17 = vadd.f32 %v2075_v24, %v2053_v35 }
 0x558   :  { %v2095_v32 = vpop.f32.mrf.mxu2  ;;  %v2118_v40 = vpop.f32.mrf.mxu3 }
 0x559   :  { %v2096_v50 = vadd.f32 %v2095_v32, %v2073_v22 }
 0x55b   :  { %v2119_v60 = vadd.f32 %v2118_v40, %v2096_v50 }
 0x55d   :  { %v2124_v63 = vadd.f32 %v2119_v60, %v5473_v28 }
 0x55f   :  { %v2126_v33 = vsel %vm86_vm2, %v2124_v63, 0.0 }
 0x560   :  { %v2098_v30 = vpop.f32.mrf.mxu2  ;;  %2127 = vadd.xlane.f32.xlu1 %v2126_v33  ;;  %v2121_v11 = vpop.f32.mrf.mxu3 }
 0x561   :  { %v2099_v14 = vadd.f32 %v2098_v30, %v2076_v17 }
 0x563   :  { %v2122_v18 = vadd.f32 %v2121_v11, %v2099_v14 }
 0x565   :  { %v2125_v5 = vadd.f32 %v2122_v18, %v5497_v1  ;;  %v4358_v1 = vld [vmem:[%s7913_s4 + $0x10] sm:$0xff] }
 0x566   :  { %2201 = vmatpush.msrb.mxu0 %v4358_v1 }
 0x567   :  { %v2129_v9 = vsel %vm86_vm2, %v2125_v5, 0.0 }
 0x568   :  { %2130 = vadd.xlane.f32.xlu2 %v2129_v9 }
 0x5d3   :  { %v2128_v51 = vpop.xlane.xlu1 %2127 }
 0x5d4   :  { %v2132_v61 = vmul.f32 %v2128_v51, %v5435_v8 }
 0x5d6   :  { %v2134_v41 = vsub.f32 %v2124_v63, %v2132_v61 }
 0x5d8   :  { %v2136_v59 = vmul.f32 %v2134_v41, %v2134_v41 }
 0x5da   :  { %v2138_v28 = vsel %vm86_vm2, %v2136_v59, 0.0 }
 0x5db   :  { %2139 = vadd.xlane.f32.xlu0 %v2138_v28  ;;  %v2131_v7 = vpop.xlane.xlu2 %2130 }
 0x5dc   :  { %v2133_v23 = vmul.f32 %v2131_v7, %v5435_v8 }
 0x5de   :  { %v2135_v37 = vsub.f32 %v2125_v5, %v2133_v23 }
 0x5e0   :  { %v2137_v3 = vmul.f32 %v2135_v37, %v2135_v37 }
 0x5e2   :  { %v2141_v57 = vsel %vm86_vm2, %v2137_v3, 0.0 }
 0x5e3   :  { %2142 = vadd.xlane.f32.xlu1 %v2141_v57 }
 0x64e   :  { %v2140_v12 = vpop.xlane.xlu0 %2139 }
 0x64f   :  { %v2144_v6 = vmul.f32 %v2140_v12, %v5435_v8 }
 0x651   :  { %v2146_v31 = vadd.f32 1e-05, %v2144_v6 }
 0x653   :  { %4763 = vrsqrt.f32 %v2146_v31  ;;  %vm2154_vm14 = vweird.f32 %v2146_v31 }
 0x656   :  { %v2143_v62 = vpop.xlane.xlu1 %2142 }
 0x657   :  { %v2145_v13 = vmul.f32 %v2143_v62, %v5435_v8 }
 0x659   :  { %v4764_v4 = vpop.eup %4763  ;;  %v2147_v20 = vadd.f32 1e-05, %v2145_v13 }
 0x65a   :  { %v2149_v26 = vmul.f32 %v4764_v4, %v2146_v31  ;;  %vm2155_vm13 = vweird.f32 %v4764_v4 }
 0x65b   :  { %4765 = vrsqrt.f32 %v2147_v20  ;;  %vm2156_vm15 = vmor %vm2154_vm14, %vm2155_vm13  ;;  %vm2164_vm1 = vweird.f32 %v2147_v20 }
 0x65c   :  { %v2150_v34 = vmul.f32 %v4764_v4, %v2149_v26 }
 0x65e   :  { %v2151_v42 = vmul.f32 0.5, %v2150_v34 }
 0x660   :  { %v2152_v53 = vsub.f32 1.5, %v2151_v42 }
 0x661   :  { %v4766_v55 = vpop.eup %4765 }
 0x662   :  { %v2153_v21 = vmul.f32 %v4764_v4, %v2152_v53  ;;  %v2159_v46 = vmul.f32 %v4766_v55, %v2147_v20  ;;  %vm2165_vm0 = vweird.f32 %v4766_v55 }
 0x663   :  { %vm2166_vm12 = vmor %vm2164_vm1, %vm2165_vm0 }
 0x664   :  { %v2157_v36 = vsel %vm2156_vm15, %v4764_v4, %v2153_v21  ;;  %v2160_v48 = vmul.f32 %v4766_v55, %v2159_v46 }
 0x665   :  { %v2168_v56 = vmul.f32 %v2157_v36, %v2134_v41 }
 0x666   :  { %v2161_v19 = vmul.f32 0.5, %v2160_v48 }
 0x667   :  { %v2171_v47 = vmul.f32 %v2170_v10, %v2168_v56 }
 0x668   :  { %v2162_v38 = vsub.f32 1.5, %v2161_v19 }
 0x669   :  { %v6420_v58 = vadd.f32 %v2173_v25, %v2171_v47 }
 0x66a   :  { %v2163_v27 = vmul.f32 %v4766_v55, %v2162_v38 }
 0x66b   :  { %4360 = vmatmul.msk.f32.vlgmr.msrb.gmra.mxu0 %vm86_vm2, %v6420_v58 }
 0x66c   :  { %v2167_v39 = vsel %vm2166_vm12, %v4766_v55, %v2163_v27 }
 0x66d   :  { %v2169_v54 = vmul.f32 %v2167_v39, %v2135_v37 }
 0x66f   :  { %v2172_v45 = vmul.f32 %v2170_v10, %v2169_v54 }
 0x671   :  { %v6424_v52 = vadd.f32 %v2173_v25, %v2172_v45 }
 0x673   :  { %4361 = vmatmul.msk.f32.gmra.mxu0 %vm86_vm2, %v6424_v52 }
 0x6e8   :  { %v2203_v29 = vpop.f32.mrf.mxu0 }
 0x6e9   :  { %v6431_v15 = vadd.f32 %v4690_v43, %v2203_v29 }
 0x6eb   :  { %2261 = vrot.lane.b32.xlu2 %v6431_v15, %s4867_s2  ;;  %v2209_v22 = vmul.f32 0.70710677, %v6431_v15 }
 0x6ed   :  { %v2214_v0 = vrot.slane %v2209_v22, 2  ;;  %v2213_v16 = vrot.slane %v2209_v22, 1  ;;  %v2227_v50 = vperm.slane %v2209_v22, 0  ;;  %v2217_v17 = vrot.slane %v2209_v22, 5 }
 0x6ee   :  { %v2216_v33 = vrot.slane %v2209_v22, 4  ;;  %v2215_v30 = vrot.slane %v2209_v22, 3  ;;  %v2219_v61 = vrot.slane %v2209_v22, 7  ;;  %v2218_v41 = vrot.slane %v2209_v22, 6 }
 0x6ef   :  { %v2229_v32 = vperm.slane %v2214_v0, 0  ;;  %v2228_v40 = vperm.slane %v2213_v16, 0  ;;  %v2232_v14 = vperm.slane %v2217_v17, 0 }
 0x6f0   :  { %v2206_v44 = vpop.f32.mrf.mxu0  ;;  %v2231_v11 = vperm.slane %v2216_v33, 0  ;;  %v2230_v18 = vperm.slane %v2215_v30, 0  ;;  %v2234_v59 = vperm.slane %v2219_v61, 0  ;;  %v2233_v28 = vperm.slane %v2218_v41, 0 }
 0x6f1   :  { %v6435_v49 = vadd.f32 %v4690_v43, %v2206_v44 }
 0x6f3   :  { %2263 = vrot.lane.b32.xlu0 %v6435_v49, %s4867_s2  ;;  %v2210_v37 = vmul.f32 0.70710677, %v6435_v49 }
 0x6f5   :  { %v2221_v3 = vrot.slane %v2210_v37, 2  ;;  %v2220_v57 = vrot.slane %v2210_v37, 1  ;;  %v2235_v1 = vperm.slane %v2210_v37, 0  ;;  %v2222_v20 = vrot.slane %v2210_v37, 3 }
 0x6f6   :  { %v2224_v26 = vrot.slane %v2210_v37, 5  ;;  %v2223_v34 = vrot.slane %v2210_v37, 4  ;;  %v2225_v10 = vrot.slane %v2210_v37, 6  ;;  %v2226_v36 = vrot.slane %v2210_v37, 7 }
 0x6f7   :  { %v2237_v12 = vperm.slane %v2221_v3, 0  ;;  %v2236_v6 = vperm.slane %v2220_v57, 0  ;;  %v2238_v42 = vperm.slane %v2222_v20, 0 }
 0x6f8   :  { %v2240_v53 = vperm.slane %v2224_v26, 0  ;;  %v2239_v55 = vperm.slane %v2223_v34, 0  ;;  %v2241_v48 = vperm.slane %v2225_v10, 0  ;;  %v2242_v56 = vperm.slane %v2226_v36, 0 }
 0x745   :  { %v2262_v35 = vpop.permute.xlu2 %2261 }
 0x746   :  { %v6440_v60 = vmul.f32 %v2262_v35, %v2229_v32  ;;  %v6442_v63 = vmul.f32 %v2262_v35, %v2228_v40  ;;  %v6444_v24 = vmul.f32 %v2262_v35, %v2227_v50  ;;  %v2272_v5 = vmul.f32 %v2262_v35, %v2232_v14 }
 0x747   :  { %v6452_v9 = vmul.f32 %v2262_v35, %v2231_v11  ;;  %v6454_v51 = vmul.f32 %v2262_v35, %v2230_v18  ;;  %v6461_v7 = vmul.f32 %v2262_v35, %v2234_v59  ;;  %v6463_v23 = vmul.f32 %v2262_v35, %v2233_v28 }
 0x748   :  { %2303 = vrot.lane.b32.xlu2 %v6440_v60, %s4868_s13  ;;  %2301 = vrot.lane.b32.xlu0 %v6442_v63, %s4868_s13 }
 0x749   :  { %2299 = vrot.lane.b32.xlu1 %v6444_v24, %s4868_s13 }
 0x750   :  { %2309 = vrot.lane.b32.xlu2 %v2272_v5, %s4868_s13  ;;  %2307 = vrot.lane.b32.xlu0 %v6452_v9, %s4868_s13 }
 0x751   :  { %2305 = vrot.lane.b32.xlu1 %v6454_v51, %s4868_s13 }
 0x758   :  { %2313 = vrot.lane.b32.xlu0 %v6461_v7, %s4868_s13 }
 0x759   :  { %2311 = vrot.lane.b32.xlu1 %v6463_v23, %s4868_s13 }
 0x765   :  { %v2264_v31 = vpop.permute.xlu0 %2263 }
 0x766   :  { %v6470_v62 = vmul.f32 %v2264_v31, %v2235_v1  ;;  %v6472_v13 = vmul.f32 %v2264_v31, %v2237_v12  ;;  %v6474_v4 = vmul.f32 %v2264_v31, %v2236_v6  ;;  %v6482_v21 = vmul.f32 %v2264_v31, %v2238_v42 }
 0x767   :  { %v6484_v46 = vmul.f32 %v2264_v31, %v2240_v53  ;;  %v6486_v2 = vmul.f32 %v2264_v31, %v2239_v55  ;;  %v6494_v25 = vmul.f32 %v2264_v31, %v2241_v48  ;;  %v6496_v19 = vmul.f32 %v2264_v31, %v2242_v56 }
 0x768   :  { %2315 = vrot.lane.b32.xlu2 %v6470_v62, %s4868_s13  ;;  %2319 = vrot.lane.b32.xlu0 %v6472_v13, %s4868_s13 }
 0x769   :  { %2317 = vrot.lane.b32.xlu1 %v6474_v4, %s4868_s13 }
 0x770   :  { %2321 = vrot.lane.b32.xlu2 %v6482_v21, %s4868_s13  ;;  %2325 = vrot.lane.b32.xlu0 %v6484_v46, %s4868_s13 }
 0x771   :  { %2323 = vrot.lane.b32.xlu1 %v6486_v2, %s4868_s13 }
 0x778   :  { %2327 = vrot.lane.b32.xlu2 %v6494_v25, %s4868_s13  ;;  %2867 = vrot.lane.b32.xlu0 %v6431_v15, %s4870_s15 }
 0x779   :  { %2329 = vrot.lane.b32.xlu1 %v6496_v19, %s4868_s13 }
 0x780   :  { %2670 = vrot.lane.b32.xlu2 %v6431_v15, %s4869_s14  ;;  %2672 = vrot.lane.b32.xlu0 %v6435_v49, %s4869_s14 }
 0x781   :  { %2869 = vrot.lane.b32.xlu1 %v6435_v49, %s4870_s15 }
 0x7a2   :  { %v2304_v47 = vpop.permute.xlu2 %2303 }
 0x7a3   :  { %v2349_v38 = vadd.f32 %v2304_v47, %v6440_v60 }
 0x7a5   :  { %v2377_v27 = vsel %vm270_vm3, %v2349_v38, -inf }
 0x7a6   :  { %v2378_v39 = vrot.slane %v2377_v27, 4 }
 0x7a8   :  { %v2379_v54 = vmax.f32 %v2377_v27, %v2378_v39 }
 0x7aa   :  { %v2380_v45 = vrot.slane %v2379_v54, 2  ;;  %v2310_v43 = vpop.permute.xlu2 %2309 }
 0x7ab   :  { %v2352_v29 = vadd.f32 %v2310_v43, %v2272_v5 }
 0x7ac   :  { %v2381_v44 = vmax.f32 %v2379_v54, %v2380_v45 }
 0x7ad   :  { %v2398_v22 = vsel %vm270_vm3, %v2352_v29, -inf }
 0x7ae   :  { %v2382_v15 = vrot.slane %v2381_v44, 1  ;;  %v2399_v0 = vrot.slane %v2398_v22, 4 }
 0x7b0   :  { %v2383_v16 = vmax.f32 %v2381_v44, %v2382_v15  ;;  %v2400_v32 = vmax.f32 %v2398_v22, %v2399_v0 }
 0x7b2   :  { %v2477_v40 = vsub.f32 %v2349_v38, %v2383_v16  ;;  %v2401_v50 = vrot.slane %v2400_v32, 2 }
 0x7b4   :  { %v2495_v49 = vmul.f32 1.442695, %v2477_v40  ;;  %v2402_v35 = vmax.f32 %v2400_v32, %v2401_v50 }
 0x7b6   :  { %4767 = vpow2.f32 %v2495_v49  ;;  %v2403_v60 = vrot.slane %v2402_v35, 1 }
 0x7b8   :  { %v2404_v17 = vmax.f32 %v2402_v35, %v2403_v60 }
 0x7ba   :  { %v2480_v33 = vsub.f32 %v2352_v29, %v2404_v17  ;;  %v2302_v30 = vpop.permute.xlu0 %2301 }
 0x7bb   :  { %v2348_v14 = vadd.f32 %v2302_v30, %v6442_v63  ;;  %v2300_v11 = vpop.permute.xlu1 %2299 }
 0x7bc   :  { %v6514_v18 = vpop.eup %4767  ;;  %v2501_v5 = vmul.f32 1.442695, %v2480_v33  ;;  %v2347_v61 = vadd.f32 %v2300_v11, %v6444_v24 }
 0x7bd   :  { %v2537_v41 = vsel %vm270_vm3, %v6514_v18, 0.0  ;;  %v2370_v59 = vsel %vm270_vm3, %v2348_v14, -inf }
 0x7be   :  { %v2538_v28 = vrot.slane %v2537_v41, 4  ;;  %4769 = vpow2.f32 %v2501_v5  ;;  %v2371_v37 = vrot.slane %v2370_v59, 4  ;;  %v2363_v3 = vsel %vm270_vm3, %v2347_v61, -inf }
 0x7bf   :  { %v2364_v57 = vrot.slane %v2363_v3, 4 }
 0x7c0   :  { %v2539_v1 = vadd.f32 %v2538_v28, %v2537_v41  ;;  %v2372_v12 = vmax.f32 %v2370_v59, %v2371_v37 }
 0x7c1   :  { %v2365_v63 = vmax.f32 %v2363_v3, %v2364_v57 }
 0x7c2   :  { %v2540_v6 = vrot.slane %v2539_v1, 2  ;;  %v2373_v31 = vrot.slane %v2372_v12, 2  ;;  %v2316_v20 = vpop.permute.xlu2 %2315  ;;  %v2308_v26 = vpop.permute.xlu0 %2307 }
 0x7c3   :  { %v2366_v34 = vrot.slane %v2365_v63, 2  ;;  %v6522_v24 = vadd.f32 %v2316_v20, %v6470_v62  ;;  %v6525_v42 = vadd.f32 %v2308_v26, %v6452_v9  ;;  %v2306_v53 = vpop.permute.xlu1 %2305 }
 0x7c4   :  { %v6527_v55 = vpop.eup %4769  ;;  %v2541_v10 = vadd.f32 %v2540_v6, %v2539_v1  ;;  %v2374_v36 = vmax.f32 %v2372_v12, %v2373_v31  ;;  %v6530_v48 = vadd.f32 %v2306_v53, %v6454_v51 }
 0x7c5   :  { %v2558_v56 = vsel %vm270_vm3, %v6527_v55, 0.0  ;;  %v2367_v47 = vmax.f32 %v2365_v63, %v2366_v34  ;;  %v2419_v38 = vsel %vm270_vm3, %v6522_v24, -inf  ;;  %v2391_v62 = vsel %vm270_vm3, %v6525_v42, -inf }
 0x7c6   :  { %v2542_v9 = vrot.slane %v2541_v10, 1  ;;  %v2559_v27 = vrot.slane %v2558_v56, 4  ;;  %v2375_v39 = vrot.slane %v2374_v36, 1  ;;  %v2420_v54 = vrot.slane %v2419_v38, 4 }
 0x7c7   :  { %v2368_v45 = vrot.slane %v2367_v47, 1  ;;  %v2392_v43 = vrot.slane %v2391_v62, 4  ;;  %v2384_v51 = vsel %vm270_vm3, %v6530_v48, -inf }
 0x7c8   :  { %v2560_v29 = vadd.f32 %v2559_v27, %v2558_v56  ;;  %v2376_v44 = vmax.f32 %v2374_v36, %v2375_v39  ;;  %v2421_v22 = vmax.f32 %v2419_v38, %v2420_v54  ;;  %v2385_v16 = vrot.slane %v2384_v51, 4 }
 0x7c9   :  { %v2369_v15 = vmax.f32 %v2367_v47, %v2368_v45  ;;  %v2393_v0 = vmax.f32 %v2391_v62, %v2392_v43  ;;  %v2543_v32 = vadd.f32 %v2542_v9, %v2541_v10 }
 0x7ca   :  { %v2561_v40 = vrot.slane %v2560_v29, 2  ;;  %v2476_v50 = vsub.f32 %v2348_v14, %v2376_v44  ;;  %v2422_v49 = vrot.slane %v2421_v22, 2  ;;  %v2322_v35 = vpop.permute.xlu2 %2321  ;;  %v2314_v60 = vpop.permute.xlu0 %2313  ;;  %v2386_v30 = vmax.f32 %v2384_v51, %v2385_v16 }
 0x7cb   :  { %v2475_v17 = vsub.f32 %v2347_v61, %v2369_v15  ;;  %v2394_v33 = vrot.slane %v2393_v0, 2  ;;  %v6541_v11 = vadd.f32 %v2322_v35, %v6482_v21  ;;  %v6544_v28 = vadd.f32 %v2314_v60, %v6461_v7  ;;  %v2312_v63 = vpop.permute.xlu1 %2311 }
 0x7cc   :  { %v2562_v5 = vadd.f32 %v2561_v40, %v2560_v29  ;;  %v2493_v41 = vmul.f32 1.442695, %v2476_v50  ;;  %v2423_v59 = vmax.f32 %v2421_v22, %v2422_v49  ;;  %v2387_v57 = vrot.slane %v2386_v30, 2 }
 0x7cd   :  { %v2491_v37 = vmul.f32 1.442695, %v2475_v17  ;;  %v2395_v3 = vmax.f32 %v2393_v0, %v2394_v33  ;;  %v2440_v14 = vsel %vm270_vm3, %v6541_v11, -inf  ;;  %v2412_v31 = vsel %vm270_vm3, %v6544_v28, -inf }
 0x7ce   :  { %v2563_v1 = vrot.slane %v2562_v5, 1  ;;  %4771 = vpow2.f32 %v2493_v41  ;;  %v2424_v61 = vrot.slane %v2423_v59, 1  ;;  %v2441_v12 = vrot.slane %v2440_v14, 4 }
 0x7cf   :  { %4773 = vpow2.f32 %v2491_v37  ;;  %v2396_v21 = vrot.slane %v2395_v3, 1  ;;  %v2388_v6 = vmax.f32 %v2386_v30, %v2387_v57  ;;  %v2413_v26 = vrot.slane %v2412_v31, 4 }
 0x7d0   :  { %4775 = vrcp.f32 %v2543_v32  ;;  %v2425_v7 = vmax.f32 %v2423_v59, %v2424_v61  ;;  %v2442_v20 = vmax.f32 %v2440_v14, %v2441_v12  ;;  %v6551_v10 = vadd.f32 %v2312_v63, %v6463_v23 }
 0x7d1   :  { %v2397_v34 = vmax.f32 %v2395_v3, %v2396_v21  ;;  %v2389_v53 = vrot.slane %v2388_v6, 1  ;;  %v2564_v36 = vadd.f32 %v2563_v1, %v2562_v5  ;;  %v2414_v38 = vmax.f32 %v2412_v31, %v2413_v26 }
 0x7d2   :  { %v2483_v56 = vsub.f32 %v6522_v24, %v2425_v7  ;;  %v2443_v47 = vrot.slane %v2442_v20, 2  ;;  %v2328_v62 = vpop.permute.xlu2 %2327  ;;  %v2405_v39 = vsel %vm270_vm3, %v6551_v10, -inf }
 0x7d3   :  { %v2479_v9 = vsub.f32 %v6525_v42, %v2397_v34  ;;  %v2390_v27 = vmax.f32 %v2388_v6, %v2389_v53  ;;  %v6558_v54 = vadd.f32 %v2328_v62, %v6494_v25  ;;  %v2415_v51 = vrot.slane %v2414_v38, 2 }
 0x7d4   :  { %v6560_v45 = vpop.eup %4771  ;;  %v2507_v43 = vmul.f32 1.442695, %v2483_v56  ;;  %v2444_v23 = vmax.f32 %v2442_v20, %v2443_v47  ;;  %v2406_v29 = vrot.slane %v2405_v39, 4 }
 0x7d5   :  { %v6562_v44 = vpop.eup %4773  ;;  %v2530_v24 = vsel %vm270_vm3, %v6560_v45, 0.0  ;;  %v2499_v22 = vmul.f32 1.442695, %v2479_v9  ;;  %v2478_v42 = vsub.f32 %v6530_v48, %v2390_v27  ;;  %v2461_v15 = vsel %vm270_vm3, %v6558_v54, -inf }
 0x7d6   :  { %v4776_v0 = vpop.eup %4775  ;;  %v2531_v25 = vrot.slane %v2530_v24, 4  ;;  %v2523_v16 = vsel %vm270_vm3, %v6562_v44, 0.0  ;;  %4777 = vpow2.f32 %v2507_v43  ;;  %v2445_v32 = vrot.slane %v2444_v23, 1 }
 0x7d7   :  { %v2524_v40 = vrot.slane %v2523_v16, 4  ;;  %4779 = vpow2.f32 %v2499_v22  ;;  %v2497_v50 = vmul.f32 1.442695, %v2478_v42  ;;  %v2416_v49 = vmax.f32 %v2414_v38, %v2415_v51 }
 0x7d8   :  { %v2532_v35 = vadd.f32 %v2531_v25, %v2530_v24  ;;  %v2446_v60 = vmax.f32 %v2444_v23, %v2445_v32  ;;  %v2407_v17 = vmax.f32 %v2405_v39, %v2406_v29  ;;  %v2462_v33 = vrot.slane %v2461_v15, 4 }
 0x7d9   :  { %v6572_v48 = vmul.f32 %v4776_v0, %v6514_v18  ;;  %v2525_v30 = vadd.f32 %v2524_v40, %v2523_v16  ;;  %4781 = vpow2.f32 %v2497_v50  ;;  %v2417_v5 = vrot.slane %v2416_v49, 1 }
 0x7da   :  { %v2533_v41 = vrot.slane %v2532_v35, 2  ;;  %v2486_v59 = vsub.f32 %v6541_v11, %v2446_v60  ;;  %v2408_v37 = vrot.slane %v2407_v17, 2  ;;  %v2463_v3 = vmax.f32 %v2461_v15, %v2462_v33  ;;  %v6575_v57 = vpop.permute.xlu2 %2670  ;;  %v2320_v22 = vpop.permute.xlu0 %2319 }
 0x7db   :  { %4783 = vrcp.f32 %v2564_v36  ;;  %v2526_v14 = vrot.slane %v2525_v30, 2  ;;  %v2418_v1 = vmax.f32 %v2416_v49, %v2417_v5  ;;  %v2678_v61 = vmul.f32 %v6575_v57, %v6572_v48 }
 0x7dc   :  { %v6579_v12 = vpop.eup %4777  ;;  %v2534_v18 = vadd.f32 %v2533_v41, %v2532_v35  ;;  %v2513_v63 = vmul.f32 1.442695, %v2486_v59  ;;  %v2409_v21 = vmax.f32 %v2407_v17, %v2408_v37  ;;  %v2464_v6 = vrot.slane %v2463_v3, 2 }
 0x7dd   :  { %v6581_v31 = vpop.eup %4779  ;;  %v2527_v7 = vadd.f32 %v2526_v14, %v2525_v30  ;;  %v2579_v11 = vsel %vm270_vm3, %v6579_v12, 0.0  ;;  %v2482_v20 = vsub.f32 %v6544_v28, %v2418_v1  ;;  %v2706_v26 = vsel %vm270_vm3, %v2678_v61, 0.0 }
 0x7de   :  { %v2535_v34 = vrot.slane %v2534_v18, 1  ;;  %v2580_v53 = vrot.slane %v2579_v11, 4  ;;  %v2551_v36 = vsel %vm270_vm3, %v6581_v31, 0.0  ;;  %4785 = vpow2.f32 %v2513_v63 }
 0x7df   :  { %v6589_v56 = vpop.eup %4781  ;;  %v2528_v47 = vrot.slane %v2527_v7, 1  ;;  %v2552_v38 = vrot.slane %v2551_v36, 4  ;;  %v2505_v62 = vmul.f32 1.442695, %v2482_v20  ;;  %v2410_v9 = vrot.slane %v2409_v21, 1 }
 0x7e0   :  { %v2536_v27 = vadd.f32 %v2535_v34, %v2534_v18  ;;  %v2581_v39 = vadd.f32 %v2580_v53, %v2579_v11  ;;  %v2544_v43 = vsel %vm270_vm3, %v6589_v56, 0.0  ;;  %v2465_v28 = vmax.f32 %v2463_v3, %v2464_v6 }
 0x7e1   :  { %v4784_v23 = vpop.eup %4783  ;;  %v2529_v51 = vadd.f32 %v2528_v47, %v2527_v7  ;;  %v2553_v29 = vadd.f32 %v2552_v38, %v2551_v36  ;;  %v2545_v24 = vrot.slane %v2544_v43, 4  ;;  %4787 = vpow2.f32 %v2505_v62  ;;  %v2318_v36 = vpop.permute.xlu1 %2317 }
 0x7e2   :  { %4789 = vrcp.f32 %v2536_v27  ;;  %v2582_v42 = vrot.slane %v2581_v39, 2  ;;  %v2411_v15 = vmax.f32 %v2409_v21, %v2410_v9  ;;  %v2466_v0 = vrot.slane %v2465_v28, 1 }
 0x7e3   :  { %4791 = vrcp.f32 %v2529_v51  ;;  %v2554_v25 = vrot.slane %v2553_v29, 2  ;;  %v2546_v16 = vadd.f32 %v2545_v24, %v2544_v43  ;;  %v2707_v32 = vrot.slane %v2706_v26, 4 }
 0x7e4   :  { %v6593_v40 = vpop.eup %4785  ;;  %v2583_v50 = vadd.f32 %v2582_v42, %v2581_v39  ;;  %v2481_v49 = vsub.f32 %v6551_v10, %v2411_v15  ;;  %v2467_v35 = vmax.f32 %v2465_v28, %v2466_v0  ;;  %v6597_v60 = vadd.f32 %v2320_v22, %v6472_v13 }
 0x7e5   :  { %v6600_v17 = vmul.f32 %v4784_v23, %v6527_v55  ;;  %v2555_v33 = vadd.f32 %v2554_v25, %v2553_v29  ;;  %v2547_v30 = vrot.slane %v2546_v16, 2  ;;  %v2600_v5 = vsel %vm270_vm3, %v6593_v40, 0.0 }
 0x7e6   :  { %v2584_v41 = vrot.slane %v2583_v50, 1  ;;  %v2601_v59 = vrot.slane %v2600_v5, 4  ;;  %v2503_v37 = vmul.f32 1.442695, %v2481_v49  ;;  %v2489_v3 = vsub.f32 %v6558_v54, %v2467_v35  ;;  %v2326_v49 = vpop.permute.xlu0 %2325 }
 0x7e7   :  { %v6605_v14 = vpop.eup %4787  ;;  %v2556_v10 = vrot.slane %v2555_v33, 1  ;;  %v2548_v1 = vadd.f32 %v2547_v30, %v2546_v16  ;;  %v6607_v61 = vadd.f32 %v2707_v32, %v2706_v26  ;;  %v2433_v13 = vsel %vm270_vm3, %v6597_v60, -inf }
 0x7e8   :  { %v4790_v55 = vpop.eup %4789  ;;  %v2585_v18 = vadd.f32 %v2584_v41, %v2583_v50  ;;  %v2602_v63 = vadd.f32 %v2601_v59, %v2600_v5  ;;  %v2572_v21 = vsel %vm270_vm3, %v6605_v14, 0.0  ;;  %4793 = vpow2.f32 %v2503_v37 }
 0x7e9   :  { %v4792_v6 = vpop.eup %4791  ;;  %v6614_v7 = vmul.f32 %v4790_v55, %v6560_v45  ;;  %v2557_v54 = vadd.f32 %v2556_v10, %v2555_v33  ;;  %v2549_v11 = vrot.slane %v2548_v1, 1  ;;  %v2573_v20 = vrot.slane %v2572_v21, 4 }
 0x7ea   :  { %v6617_v26 = vmul.f32 %v4792_v6, %v6562_v44  ;;  %4795 = vrcp.f32 %v2585_v18  ;;  %v2603_v34 = vrot.slane %v2602_v63, 2  ;;  %v2519_v53 = vmul.f32 1.442695, %v2489_v3 }
 0x7eb   :  { %4797 = vrcp.f32 %v2557_v54  ;;  %v2550_v47 = vadd.f32 %v2549_v11, %v2548_v1  ;;  %v2574_v38 = vadd.f32 %v2573_v20, %v2572_v21  ;;  %v2677_v62 = vmul.f32 %v6575_v57, %v6614_v7  ;;  %v2324_v20 = vpop.permute.xlu1 %2323 }
 0x7ec   :  { %v2604_v9 = vadd.f32 %v2603_v34, %v2602_v63  ;;  %4799 = vpow2.f32 %v2519_v53  ;;  %v2676_v45 = vmul.f32 %v6575_v57, %v6617_v26  ;;  %v2434_v27 = vrot.slane %v2433_v13, 4 }
 0x7ed   :  { %4801 = vrcp.f32 %v2550_v47  ;;  %v2575_v39 = vrot.slane %v2574_v38, 2  ;;  %v2699_v44 = vsel %vm270_vm3, %v2677_v62, 0.0  ;;  %v6625_v43 = vadd.f32 %v2318_v36, %v6474_v4 }
 0x7ee   :  { %v6627_v28 = vpop.eup %4793  ;;  %v2605_v23 = vrot.slane %v2604_v9, 1  ;;  %v2692_v51 = vsel %vm270_vm3, %v2676_v45, 0.0  ;;  %v2700_v29 = vrot.slane %v2699_v44, 4  ;;  %v2435_v24 = vmax.f32 %v2433_v13, %v2434_v27 }
 0x7ef   :  { %v2576_v22 = vadd.f32 %v2575_v39, %v2574_v38  ;;  %v2565_v42 = vsel %vm270_vm3, %v6627_v28, 0.0  ;;  %v2693_v15 = vrot.slane %v2692_v51, 4  ;;  %v2426_v0 = vsel %vm270_vm3, %v6625_v43, -inf }
 0x7f0   :  { %v4796_v25 = vpop.eup %4795  ;;  %v2606_v16 = vadd.f32 %v2605_v23, %v2604_v9  ;;  %v2566_v32 = vrot.slane %v2565_v42, 4  ;;  %v6636_v4 = vmul.f32 %v6575_v57, %v6600_v17  ;;  %v2436_v50 = vrot.slane %v2435_v24, 2 }
 0x7f1   :  { %v4798_v35 = vpop.eup %4797  ;;  %v2577_v33 = vrot.slane %v2576_v22, 1  ;;  %v2694_v30 = vadd.f32 %v2693_v15, %v2692_v51  ;;  %v2701_v5 = vadd.f32 %v2700_v29, %v2699_v44  ;;  %v2709_v41 = vrot.slane %v6607_v61, 2 }
 0x7f2   :  { %v6639_v59 = vpop.eup %4799  ;;  %v6642_v37 = vmul.f32 %v4798_v35, %v6581_v31  ;;  %4803 = vrcp.f32 %v2606_v16  ;;  %v2567_v3 = vadd.f32 %v2566_v32, %v2565_v42  ;;  %v2427_v10 = vrot.slane %v2426_v0, 4  ;;  %v6673_v16 = vpop.permute.xlu0 %2867 }
 0x7f3   :  { %v4802_v1 = vpop.eup %4801  ;;  %v2578_v13 = vadd.f32 %v2577_v33, %v2576_v22  ;;  %v2621_v55 = vsel %vm270_vm3, %v6639_v59, 0.0  ;;  %v2695_v18 = vrot.slane %v2694_v30, 2  ;;  %v2437_v63 = vmax.f32 %v2435_v24, %v2436_v50 }
 0x7f4   :  { %v2654_v21 = vmul.f32 %v4802_v1, %v6589_v56  ;;  %v2568_v6 = vrot.slane %v2567_v3, 2  ;;  %v2622_v54 = vrot.slane %v2621_v55, 4  ;;  %v2680_v11 = vmul.f32 %v6575_v57, %v6642_v37 }
 0x7f5   :  { %v6650_v31 = vmul.f32 %v4796_v25, %v6579_v12  ;;  %4805 = vrcp.f32 %v2578_v13  ;;  %v2702_v34 = vrot.slane %v2701_v5, 2  ;;  %v2438_v53 = vrot.slane %v2437_v63, 1 }
 0x7f6   :  { %v2569_v36 = vadd.f32 %v2568_v6, %v2567_v3  ;;  %v2623_v47 = vadd.f32 %v2622_v54, %v2621_v55  ;;  %v2679_v38 = vmul.f32 %v6575_v57, %v2654_v21  ;;  %v6654_v62 = vsel %vm270_vm3, %v2680_v11, 0.0 }
 0x7f7   :  { %v6656_v56 = vadd.f32 %v2695_v18, %v2694_v30  ;;  %v2439_v9 = vmax.f32 %v2437_v63, %v2438_v53  ;;  %v2428_v45 = vmax.f32 %v2426_v0, %v2427_v10  ;;  %v6659_v27 = vadd.f32 %v2326_v49, %v6484_v46  ;;  %v2330_v63 = vpop.permute.xlu1 %2329 }
 0x7f8   :  { %v4804_v39 = vpop.eup %4803  ;;  %v2570_v12 = vrot.slane %v2569_v36, 1  ;;  %v2624_v44 = vrot.slane %v2623_v47, 2  ;;  %v2713_v23 = vsel %vm270_vm3, %v2679_v38, 0.0  ;;  %v6663_v51 = vadd.f32 %v2324_v20, %v6486_v2 }
 0x7f9   :  { %v6665_v29 = vadd.f32 %v2702_v34, %v2701_v5  ;;  %v2721_v24 = vrot.slane %v6654_v62, 4  ;;  %v2485_v22 = vsub.f32 %v6597_v60, %v2439_v9  ;;  %v2429_v42 = vrot.slane %v2428_v45, 2 }
 0x7fa   :  { %v2571_v15 = vadd.f32 %v2570_v12, %v2569_v36  ;;  %v2625_v0 = vadd.f32 %v2624_v44, %v2623_v47  ;;  %v2454_v46 = vsel %vm270_vm3, %v6659_v27, -inf  ;;  %v2447_v25 = vsel %vm270_vm3, %v6663_v51, -inf }
 0x7fb   :  { %v4806_v32 = vpop.eup %4805  ;;  %v2714_v2 = vrot.slane %v2713_v23, 4  ;;  %v2511_v50 = vmul.f32 1.442695, %v2485_v22  ;;  %v2430_v49 = vmax.f32 %v2428_v45, %v2429_v42  ;;  %v2455_v35 = vrot.slane %v2454_v46, 4 }
 0x7fc   :  { %v6676_v33 = vmul.f32 %v4804_v39, %v6593_v40  ;;  %4807 = vrcp.f32 %v2571_v15  ;;  %v2626_v60 = vrot.slane %v2625_v0, 1  ;;  %v2448_v30 = vrot.slane %v2447_v25, 4 }
 0x7fd   :  { %4809 = vpow2.f32 %v2511_v50  ;;  %v2431_v5 = vrot.slane %v2430_v49, 1  ;;  %v2456_v3 = vmax.f32 %v2454_v46, %v2455_v35  ;;  %v2873_v10 = vmul.f32 %v6673_v16, %v6617_v26  ;;  %v4362_v35 = vld [vmem:[%s7914_s5 + $0x10] sm:$0xff] }
 0x7fe   :  { %v2627_v1 = vadd.f32 %v2626_v60, %v2625_v0  ;;  %v2449_v13 = vmax.f32 %v2447_v25, %v2448_v30  ;;  %v2874_v55 = vmul.f32 %v6673_v16, %v6614_v7  ;;  %v2875_v18 = vmul.f32 %v6673_v16, %v6572_v48  ;;  %4364 = vmatpush.msk.msrb.mxu1 %vm752_vm4, %v4362_v35 }
 0x7ff   :  { %v6684_v40 = vadd.f32 %v2714_v2, %v2713_v23  ;;  %v2432_v6 = vmax.f32 %v2430_v49, %v2431_v5  ;;  %v2457_v54 = vrot.slane %v2456_v3, 2  ;;  %v2876_v11 = vmul.f32 %v6673_v16, %v2654_v21 }
 0x800   :  { %v6688_v20 = vmul.f32 %v4806_v32, %v6605_v14  ;;  %4811 = vrcp.f32 %v2627_v1  ;;  %v2450_v26 = vrot.slane %v2449_v13, 2  ;;  %v2889_v34 = vsel %vm270_vm3, %v2873_v10, 0.0  ;;  %v6714_v10 = vpop.permute.xlu0 %2672 }
 0x801   :  { %v2484_v53 = vsub.f32 %v6625_v43, %v2432_v6  ;;  %v2458_v7 = vmax.f32 %v2456_v3, %v2457_v54  ;;  %v2890_v36 = vrot.slane %v2889_v34, 4  ;;  %v2896_v48 = vsel %vm270_vm3, %v2874_v55, 0.0 }
 0x802   :  { %v4808_v47 = vpop.eup %4807  ;;  %v2451_v38 = vmax.f32 %v2449_v13, %v2450_v26  ;;  %v2877_v9 = vmul.f32 %v6673_v16, %v6642_v37  ;;  %v2897_v45 = vrot.slane %v2896_v48, 4  ;;  %v2903_v21 = vsel %vm270_vm3, %v2875_v18, 0.0  ;;  %v6725_v18 = vpop.permute.xlu1 %2869 }
 0x803   :  { %v6696_v14 = vpop.eup %4809  ;;  %v2509_v39 = vmul.f32 1.442695, %v2484_v53  ;;  %v2459_v12 = vrot.slane %v2458_v7, 1  ;;  %v2891_v44 = vadd.f32 %v2890_v36, %v2889_v34  ;;  %v2910_v23 = vsel %vm270_vm3, %v2876_v11, 0.0 }
 0x804   :  { %v2593_v43 = vsel %vm270_vm3, %v6696_v14, 0.0  ;;  %v2452_v22 = vrot.slane %v2451_v38, 1  ;;  %v2898_v42 = vadd.f32 %v2897_v45, %v2896_v48  ;;  %v2904_v15 = vrot.slane %v2903_v21, 4 }
 0x805   :  { %v2594_v0 = vrot.slane %v2593_v43, 4  ;;  %4813 = vpow2.f32 %v2509_v39  ;;  %v2460_v46 = vmax.f32 %v2458_v7, %v2459_v12  ;;  %v2892_v37 = vrot.slane %v2891_v44, 2 }
 0x806   :  { %v4812_v25 = vpop.eup %4811  ;;  %v2453_v32 = vmax.f32 %v2451_v38, %v2452_v22  ;;  %v2899_v2 = vrot.slane %v2898_v42, 2  ;;  %v6701_v50 = vadd.f32 %v2904_v15, %v2903_v21  ;;  %v2911_v49 = vrot.slane %v2910_v23, 4 }
 0x807   :  { %v6707_v60 = vmul.f32 %v4808_v47, %v6627_v28  ;;  %v2595_v30 = vadd.f32 %v2594_v0, %v2593_v43  ;;  %v2488_v5 = vsub.f32 %v6659_v27, %v2460_v46  ;;  %v6712_v3 = vmul.f32 %v6673_v16, %v6600_v17 }
 0x808   :  { %v6718_v1 = vmul.f32 %v4812_v25, %v6639_v59  ;;  %v2487_v13 = vsub.f32 %v6663_v51, %v2453_v32  ;;  %v6721_v55 = vadd.f32 %v2892_v37, %v2891_v44  ;;  %v6723_v28 = vadd.f32 %v2899_v2, %v2898_v42 }
 0x809   :  { %v2596_v27 = vrot.slane %v2595_v30, 2  ;;  %v2517_v6 = vmul.f32 1.442695, %v2488_v5  ;;  %v2906_v17 = vrot.slane %v6701_v50, 2  ;;  %v6729_v54 = vadd.f32 %v2330_v63, %v6496_v19 }
 0x80a   :  { %v2515_v11 = vmul.f32 1.442695, %v2487_v13  ;;  %v6731_v26 = vadd.f32 %v2911_v49, %v2910_v23  ;;  %v6734_v59 = vsel %vm270_vm3, %v2877_v9, 0.0  ;;  %v2684_v51 = vmul.f32 %v6714_v10, %v6650_v31 }
 0x80b   :  { %v6738_v34 = vpop.eup %4813  ;;  %v2597_v53 = vadd.f32 %v2596_v27, %v2595_v30  ;;  %4815 = vpow2.f32 %v2517_v6  ;;  %v2468_v7 = vsel %vm270_vm3, %v6729_v54, -inf  ;;  %v2881_v19 = vmul.f32 %v6725_v18, %v6650_v31 }
 0x80c   :  { %v2586_v63 = vsel %vm270_vm3, %v6738_v34, 0.0  ;;  %4817 = vpow2.f32 %v2515_v11  ;;  %v2469_v36 = vrot.slane %v2468_v7, 4  ;;  %v2748_v48 = vsel %vm270_vm3, %v2684_v51, 0.0 }
 0x80d   :  { %v2598_v47 = vrot.slane %v2597_v53, 1  ;;  %v2587_v38 = vrot.slane %v2586_v63, 4  ;;  %v2918_v9 = vrot.slane %v6734_v59, 4  ;;  %v2749_v45 = vrot.slane %v2748_v48, 4 }
 0x80e   :  { %v2470_v21 = vmax.f32 %v2468_v7, %v2469_v36  ;;  %v6750_v39 = vmul.f32 %v6714_v10, %v6676_v33  ;;  %v2945_v12 = vsel %vm270_vm3, %v2881_v19, 0.0  ;;  %v3031_v31 = vrot.slane %v4362_v35, 4 }
 0x80f   :  { %v2599_v44 = vadd.f32 %v2598_v47, %v2597_v53  ;;  %v2588_v23 = vadd.f32 %v2587_v38, %v2586_v63  ;;  %v6755_v43 = vmul.f32 %v6725_v18, %v6676_v33  ;;  %v2946_v22 = vrot.slane %v2945_v12, 4 }
 0x810   :  { %v2471_v42 = vrot.slane %v2470_v21, 2  ;;  %v6757_v15 = vadd.f32 %v2749_v45, %v2748_v48  ;;  %4367 = vmatpush.msk.msrb.mxu2 %vm752_vm4, %v3031_v31  ;;  %v2682_v0 = vmul.f32 %v6575_v57, %v6707_v60  ;;  %v2697_v46 = vrot.slane %v6656_v56, 1 }
 0x811   :  { %v6763_v37 = vpop.eup %4815  ;;  %4819 = vrcp.f32 %v2599_v44  ;;  %v2589_v25 = vrot.slane %v2588_v23, 2  ;;  %v2683_v32 = vmul.f32 %v6575_v57, %v6688_v20  ;;  %v2704_v33 = vrot.slane %v6665_v29, 1 }
 0x812   :  { %v6768_v2 = vpop.eup %4817  ;;  %v2614_v49 = vsel %vm270_vm3, %v6763_v37, 0.0  ;;  %v2472_v35 = vmax.f32 %v2470_v21, %v2471_v42  ;;  %v6772_v30 = vadd.f32 %v2946_v22, %v2945_v12  ;;  %v2710_v5 = vadd.f32 %v2709_v41, %v6607_v61 }
 0x813   :  { %v2590_v13 = vadd.f32 %v2589_v25, %v2588_v23  ;;  %v2615_v27 = vrot.slane %v2614_v49, 4  ;;  %v2607_v6 = vsel %vm270_vm3, %v6768_v2, 0.0  ;;  %v2698_v57 = vadd.f32 %v2697_v46, %v6656_v56 }
 0x814   :  { %v2608_v11 = vrot.slane %v2607_v6, 4  ;;  %v2473_v51 = vrot.slane %v2472_v35, 1  ;;  %v2716_v53 = vrot.slane %v6684_v40, 2  ;;  %v2722_v7 = vadd.f32 %v2721_v24, %v6654_v62 }
 0x815   :  { %v2591_v19 = vrot.slane %v2590_v13, 1  ;;  %v2616_v63 = vadd.f32 %v2615_v27, %v2614_v49  ;;  %v2705_v36 = vadd.f32 %v2704_v33, %v6665_v29  ;;  %v2727_v61 = vsel %vm270_vm3, %v6636_v4, 0.0 }
 0x816   :  { %v2609_v41 = vadd.f32 %v2608_v11, %v2607_v6  ;;  %v2474_v48 = vmax.f32 %v2472_v35, %v2473_v51  ;;  %v2717_v47 = vadd.f32 %v2716_v53, %v6684_v40  ;;  %v2723_v56 = vrot.slane %v2722_v7, 2 }
 0x817   :  { %v4820_v38 = vpop.eup %4819  ;;  %v2592_v45 = vadd.f32 %v2591_v19, %v2590_v13  ;;  %v2617_v21 = vrot.slane %v2616_v63, 2  ;;  %v2711_v12 = vrot.slane %v2710_v5, 1  ;;  %v2728_v31 = vrot.slane %v2727_v61, 4 }
 0x818   :  { %v2661_v44 = vmul.f32 %v4820_v38, %v6696_v14  ;;  %v2610_v62 = vrot.slane %v2609_v41, 2  ;;  %v2490_v24 = vsub.f32 %v6729_v54, %v2474_v48  ;;  %v2718_v23 = vrot.slane %v2717_v47, 1 }
 0x819   :  { %4821 = vrcp.f32 %v2592_v45  ;;  %v2618_v29 = vadd.f32 %v2617_v21, %v2616_v63  ;;  %v2724_v22 = vadd.f32 %v2723_v56, %v2722_v7  ;;  %v2729_v4 = vadd.f32 %v2728_v31, %v2727_v61 }
 0x81a   :  { %v2611_v42 = vadd.f32 %v2610_v62, %v2609_v41  ;;  %v2521_v46 = vmul.f32 1.442695, %v2490_v24  ;;  %v2686_v40 = vmul.f32 %v6714_v10, %v2661_v44  ;;  %v2883_v25 = vmul.f32 %v6725_v18, %v2661_v44 }
 0x81b   :  { %v2619_v33 = vrot.slane %v2618_v29, 1  ;;  %v2725_v49 = vrot.slane %v2724_v22, 1  ;;  %v2730_v35 = vrot.slane %v2729_v4, 2  ;;  %v2734_v13 = vsel %vm270_vm3, %v2682_v0, 0.0 }
 0x81c   :  { %v2612_v14 = vrot.slane %v2611_v42, 1  ;;  %4823 = vpow2.f32 %v2521_v46  ;;  %v6794_v54 = vsel %vm270_vm3, %v2686_v40, 0.0  ;;  %v6797_v27 = vsel %vm270_vm3, %v2883_v25, 0.0 }
 0x81d   :  { %v2620_v6 = vadd.f32 %v2619_v33, %v2618_v29  ;;  %v2763_v11 = vrot.slane %v6794_v54, 4  ;;  %v2712_v51 = vadd.f32 %v2711_v12, %v2710_v5  ;;  %v2719_v53 = vadd.f32 %v2718_v23, %v2717_v47 }
 0x81e   :  { %v2613_v7 = vadd.f32 %v2612_v14, %v2611_v42  ;;  %v2731_v19 = vadd.f32 %v2730_v35, %v2729_v4  ;;  %v2735_v63 = vrot.slane %v2734_v13, 4  ;;  %v2741_v61 = vsel %vm270_vm3, %v2683_v32, 0.0 }
 0x81f   :  { %v4822_v41 = vpop.eup %4821  ;;  %4825 = vrcp.f32 %v2620_v6  ;;  %v2960_v0 = vrot.slane %v6797_v27, 4  ;;  %v2742_v48 = vrot.slane %v2741_v61, 4  ;;  %v2820_v56 = vsel %vm727_vm5, %v2705_v36, %v2698_v57 }
 0x820   :  { %v2660_v38 = vmul.f32 %v4822_v41, %v6738_v34  ;;  %4827 = vrcp.f32 %v2613_v7  ;;  %v2726_v45 = vadd.f32 %v2725_v49, %v2724_v22  ;;  %v2736_v21 = vadd.f32 %v2735_v63, %v2734_v13 }
 0x821   :  { %v2732_v31 = vrot.slane %v2731_v19, 1  ;;  %v2743_v5 = vadd.f32 %v2742_v48, %v2741_v61  ;;  %v2821_v47 = vsel %vm729_vm6, %v2712_v51, %v2820_v56  ;;  %v2879_v12 = vmul.f32 %v6673_v16, %v6707_v60 }
 0x822   :  { %v6807_v32 = vpop.eup %4823  ;;  %v2685_v44 = vmul.f32 %v6714_v10, %v2660_v38  ;;  %v2882_v62 = vmul.f32 %v6725_v18, %v2660_v38  ;;  %v2737_v24 = vrot.slane %v2736_v21, 2  ;;  %v2894_v57 = vrot.slane %v6721_v55, 1 }
 0x823   :  { %v2628_v34 = vsel %vm270_vm3, %v6807_v32, 0.0  ;;  %v2744_v36 = vrot.slane %v2743_v5, 2  ;;  %v2822_v23 = vsel %vm731_vm7, %v2719_v53, %v2821_v47  ;;  %v2880_v29 = vmul.f32 %v6673_v16, %v6688_v20 }
 0x824   :  { %v2629_v22 = vrot.slane %v2628_v34, 4  ;;  %v2755_v60 = vsel %vm270_vm3, %v2685_v44, 0.0  ;;  %v6819_v4 = vsel %vm270_vm3, %v2882_v62, 0.0  ;;  %v2738_v42 = vadd.f32 %v2737_v24, %v2736_v21 }
 0x825   :  { %v4826_v46 = vpop.eup %4825  ;;  %v2756_v40 = vrot.slane %v2755_v60, 4  ;;  %v2733_v25 = vadd.f32 %v2732_v31, %v2731_v19  ;;  %v2745_v33 = vadd.f32 %v2744_v36, %v2743_v5  ;;  %v2823_v49 = vsel %vm733_vm8, %v2726_v45, %v2822_v23 }
 0x826   :  { %v4828_v35 = vpop.eup %4827  ;;  %v2630_v13 = vadd.f32 %v2629_v22, %v2628_v34  ;;  %v2953_v14 = vrot.slane %v6819_v4, 4  ;;  %v2739_v6 = vrot.slane %v2738_v42, 1  ;;  %v2895_v16 = vadd.f32 %v2894_v57, %v6721_v55 }
 0x827   :  { %v6825_v20 = vmul.f32 %v4826_v46, %v6763_v37  ;;  %v6828_v51 = vmul.f32 %v4828_v35, %v6768_v2  ;;  %v2746_v53 = vrot.slane %v2745_v33, 1  ;;  %v2824_v7 = vsel %vm735_vm9, %v2733_v25, %v2823_v49 }
 0x828   :  { %v2631_v19 = vrot.slane %v2630_v13, 2  ;;  %v2740_v63 = vadd.f32 %v2739_v6, %v2738_v42  ;;  %v2901_v61 = vrot.slane %v6723_v28, 1  ;;  %v2907_v41 = vadd.f32 %v2906_v17, %v6701_v50 }
 0x829   :  { %v6837_v55 = vmul.f32 %v6714_v10, %v6828_v51  ;;  %v2757_v37 = vadd.f32 %v2756_v40, %v2755_v60  ;;  %v2747_v48 = vadd.f32 %v2746_v53, %v2745_v33  ;;  %v2913_v2 = vrot.slane %v6731_v26, 2 }
 0x82a   :  { %v2632_v56 = vadd.f32 %v2631_v19, %v2630_v13  ;;  %v2825_v38 = vsel %vm737_vm10, %v2740_v63, %v2824_v7  ;;  %v2902_v45 = vadd.f32 %v2901_v61, %v6723_v28  ;;  %v2908_v21 = vrot.slane %v2907_v41, 1 }
 0x82b   :  { %v2826_v31 = vsel %vm739_vm11, %v2747_v48, %v2825_v38  ;;  %v2914_v5 = vadd.f32 %v2913_v2, %v6731_v26  ;;  %v2919_v50 = vadd.f32 %v2918_v9, %v6734_v59  ;;  %v2924_v17 = vsel %vm270_vm3, %v6712_v3, 0.0 }
 0x82c   :  { %v2633_v47 = vrot.slane %v2632_v56, 1  ;;  %4365 = vmatmul.msk.f32.vlgmr.msrb.gmra.mxu1 %vm270_vm3, %v2826_v31  ;;  %v2909_v44 = vadd.f32 %v2908_v21, %v2907_v41  ;;  %v2925_v62 = vrot.slane %v2924_v17, 4  ;;  %v2931_v24 = vsel %vm270_vm3, %v2879_v12, 0.0 }
 0x82d   :  { %v2915_v28 = vrot.slane %v2914_v5, 1  ;;  %v2920_v57 = vrot.slane %v2919_v50, 2  ;;  %v2932_v34 = vrot.slane %v2931_v24, 4  ;;  %v2938_v36 = vsel %vm270_vm3, %v2880_v29, 0.0 }
 0x82e   :  { %v2634_v26 = vadd.f32 %v2633_v47, %v2632_v56  ;;  %v2926_v23 = vadd.f32 %v2925_v62, %v2924_v17  ;;  %v2939_v22 = vrot.slane %v2938_v36, 4  ;;  %v3017_v59 = vsel %vm727_vm5, %v2902_v45, %v2895_v16 }
 0x82f   :  { %v2916_v9 = vadd.f32 %v2915_v28, %v2914_v5  ;;  %v2921_v60 = vadd.f32 %v2920_v57, %v2919_v50  ;;  %v2933_v3 = vadd.f32 %v2932_v34, %v2931_v24  ;;  %v3018_v42 = vsel %vm729_vm6, %v2909_v44, %v3017_v59 }
 0x830   :  { %4829 = vrcp.f32 %v2634_v26  ;;  %v2927_v46 = vrot.slane %v2926_v23, 2  ;;  %v2940_v40 = vadd.f32 %v2939_v22, %v2938_v36  ;;  %v2689_v12 = vmul.f32 %v6714_v10, %v6825_v20 }
 0x831   :  { %v2922_v25 = vrot.slane %v2921_v60, 1  ;;  %v2934_v33 = vrot.slane %v2933_v3, 2  ;;  %v3019_v29 = vsel %vm731_vm7, %v2916_v9, %v3018_v42  ;;  %v2690_v49 = vmul.f32 %v6714_v10, %v6718_v1 }
 0x832   :  { %v2928_v35 = vadd.f32 %v2927_v46, %v2926_v23  ;;  %v2941_v13 = vrot.slane %v2940_v40, 2  ;;  %v2751_v6 = vrot.slane %v6757_v15, 2  ;;  %v2758_v16 = vrot.slane %v2757_v37, 2 }
 0x833   :  { %v2923_v53 = vadd.f32 %v2922_v25, %v2921_v60  ;;  %v2935_v7 = vadd.f32 %v2934_v33, %v2933_v3  ;;  %v2764_v19 = vadd.f32 %v2763_v11, %v6794_v54  ;;  %v2769_v63 = vsel %vm270_vm3, %v6750_v39, 0.0 }
 0x834   :  { %v2929_v61 = vrot.slane %v2928_v35, 1  ;;  %v2942_v41 = vadd.f32 %v2941_v13, %v2940_v40  ;;  %v2752_v48 = vadd.f32 %v2751_v6, %v6757_v15  ;;  %v2759_v2 = vadd.f32 %v2758_v16, %v2757_v37 }
 0x835   :  { %v2936_v56 = vrot.slane %v2935_v7, 1  ;;  %v3020_v38 = vsel %vm733_vm8, %v2923_v53, %v3019_v29  ;;  %v2765_v45 = vrot.slane %v2764_v19, 2  ;;  %v2770_v21 = vrot.slane %v2769_v63, 4 }
 0x836   :  { %v4830_v31 = vpop.eup %4829  ;;  %v2930_v5 = vadd.f32 %v2929_v61, %v2928_v35  ;;  %v2943_v50 = vrot.slane %v2942_v41, 1  ;;  %v2753_v17 = vrot.slane %v2752_v48, 1  ;;  %v2760_v47 = vrot.slane %v2759_v2, 1 }
 0x837   :  { %v2666_v54 = vmul.f32 %v4830_v31, %v6807_v32  ;;  %v2937_v11 = vadd.f32 %v2936_v56, %v2935_v7  ;;  %v2766_v44 = vadd.f32 %v2765_v45, %v2764_v19  ;;  %v2771_v39 = vadd.f32 %v2770_v21, %v2769_v63 }
 0x838   :  { %v2944_v62 = vadd.f32 %v2943_v50, %v2942_v41  ;;  %v3021_v24 = vsel %vm735_vm9, %v2930_v5, %v3020_v38  ;;  %v2754_v15 = vadd.f32 %v2753_v17, %v2752_v48  ;;  %v2761_v37 = vadd.f32 %v2760_v47, %v2759_v2 }
 0x839   :  { %v3022_v28 = vsel %vm737_vm10, %v2937_v11, %v3021_v24  ;;  %v2691_v57 = vmul.f32 %v6714_v10, %v2666_v54  ;;  %v2767_v34 = vrot.slane %v2766_v44, 1  ;;  %v2772_v36 = vrot.slane %v2771_v39, 2 }
 0x83a   :  { %v3023_v26 = vsel %vm739_vm11, %v2944_v62, %v3022_v28  ;;  %v2776_v23 = vsel %vm270_vm3, %v6837_v55, 0.0  ;;  %v2783_v32 = vsel %vm270_vm3, %v2689_v12, 0.0  ;;  %v2790_v22 = vsel %vm270_vm3, %v2690_v49, 0.0 }
 0x83b   :  { %4368 = vmatmul.msk.f32.vlgmr.msrb.gmra.mxu2 %vm270_vm3, %v3023_v26  ;;  %v2768_v59 = vadd.f32 %v2767_v34, %v2766_v44  ;;  %v2773_v9 = vadd.f32 %v2772_v36, %v2771_v39  ;;  %v2777_v60 = vrot.slane %v2776_v23, 4  ;;  %v2784_v3 = vrot.slane %v2783_v32, 4 }
 0x83c   :  { %v2954_v10 = vadd.f32 %v2953_v14, %v6819_v4  ;;  %v2791_v42 = vrot.slane %v2790_v22, 4  ;;  %v2797_v46 = vsel %vm270_vm3, %v2691_v57, 0.0  ;;  %v2827_v40 = vsel %vm727_vm5, %v2761_v37, %v2754_v15 }
 0x83d   :  { %v2885_v55 = vmul.f32 %v6725_v18, %v6828_v51  ;;  %v2778_v12 = vadd.f32 %v2777_v60, %v2776_v23  ;;  %v2785_v25 = vadd.f32 %v2784_v3, %v2783_v32  ;;  %v2798_v33 = vrot.slane %v2797_v46, 4 }
 0x83e   :  { %v2774_v29 = vrot.slane %v2773_v9, 1  ;;  %v2792_v49 = vadd.f32 %v2791_v42, %v2790_v22  ;;  %v2828_v35 = vsel %vm729_vm6, %v2768_v59, %v2827_v40  ;;  %v2886_v13 = vmul.f32 %v6725_v18, %v6825_v20 }
 0x83f   :  { %v2779_v6 = vrot.slane %v2778_v12, 2  ;;  %v2786_v4 = vrot.slane %v2785_v25, 2  ;;  %v2799_v14 = vadd.f32 %v2798_v33, %v2797_v46  ;;  %v2887_v16 = vmul.f32 %v6725_v18, %v6718_v1 }
 0x840   :  { %v2793_v53 = vrot.slane %v2792_v49, 2  ;;  %v2948_v7 = vrot.slane %v6772_v30, 2  ;;  %v2955_v51 = vrot.slane %v2954_v10, 2  ;;  %v2961_v19 = vadd.f32 %v2960_v0, %v6797_v27 }
 0x841   :  { %v2780_v63 = vadd.f32 %v2779_v6, %v2778_v12  ;;  %v2787_v61 = vadd.f32 %v2786_v4, %v2785_v25  ;;  %v2800_v41 = vrot.slane %v2799_v14, 2  ;;  %v2888_v48 = vmul.f32 %v6725_v18, %v2666_v54 }
 0x842   :  { %v2794_v20 = vadd.f32 %v2793_v53, %v2792_v49  ;;  %v2949_v2 = vadd.f32 %v2948_v7, %v6772_v30  ;;  %v2956_v56 = vadd.f32 %v2955_v51, %v2954_v10  ;;  %v2962_v38 = vrot.slane %v2961_v19, 2 }
 0x843   :  { %v2781_v45 = vrot.slane %v2780_v63, 1  ;;  %v2788_v1 = vrot.slane %v2787_v61, 1  ;;  %v2801_v21 = vadd.f32 %v2800_v41, %v2799_v14  ;;  %v2966_v31 = vsel %vm270_vm3, %v6755_v43, 0.0 }
 0x844   :  { %v2775_v5 = vadd.f32 %v2774_v29, %v2773_v9  ;;  %v2795_v50 = vrot.slane %v2794_v20, 1  ;;  %v2957_v17 = vrot.slane %v2956_v56, 1  ;;  %v2963_v27 = vadd.f32 %v2962_v38, %v2961_v19 }
 0x845   :  { %v2782_v0 = vadd.f32 %v2781_v45, %v2780_v63  ;;  %v2789_v47 = vadd.f32 %v2788_v1, %v2787_v61  ;;  %v2802_v11 = vrot.slane %v2801_v21, 1  ;;  %v2967_v44 = vrot.slane %v2966_v31, 4 }
 0x846   :  { %v2796_v18 = vadd.f32 %v2795_v50, %v2794_v20  ;;  %v2829_v54 = vsel %vm731_vm7, %v2775_v5, %v2828_v35  ;;  %v2950_v30 = vrot.slane %v2949_v2, 1  ;;  %v2958_v39 = vadd.f32 %v2957_v17, %v2956_v56 }
 0x847   :  { %v2803_v62 = vadd.f32 %v2802_v11, %v2801_v21  ;;  %v2830_v24 = vsel %vm733_vm8, %v2782_v0, %v2829_v54  ;;  %v2968_v15 = vadd.f32 %v2967_v44, %v2966_v31  ;;  %v2973_v37 = vsel %vm270_vm3, %v2885_v55, 0.0  ;;  %v4691_v31 = vld [vmem:[%s7914_s5 + $0x18] ss:$0 sm:$0xff]  ;;  %s4873_s5 = smov [#allocation3]  }
 0x848   :  { %v2831_v43 = vsel %vm735_vm9, %v2789_v47, %v2830_v24  ;;  %v2964_v28 = vrot.slane %v2963_v27, 1  ;;  %v2974_v57 = vrot.slane %v2973_v37, 4  ;;  %v2980_v34 = vsel %vm270_vm3, %v2886_v13, 0.0  ;;  %s4304_s15 = sshll.u32 %s4873_s5, 4  ;;  %s4305_s15 = int_to_ptr.vmem [resolvable:$true] %s4304_s15 }
 0x849   :  { %v2832_v36 = vsel %vm737_vm10, %v2796_v18, %v2831_v43  ;;  %v2969_v26 = vrot.slane %v2968_v15, 2  ;;  %v2981_v23 = vrot.slane %v2980_v34, 4  ;;  %v2987_v32 = vsel %vm270_vm3, %v2887_v16, 0.0 }
 0x84a   :  { %v2833_v22 = vsel %vm739_vm11, %v2803_v62, %v2832_v36  ;;  %v2975_v59 = vadd.f32 %v2974_v57, %v2973_v37  ;;  %v2988_v9 = vrot.slane %v2987_v32, 4  ;;  %v2994_v60 = vsel %vm270_vm3, %v2888_v48, 0.0  ;;  %v4371_v36 = vld [vmem:[%s7915_s6 + $0x80] sm:$0xff] }
 0x84b   :  { %4366 = vmatmul.msk.f32.gmra.mxu1 %vm270_vm3, %v2833_v22  ;;  %v2951_v3 = vadd.f32 %v2950_v30, %v2949_v2  ;;  %v2970_v10 = vadd.f32 %v2969_v26, %v2968_v15  ;;  %v2982_v42 = vadd.f32 %v2981_v23, %v2980_v34  ;;  %v2995_v46 = vrot.slane %v2994_v60, 4  ;;  %v4372_v26 = vld [vmem:[%s7915_s6 + $0x88] sm:$0xff]  ;;  %v4373_v23 = vld [vmem:[%s7915_s6 + $0x90] sm:$0xff]  ;;  %3192 = vmatpush.msrb.mxu3 %v4371_v36  ;;  %v4432_v36 = vld [vmem:[%s7917_s8 + $0x858] sm:$0xff] }
 0x84c   :  { %v2965_v40 = vadd.f32 %v2964_v28, %v2963_v27  ;;  %v2976_v55 = vrot.slane %v2975_v59, 2  ;;  %v2989_v12 = vadd.f32 %v2988_v9, %v2987_v32  ;;  %3215 = vmatpush.msra.mxu0 %v4372_v26  ;;  %v4374_v32 = vld [vmem:[%s7915_s6 + $0x98] sm:$0xff]  ;;  %3238 = vmatpush.msra.mxu1 %v4373_v23  ;;  %v4447_v23 = vld [vmem:[%s7917_s8 + $0x8d0] sm:$0xff] }
 0x84d   :  { %v2971_v25 = vrot.slane %v2970_v10, 1  ;;  %v2983_v33 = vrot.slane %v2982_v42, 2  ;;  %v2996_v29 = vadd.f32 %v2995_v46, %v2994_v60  ;;  %v3024_v49 = vsel %vm727_vm5, %v2958_v39, %v2951_v3  ;;  %3261 = vmatpush.msra.mxu2 %v4374_v32  ;;  %v4370_v46 = vld [vmem:[%s7919_s10 + $0x4] sm:$0xf]  ;;  %v4480_v26 = vld [vmem:[%s7917_s8 + $0x9d8] sm:$0xff]  ;;  %v4463_v32 = vld [vmem:[%s7917_s8 + $0x950] sm:$0xff] }
 0x84e   :  { %v2977_v35 = vadd.f32 %v2976_v55, %v2975_v59  ;;  %v2990_v13 = vrot.slane %v2989_v12, 2  ;;  %v3025_v53 = vsel %vm729_vm6, %v2965_v40, %v3024_v49  ;;  %v4375_v49 = vld [vmem:[%s7915_s6 + $0xa0] sm:$0xff] }
 0x84f   :  { %v2984_v6 = vadd.f32 %v2983_v33, %v2982_v42  ;;  %v2997_v4 = vrot.slane %v2996_v29, 2  ;;  %v2972_v7 = vadd.f32 %v2971_v25, %v2970_v10  ;;  %v3114_v33 = vperm.slane %v4370_v46, 1  ;;  %3284 = vmatpush.msra.mxu3 %v4375_v49  ;;  %v4443_v49 = vld [vmem:[%s7917_s8 + $0x8b0] sm:$0xff] }
 0x850   :  { %v2978_v14 = vrot.slane %v2977_v35, 1  ;;  %v2991_v16 = vadd.f32 %v2990_v13, %v2989_v12  ;;  %v3111_v12 = vperm.slane %v4370_v46, 0  ;;  %v4461_v46 = vld [vmem:[%s7917_s8 + $0x940] sm:$0xff] }
 0x851   :  { %v2985_v51 = vrot.slane %v2984_v6, 1  ;;  %v2998_v19 = vadd.f32 %v2997_v4, %v2996_v29  ;;  %v3026_v20 = vsel %vm731_vm7, %v2972_v7, %v3025_v53  ;;  %v4376_v4 = vld [vmem:[%s7915_s6 + $0xa8] sm:$0xff] }
 0x852   :  { %v2979_v63 = vadd.f32 %v2978_v14, %v2977_v35  ;;  %v2992_v61 = vrot.slane %v2991_v16, 1  ;;  %v4378_v35 = vld [vmem:[%s7915_s6 + $0xb8] sm:$0xff]  ;;  %v4377_v14 = vld [vmem:[%s7915_s6 + $0xb0] sm:$0xff]  ;;  %3307 = vmatpush.msrb.mxu0 %v4376_v4 }
 0x853   :  { %v2986_v41 = vadd.f32 %v2985_v51, %v2984_v6  ;;  %v2999_v48 = vrot.slane %v2998_v19, 1  ;;  %3353 = vmatpush.msrb.mxu2 %v4378_v35  ;;  %3330 = vmatpush.msrb.mxu1 %v4377_v14  ;;  %v4379_v51 = vld [vmem:[%s7915_s6 + $0xc0] sm:$0xff]  ;;  %v4459_v35 = vld [vmem:[%s7917_s8 + $0x930] sm:$0xff]  ;;  %v4442_v14 = vld [vmem:[%s7917_s8 + $0x8a8] sm:$0xff] }
 0x854   :  { %v2993_v2 = vadd.f32 %v2992_v61, %v2991_v16  ;;  %v3027_v56 = vsel %vm733_vm8, %v2979_v63, %v3026_v20  ;;  %v4381_v20 = vld [vmem:[%s7915_s6 + $0xd0] sm:$0xff] }
 0x855   :  { %v3000_v38 = vadd.f32 %v2999_v48, %v2998_v19  ;;  %v3028_v45 = vsel %vm735_vm9, %v2986_v41, %v3027_v56  ;;  %v4382_v19 = vld [vmem:[%s7915_s6 + $0xd8] sm:$0xff]  ;;  %v4380_v48 = vld [vmem:[%s7915_s6 + $0xc8] sm:$0xff]  ;;  %v4475_v4 = vld [vmem:[%s7917_s8 + $0x9b0] sm:$0xff] }
 0x856   :  { %v3029_v1 = vsel %vm737_vm10, %v2993_v2, %v3028_v45 }
 0x857   :  { %v3030_v21 = vsel %vm739_vm11, %v3000_v38, %v3029_v1 }
 0x858   :  { %4369 = vmatmul.msk.f32.gmra.mxu2 %vm270_vm3, %v3030_v21 }
 0x8a9   :  { %v2858_v5 = vpop.f32.mrf.mxu1 }
 0x8aa   :  { %v2865_v50 = vadd.f32 %v4691_v31, %v2858_v5  ;;  %v4383_v5 = vld [vmem:[%s7915_s6 + $0xe0] sm:$0xff] }
 0x8be   :  { %v3055_v17 = vpop.f32.mrf.mxu2 }
 0x8bf   :  { %v3061_v27 = vadd.f32 %v3055_v17, %v2865_v50  ;;  %v4386_v50 = vld [vmem:[%s7915_s6 + $0xf8] sm:$0xff]  ;;  %v4384_v17 = vld [vmem:[%s7915_s6 + $0xe8] sm:$0xff] }
 0x8c1   :  { %v3065_v0 = vadd.f32 %v3061_v27, %v6420_v58  ;;  %v4385_v27 = vld [vmem:[%s7915_s6 + $0xf0] sm:$0xff] }
 0x8c3   :  { %v3067_v47 = vsel %vm86_vm2, %v3065_v0, 0.0 }
 0x8c4   :  { %3068 = vadd.xlane.f32.xlu2 %v3067_v47  ;;  %v4468_v47 = vld [vmem:[%s7917_s8 + $0x978] sm:$0xff] }
 0x8c8   :  { %v2861_v11 = vpop.f32.mrf.mxu1 }
 0x8c9   :  { %v2866_v44 = vadd.f32 %v4691_v31, %v2861_v11  ;;  %v4436_v11 = vld [vmem:[%s7917_s8 + $0x878] sm:$0xff] }
 0x8db   :  { %v3058_v18 = vpop.f32.mrf.mxu2 }
 0x8dc   :  { %v3062_v54 = vadd.f32 %v3058_v18, %v2866_v44  ;;  %v4484_v44 = vld [vmem:[%s7917_s8 + $0x9f8] sm:$0xff]  ;;  %v4451_v18 = vld [vmem:[%s7917_s8 + $0x8f0] sm:$0xff] }
 0x8de   :  { %v3066_v30 = vadd.f32 %v3062_v54, %v6424_v52  ;;  %v4467_v54 = vld [vmem:[%s7917_s8 + $0x970] sm:$0xff] }
 0x8e0   :  { %v3070_v39 = vsel %vm86_vm2, %v3066_v30, 0.0 }
 0x8e1   :  { %3071 = vadd.xlane.f32.xlu1 %v3070_v39  ;;  %v4483_v39 = vld [vmem:[%s7917_s8 + $0x9f0] sm:$0xff] }
 0x937   :  { %v3069_v62 = vpop.xlane.xlu2 %3068 }
 0x938   :  { %v3073_v24 = vmul.f32 %v3069_v62, %v5435_v8  ;;  %v4450_v62 = vld [vmem:[%s7917_s8 + $0x8e8] sm:$0xff] }
 0x93a   :  { %v3075_v15 = vsub.f32 %v3065_v0, %v3073_v24  ;;  %v4452_v0 = vld [vmem:[%s7917_s8 + $0x8f8] sm:$0xff]  ;;  %v4466_v24 = vld [vmem:[%s7917_s8 + $0x968] sm:$0xff] }
 0x93c   :  { %v3077_v37 = vmul.f32 %v3075_v15, %v3075_v15 }
 0x93e   :  { %v3079_v43 = vsel %vm86_vm2, %v3077_v37, 0.0  ;;  %v4482_v37 = vld [vmem:[%s7917_s8 + $0x9e8] sm:$0xff] }
 0x93f   :  { %3080 = vadd.xlane.f32.xlu0 %v3079_v43  ;;  %v4449_v43 = vld [vmem:[%s7917_s8 + $0x8e0] sm:$0xff] }
 0x954   :  { %v3072_v58 = vpop.xlane.xlu1 %3071 }
 0x955   :  { %v3074_v28 = vmul.f32 %v3072_v58, %v5435_v8  ;;  %v4465_v58 = vld [vmem:[%s7917_s8 + $0x960] sm:$0xff] }
 0x957   :  { %v6925_v57 = vsub.f32 %v3066_v30, %v3074_v28  ;;  %v4435_v30 = vld [vmem:[%s7917_s8 + $0x870] sm:$0xff]  ;;  %v4433_v28 = vld [vmem:[%s7917_s8 + $0x860] sm:$0xff] }
 0x959   :  { %v3078_v34 = vmul.f32 %v6925_v57, %v6925_v57 }
 0x95b   :  { %v3082_v52 = vsel %vm86_vm2, %v3078_v34, 0.0  ;;  %v4448_v34 = vld [vmem:[%s7917_s8 + $0x8d8] sm:$0xff] }
 0x95c   :  { %3083 = vadd.xlane.f32.xlu2 %v3082_v52  ;;  %v4464_v52 = vld [vmem:[%s7917_s8 + $0x958] sm:$0xff] }
 0x9b2   :  { %v3081_v22 = vpop.xlane.xlu0 %3080 }
 0x9b3   :  { %v3085_v59 = vmul.f32 %v3081_v22, %v5435_v8  ;;  %v4431_v22 = vld [vmem:[%s7917_s8 + $0x850] sm:$0xff] }
 0x9b5   :  { %v3087_v9 = vadd.f32 1e-05, %v3085_v59  ;;  %v4479_v59 = vld [vmem:[%s7917_s8 + $0x9d0] sm:$0xff] }
 0x9b7   :  { %4831 = vrsqrt.f32 %v3087_v9  ;;  %vm3095_vm4 = vweird.f32 %v3087_v9 }
 0x9bd   :  { %v4832_v60 = vpop.eup %4831 }
 0x9be   :  { %v3090_v3 = vmul.f32 %v4832_v60, %v3087_v9  ;;  %vm3096_vm3 = vweird.f32 %v4832_v60  ;;  %v4446_v9 = vld [vmem:[%s7917_s8 + $0x8c8] sm:$0xff] }
 0x9bf   :  { %vm3097_vm5 = vmor %vm3095_vm4, %vm3096_vm3 }
 0x9c0   :  { %v3091_v10 = vmul.f32 %v4832_v60, %v3090_v3  ;;  %v4430_v3 = vld [vmem:[%s7917_s8 + $0x848] sm:$0xff] }
 0x9c2   :  { %v3092_v42 = vmul.f32 0.5, %v3091_v10  ;;  %v4478_v10 = vld [vmem:[%s7917_s8 + $0x9c8] sm:$0xff] }
 0x9c4   :  { %v3093_v40 = vsub.f32 1.5, %v3092_v42  ;;  %v4445_v42 = vld [vmem:[%s7917_s8 + $0x8c0] sm:$0xff] }
 0x9c6   :  { %v3094_v55 = vmul.f32 %v4832_v60, %v3093_v40  ;;  %v4429_v40 = vld [vmem:[%s7917_s8 + $0x840] sm:$0xff] }
 0x9c8   :  { %v3098_v25 = vsel %vm3097_vm5, %v4832_v60, %v3094_v55  ;;  %v4462_v60 = vld [vmem:[%s7917_s8 + $0x948] sm:$0xff]  ;;  %v4477_v55 = vld [vmem:[%s7917_s8 + $0x9c0] sm:$0xff] }
 0x9c9   :  { %v3109_v29 = vmul.f32 %v3098_v25, %v3075_v15  ;;  %v4434_v15 = vld [vmem:[%s7917_s8 + $0x868] sm:$0xff]  ;;  %v4460_v25 = vld [vmem:[%s7917_s8 + $0x938] sm:$0xff] }
 0x9cb   :  { %v3112_v13 = vmul.f32 %v3111_v12, %v3109_v29  ;;  %v4476_v29 = vld [vmem:[%s7917_s8 + $0x9b8] sm:$0xff] }
 0x9cd   :  { %v6952_v6 = vadd.f32 %v3114_v33, %v3112_v13  ;;  %v4427_v13 = vld [vmem:[%s7917_s8 + $0x830] sm:$0xff] }
 0x9cf   :  { %4389 = vmatmul.msk.f32.vlgmr.msrb.gmra.mxu3 %vm86_vm2, %v6952_v6  ;;  %4391 = vmatmul.msk.f32.vlgmr.msra.gmra.mxu0 %vm86_vm2, %v6952_v6  ;;  %v3084_v16 = vpop.xlane.xlu2 %3083 }
 0x9d0   :  { %4393 = vmatmul.msk.f32.vlgmr.msra.gmra.mxu1 %vm86_vm2, %v6952_v6  ;;  %4395 = vmatmul.msk.f32.vlgmr.msra.gmra.mxu2 %vm86_vm2, %v6952_v6  ;;  %v3086_v53 = vmul.f32 %v3084_v16, %v5435_v8  ;;  %v4458_v16 = vld [vmem:[%s7917_s8 + $0x928] sm:$0xff] }
 0x9d1   :  { %3376 = vmatpush.msrb.mxu3 %v4379_v51  ;;  %3445 = vmatpush.msra.mxu2 %v4382_v19  ;;  %v4441_v51 = vld [vmem:[%s7917_s8 + $0x8a0] sm:$0xff] }
 0x9d2   :  { %v3088_v7 = vadd.f32 1e-05, %v3086_v53  ;;  %3399 = vmatpush.msra.mxu0 %v4380_v48  ;;  %3422 = vmatpush.msra.mxu1 %v4381_v20  ;;  %v4426_v53 = vld [vmem:[%s7917_s8 + $0x828] sm:$0xff]  ;;  %v4457_v19 = vld [vmem:[%s7917_s8 + $0x920] sm:$0xff]  ;;  %v4456_v48 = vld [vmem:[%s7917_s8 + $0x918] sm:$0xff] }
 0x9d3   :  { %v4424_v20 = vld [vmem:[%s7917_s8 + $0x818] sm:$0xff] }
 0x9d4   :  { %4833 = vrsqrt.f32 %v3088_v7  ;;  %vm3105_vm7 = vweird.f32 %v3088_v7 }
 0x9da   :  { %v4834_v63 = vpop.eup %4833 }
 0x9db   :  { %v3100_v61 = vmul.f32 %v4834_v63, %v3088_v7  ;;  %vm3106_vm6 = vweird.f32 %v4834_v63  ;;  %v4474_v7 = vld [vmem:[%s7917_s8 + $0x9a8] sm:$0xff] }
 0x9dc   :  { %vm3107_vm8 = vmor %vm3105_vm7, %vm3106_vm6 }
 0x9dd   :  { %v3101_v41 = vmul.f32 %v4834_v63, %v3100_v61  ;;  %v4473_v61 = vld [vmem:[%s7917_s8 + $0x9a0] sm:$0xff] }
 0x9df   :  { %v3102_v2 = vmul.f32 0.5, %v3101_v41  ;;  %v4440_v41 = vld [vmem:[%s7917_s8 + $0x898] sm:$0xff] }
 0x9e1   :  { %v3103_v56 = vsub.f32 1.5, %v3102_v2  ;;  %v4472_v2 = vld [vmem:[%s7917_s8 + $0x998] sm:$0xff] }
 0x9e3   :  { %v3104_v38 = vmul.f32 %v4834_v63, %v3103_v56  ;;  %v4439_v56 = vld [vmem:[%s7917_s8 + $0x890] sm:$0xff] }
 0x9e5   :  { %v3108_v45 = vsel %vm3107_vm8, %v4834_v63, %v3104_v38  ;;  %v4425_v63 = vld [vmem:[%s7917_s8 + $0x820] sm:$0xff]  ;;  %v4455_v38 = vld [vmem:[%s7917_s8 + $0x910] sm:$0xff] }
 0x9e6   :  { %v3110_v1 = vmul.f32 %v3108_v45, %v6925_v57  ;;  %v4481_v57 = vld [vmem:[%s7917_s8 + $0x9e0] sm:$0xff]  ;;  %v4423_v45 = vld [vmem:[%s7917_s8 + $0x810] sm:$0xff] }
 0x9e8   :  { %v3113_v21 = vmul.f32 %v3111_v12, %v3110_v1  ;;  %v4444_v12 = vld [vmem:[%s7917_s8 + $0x8b8] sm:$0xff]  ;;  %v4471_v1 = vld [vmem:[%s7917_s8 + $0x990] sm:$0xff] }
 0x9ea   :  { %v6982_v31 = vadd.f32 %v3114_v33, %v3113_v21  ;;  %v4428_v33 = vld [vmem:[%s7917_s8 + $0x838] sm:$0xff]  ;;  %v4438_v21 = vld [vmem:[%s7917_s8 + $0x888] sm:$0xff] }
 0x9ec   :  { %4390 = vmatmul.msk.f32.gmra.mxu3 %vm86_vm2, %v6982_v31  ;;  %4392 = vmatmul.msk.f32.gmra.mxu0 %vm86_vm2, %v6982_v31 }
 0x9ed   :  { %4394 = vmatmul.msk.f32.gmra.mxu1 %vm86_vm2, %v6982_v31  ;;  %4396 = vmatmul.msk.f32.gmra.mxu2 %vm86_vm2, %v6982_v31 }
 0x9f4   :  { %4397 = vmatmul.msk.f32.vlgmr.msra.gmra.mxu3 %vm86_vm2, %v6952_v6  ;;  %4399 = vmatmul.msk.f32.vlgmr.msrb.gmra.mxu0 %vm86_vm2, %v6952_v6 }
 0x9f5   :  { %4401 = vmatmul.msk.f32.vlgmr.msrb.gmra.mxu1 %vm86_vm2, %v6952_v6  ;;  %4403 = vmatmul.msk.f32.vlgmr.msrb.gmra.mxu2 %vm86_vm2, %v6952_v6 }
 0x9f6   :  { %3468 = vmatpush.msra.mxu3 %v4383_v5  ;;  %3537 = vmatpush.msrb.mxu2 %v4386_v50  ;;  %v4454_v5 = vld [vmem:[%s7917_s8 + $0x908] sm:$0xff] }
 0x9f7   :  { %3491 = vmatpush.msrb.mxu0 %v4384_v17  ;;  %3514 = vmatpush.msrb.mxu1 %v4385_v27  ;;  %v4422_v50 = vld [vmem:[%s7917_s8 + $0x808] sm:$0xff]  ;;  %v4437_v27 = vld [vmem:[%s7917_s8 + $0x880] sm:$0xff] }
 0x9f8   :  { %v4470_v17 = vld [vmem:[%s7917_s8 + $0x988] sm:$0xff] }
 0x9fc   :  { %4398 = vmatmul.msk.f32.gmra.mxu3 %vm86_vm2, %v6982_v31  ;;  %4400 = vmatmul.msk.f32.gmra.mxu0 %vm86_vm2, %v6982_v31 }
 0x9fd   :  { %4402 = vmatmul.msk.f32.gmra.mxu1 %vm86_vm2, %v6982_v31  ;;  %4404 = vmatmul.msk.f32.gmra.mxu2 %vm86_vm2, %v6982_v31 }
 0xa04   :  { %4405 = vmatmul.msk.f32.vlgmr.msrb.gmra.mxu3 %vm86_vm2, %v6952_v6  ;;  %4407 = vmatmul.msk.f32.vlgmr.msra.gmra.mxu0 %vm86_vm2, %v6952_v6 }
 0xa05   :  { %4409 = vmatmul.msk.f32.vlgmr.msra.gmra.mxu1 %vm86_vm2, %v6952_v6  ;;  %4411 = vmatmul.msk.f32.vlgmr.msra.gmra.mxu2 %vm86_vm2, %v6952_v6 }
 0xa06   :  { %3862 = vmatpush.msra.mxu0 %v4452_v0  ;;  %3885 = vmatpush.msra.mxu1 %v4468_v47  ;;  %v4453_v0 = vld [vmem:[%s7917_s8 + $0x900] sm:$0xff]  ;;  %v4516_v47 = vld [vmem:[%s7917_s8 + $0xaf8] sm:$0xff] }
 0xa07   :  { %3839 = vmatpush.msrb.mxu3 %v4436_v11  ;;  %3908 = vmatpush.msra.mxu2 %v4484_v44  ;;  %v4532_v11 = vld [vmem:[%s7917_s8 + $0xb78] sm:$0xff]  ;;  %v4421_v44 = vld [vmem:[%s7917_s8 + $0x800] sm:$0xff] }
 0xa08   :  { %3863 = vmatpush.msra.mxu0 %v4451_v18  ;;  %3886 = vmatpush.msra.mxu1 %v4467_v54  ;;  %v4469_v18 = vld [vmem:[%s7917_s8 + $0x980] sm:$0xff]  ;;  %v4515_v54 = vld [vmem:[%s7917_s8 + $0xaf0] sm:$0xff] }
 0xa09   :  { %3840 = vmatpush.msrb.mxu3 %v4435_v30  ;;  %3909 = vmatpush.msra.mxu2 %v4483_v39  ;;  %v4531_v30 = vld [vmem:[%s7917_s8 + $0xb70] sm:$0xff]  ;;  %v4500_v39 = vld [vmem:[%s7917_s8 + $0xa78] sm:$0xff] }
 0xa0a   :  { %3864 = vmatpush.msra.mxu0 %v4450_v62  ;;  %3887 = vmatpush.msra.mxu1 %v4466_v24  ;;  %v4548_v62 = vld [vmem:[%s7917_s8 + $0xbf8] sm:$0xff]  ;;  %v4514_v24 = vld [vmem:[%s7917_s8 + $0xae8] sm:$0xff] }
 0xa0b   :  { %3841 = vmatpush.msrb.mxu3 %v4434_v15  ;;  %3910 = vmatpush.msra.mxu2 %v4482_v37  ;;  %v4530_v15 = vld [vmem:[%s7917_s8 + $0xb68] sm:$0xff]  ;;  %v4499_v37 = vld [vmem:[%s7917_s8 + $0xa70] sm:$0xff] }
 0xa0c   :  { %4406 = vmatmul.msk.f32.gmra.mxu3 %vm86_vm2, %v6982_v31  ;;  %4408 = vmatmul.msk.f32.gmra.mxu0 %vm86_vm2, %v6982_v31 }
 0xa0d   :  { %4410 = vmatmul.msk.f32.gmra.mxu1 %vm86_vm2, %v6982_v31  ;;  %4412 = vmatmul.msk.f32.gmra.mxu2 %vm86_vm2, %v6982_v31 }
 0xa0e   :  { %3865 = vmatpush.msra.mxu0 %v4449_v43  ;;  %3888 = vmatpush.msra.mxu1 %v4465_v58  ;;  %v4547_v43 = vld [vmem:[%s7917_s8 + $0xbf0] sm:$0xff]  ;;  %v4513_v58 = vld [vmem:[%s7917_s8 + $0xae0] sm:$0xff] }
 0xa0f   :  { %3842 = vmatpush.msrb.mxu3 %v4433_v28  ;;  %3911 = vmatpush.msra.mxu2 %v4481_v57  ;;  %v4529_v28 = vld [vmem:[%s7917_s8 + $0xb60] sm:$0xff]  ;;  %v4498_v57 = vld [vmem:[%s7917_s8 + $0xa68] sm:$0xff] }
 0xa10   :  { %3866 = vmatpush.msra.mxu0 %v4448_v34  ;;  %3889 = vmatpush.msra.mxu1 %v4464_v52  ;;  %v4546_v34 = vld [vmem:[%s7917_s8 + $0xbe8] sm:$0xff]  ;;  %v4512_v52 = vld [vmem:[%s7917_s8 + $0xad8] sm:$0xff] }
 0xa11   :  { %3843 = vmatpush.msrb.mxu3 %v4432_v36  ;;  %3912 = vmatpush.msra.mxu2 %v4480_v26  ;;  %v4528_v36 = vld [vmem:[%s7917_s8 + $0xb58] sm:$0xff]  ;;  %v4497_v26 = vld [vmem:[%s7917_s8 + $0xa60] sm:$0xff] }
 0xa12   :  { %3867 = vmatpush.msra.mxu0 %v4447_v23  ;;  %3890 = vmatpush.msra.mxu1 %v4463_v32  ;;  %v4545_v23 = vld [vmem:[%s7917_s8 + $0xbe0] sm:$0xff]  ;;  %v4511_v32 = vld [vmem:[%s7917_s8 + $0xad0] sm:$0xff] }
 0xa13   :  { %3844 = vmatpush.msrb.mxu3 %v4431_v22  ;;  %3913 = vmatpush.msra.mxu2 %v4479_v59  ;;  %v4527_v22 = vld [vmem:[%s7917_s8 + $0xb50] sm:$0xff]  ;;  %v4496_v59 = vld [vmem:[%s7917_s8 + $0xa58] sm:$0xff] }
 0xa14   :  { %4413 = vmatmul.msk.f32.vlgmr.msra.gmra.mxu3 %vm86_vm2, %v6952_v6  ;;  %4415 = vmatmul.msk.f32.vlgmr.msrb.gmra.mxu0 %vm86_vm2, %v6952_v6 }
 0xa15   :  { %4417 = vmatmul.msk.f32.vlgmr.msrb.gmra.mxu1 %vm86_vm2, %v6952_v6  ;;  %4419 = vmatmul.msk.f32.vlgmr.msrb.gmra.mxu2 %vm86_vm2, %v6952_v6 }
 0xa16   :  { %3868 = vmatpush.msra.mxu0 %v4446_v9  ;;  %3891 = vmatpush.msra.mxu1 %v4462_v60  ;;  %v4544_v9 = vld [vmem:[%s7917_s8 + $0xbd8] sm:$0xff]  ;;  %v4510_v60 = vld [vmem:[%s7917_s8 + $0xac8] sm:$0xff] }
 0xa17   :  { %3845 = vmatpush.msrb.mxu3 %v4430_v3  ;;  %3914 = vmatpush.msra.mxu2 %v4478_v10  ;;  %v4526_v3 = vld [vmem:[%s7917_s8 + $0xb48] sm:$0xff]  ;;  %v4495_v10 = vld [vmem:[%s7917_s8 + $0xa50] sm:$0xff] }
 0xa18   :  { %3869 = vmatpush.msra.mxu0 %v4445_v42  ;;  %3892 = vmatpush.msra.mxu1 %v4461_v46  ;;  %v4543_v42 = vld [vmem:[%s7917_s8 + $0xbd0] sm:$0xff]  ;;  %v4509_v46 = vld [vmem:[%s7917_s8 + $0xac0] sm:$0xff] }
 0xa19   :  { %3846 = vmatpush.msrb.mxu3 %v4429_v40  ;;  %3915 = vmatpush.msra.mxu2 %v4477_v55  ;;  %v4525_v40 = vld [vmem:[%s7917_s8 + $0xb40] sm:$0xff]  ;;  %v4494_v55 = vld [vmem:[%s7917_s8 + $0xa48] sm:$0xff] }
 0xa1a   :  { %3870 = vmatpush.msra.mxu0 %v4444_v12  ;;  %3893 = vmatpush.msra.mxu1 %v4460_v25  ;;  %v4542_v12 = vld [vmem:[%s7917_s8 + $0xbc8] sm:$0xff]  ;;  %v4508_v25 = vld [vmem:[%s7917_s8 + $0xab8] sm:$0xff] }
 0xa1b   :  { %3847 = vmatpush.msrb.mxu3 %v4428_v33  ;;  %3916 = vmatpush.msra.mxu2 %v4476_v29  ;;  %v4524_v33 = vld [vmem:[%s7917_s8 + $0xb38] sm:$0xff]  ;;  %v4493_v29 = vld [vmem:[%s7917_s8 + $0xa40] sm:$0xff] }
 0xa1c   :  { %4414 = vmatmul.msk.f32.gmra.mxu3 %vm86_vm2, %v6982_v31  ;;  %4416 = vmatmul.msk.f32.gmra.mxu0 %vm86_vm2, %v6982_v31 }
 0xa1d   :  { %4418 = vmatmul.msk.f32.gmra.mxu1 %vm86_vm2, %v6982_v31  ;;  %4420 = vmatmul.msk.f32.gmra.mxu2 %vm86_vm2, %v6982_v31 }
 0xa1e   :  { %3871 = vmatpush.msra.mxu0 %v4443_v49  ;;  %3894 = vmatpush.msra.mxu1 %v4459_v35  ;;  %v4541_v49 = vld [vmem:[%s7917_s8 + $0xbc0] sm:$0xff]  ;;  %v4507_v35 = vld [vmem:[%s7917_s8 + $0xab0] sm:$0xff] }
 0xa1f   :  { %3848 = vmatpush.msrb.mxu3 %v4427_v13  ;;  %3917 = vmatpush.msra.mxu2 %v4475_v4  ;;  %v4523_v13 = vld [vmem:[%s7917_s8 + $0xb30] sm:$0xff]  ;;  %v4492_v4 = vld [vmem:[%s7917_s8 + $0xa38] sm:$0xff] }
 0xa20   :  { %3872 = vmatpush.msra.mxu0 %v4442_v14  ;;  %3895 = vmatpush.msra.mxu1 %v4458_v16  ;;  %v4540_v14 = vld [vmem:[%s7917_s8 + $0xbb8] sm:$0xff]  ;;  %v4506_v16 = vld [vmem:[%s7917_s8 + $0xaa8] sm:$0xff] }
 0xa21   :  { %3849 = vmatpush.msrb.mxu3 %v4426_v53  ;;  %3918 = vmatpush.msra.mxu2 %v4474_v7  ;;  %v4522_v53 = vld [vmem:[%s7917_s8 + $0xb28] sm:$0xff]  ;;  %v4491_v7 = vld [vmem:[%s7917_s8 + $0xa30] sm:$0xff] }
 0xa22   :  { %3873 = vmatpush.msra.mxu0 %v4441_v51  ;;  %3896 = vmatpush.msra.mxu1 %v4457_v19  ;;  %v4539_v51 = vld [vmem:[%s7917_s8 + $0xbb0] sm:$0xff]  ;;  %v4505_v19 = vld [vmem:[%s7917_s8 + $0xaa0] sm:$0xff] }
 0xa23   :  { %3850 = vmatpush.msrb.mxu3 %v4425_v63  ;;  %3919 = vmatpush.msra.mxu2 %v4473_v61  ;;  %v4521_v63 = vld [vmem:[%s7917_s8 + $0xb20] sm:$0xff]  ;;  %v4490_v61 = vld [vmem:[%s7917_s8 + $0xa28] sm:$0xff] }
 0xa24   :  { %3874 = vmatpush.msra.mxu0 %v4440_v41  ;;  %3897 = vmatpush.msra.mxu1 %v4456_v48  ;;  %v4538_v41 = vld [vmem:[%s7917_s8 + $0xba8] sm:$0xff]  ;;  %v4504_v48 = vld [vmem:[%s7917_s8 + $0xa98] sm:$0xff] }
 0xa25   :  { %3851 = vmatpush.msrb.mxu3 %v4424_v20  ;;  %3920 = vmatpush.msra.mxu2 %v4472_v2  ;;  %v4520_v20 = vld [vmem:[%s7917_s8 + $0xb18] sm:$0xff]  ;;  %v4489_v2 = vld [vmem:[%s7917_s8 + $0xa20] sm:$0xff] }
 0xa26   :  { %3875 = vmatpush.msra.mxu0 %v4439_v56  ;;  %3898 = vmatpush.msra.mxu1 %v4455_v38  ;;  %v4537_v56 = vld [vmem:[%s7917_s8 + $0xba0] sm:$0xff]  ;;  %v4503_v38 = vld [vmem:[%s7917_s8 + $0xa90] sm:$0xff] }
 0xa27   :  { %3852 = vmatpush.msrb.mxu3 %v4423_v45  ;;  %3921 = vmatpush.msra.mxu2 %v4471_v1  ;;  %v4519_v45 = vld [vmem:[%s7917_s8 + $0xb10] sm:$0xff]  ;;  %v4488_v1 = vld [vmem:[%s7917_s8 + $0xa18] sm:$0xff] }
 0xa28   :  { %3876 = vmatpush.msra.mxu0 %v4438_v21  ;;  %3899 = vmatpush.msra.mxu1 %v4454_v5  ;;  %v4536_v21 = vld [vmem:[%s7917_s8 + $0xb98] sm:$0xff]  ;;  %v4502_v5 = vld [vmem:[%s7917_s8 + $0xa88] sm:$0xff] }
 0xa29   :  { %3853 = vmatpush.msrb.mxu3 %v4422_v50  ;;  %3922 = vmatpush.msra.mxu2 %v4470_v17  ;;  %v4518_v50 = vld [vmem:[%s7917_s8 + $0xb08] sm:$0xff]  ;;  %v4487_v17 = vld [vmem:[%s7917_s8 + $0xa10] sm:$0xff] }
 0xa2a   :  { %3877 = vmatpush.msra.mxu0 %v4437_v27  ;;  %3900 = vmatpush.msra.mxu1 %v4453_v0  ;;  %v4535_v27 = vld [vmem:[%s7917_s8 + $0xb90] sm:$0xff] }
 0xa2b   :  { %3854 = vmatpush.msrb.mxu3 %v4421_v44  ;;  %3923 = vmatpush.msra.mxu2 %v4469_v18  ;;  %v7421_v0 = vld [vmem:[%s7916_s7 + $0x10] sm:$0xff]  ;;  %v4486_v44 = vld [vmem:[%s7917_s8 + $0xa08] sm:$0xff] }
 0xa2c   :  { %3954 = vmatpush.msrb.mxu0 %v4516_v47  ;;  %3977 = vmatpush.msrb.mxu1 %v4532_v11  ;;  %v4501_v47 = vld [vmem:[%s7917_s8 + $0xa80] sm:$0xff]  ;;  %v4534_v18 = vld [vmem:[%s7917_s8 + $0xb88] sm:$0xff] }
 0xa2d   :  { %3931 = vmatpush.msra.mxu3 %v4500_v39  ;;  %4000 = vmatpush.msrb.mxu2 %v4548_v62  ;;  %v4517_v11 = vld [vmem:[%s7917_s8 + $0xb00] sm:$0xff]  ;;  %v3141_v62 = vperm.slane %v7421_v0, 2 }
 0xa2e   :  { %3955 = vmatpush.msrb.mxu0 %v4515_v54  ;;  %3978 = vmatpush.msrb.mxu1 %v4531_v30  ;;  %v3140_v54 = vperm.slane %v7421_v0, 1  ;;  %v4485_v30 = vld [vmem:[%s7917_s8 + $0xa00] sm:$0xff] }
 0xa2f   :  { %3932 = vmatpush.msra.mxu3 %v4499_v37  ;;  %4001 = vmatpush.msrb.mxu2 %v4547_v43  ;;  %v4533_v39 = vld [vmem:[%s7917_s8 + $0xb80] sm:$0xff] }
 0xa30   :  { %3956 = vmatpush.msrb.mxu0 %v4514_v24  ;;  %3979 = vmatpush.msrb.mxu1 %v4530_v15 }
 0xa31   :  { %3933 = vmatpush.msra.mxu3 %v4498_v57  ;;  %4002 = vmatpush.msrb.mxu2 %v4546_v34  ;;  %v4580_v57 = vld [vmem:[%s7917_s8 + $0xcf8] sm:$0xff] }
 0xa32   :  { %3957 = vmatpush.msrb.mxu0 %v4513_v58  ;;  %3980 = vmatpush.msrb.mxu1 %v4529_v28  ;;  %v3139_v28 = vperm.slane %v7421_v0, 0 }
 0xa33   :  { %3934 = vmatpush.msra.mxu3 %v4497_v26  ;;  %4003 = vmatpush.msrb.mxu2 %v4545_v23  ;;  %v4579_v26 = vld [vmem:[%s7917_s8 + $0xcf0] sm:$0xff] }
 0xa34   :  { %3958 = vmatpush.msrb.mxu0 %v4512_v52  ;;  %3981 = vmatpush.msrb.mxu1 %v4528_v36  ;;  %v3142_v52 = vperm.slane %v7421_v0, 3  ;;  %v4596_v36 = vld [vmem:[%s7917_s8 + $0xd78] sm:$0xff] }
 0xa35   :  { %3935 = vmatpush.msra.mxu3 %v4496_v59  ;;  %4004 = vmatpush.msrb.mxu2 %v4544_v9  ;;  %v4578_v9 = vld [vmem:[%s7917_s8 + $0xce8] sm:$0xff] }
 0xa36   :  { %3959 = vmatpush.msrb.mxu0 %v4511_v32  ;;  %3982 = vmatpush.msrb.mxu1 %v4527_v22  ;;  %v4595_v32 = vld [vmem:[%s7917_s8 + $0xd70] sm:$0xff] }
 0xa37   :  { %3936 = vmatpush.msra.mxu3 %v4495_v10  ;;  %4005 = vmatpush.msrb.mxu2 %v4543_v42  ;;  %v4564_v42 = vld [vmem:[%s7917_s8 + $0xc78] sm:$0xff] }
 0xa38   :  { %3960 = vmatpush.msrb.mxu0 %v4510_v60  ;;  %3983 = vmatpush.msrb.mxu1 %v4526_v3  ;;  %v4594_v3 = vld [vmem:[%s7917_s8 + $0xd68] sm:$0xff] }
 0xa39   :  { %3937 = vmatpush.msra.mxu3 %v4494_v55  ;;  %4006 = vmatpush.msrb.mxu2 %v4542_v12  ;;  %v4593_v55 = vld [vmem:[%s7917_s8 + $0xd60] sm:$0xff]  ;;  %v4612_v12 = vld [vmem:[%s7917_s8 + $0xdf8] sm:$0xff] }
 0xa3a   :  { %3961 = vmatpush.msrb.mxu0 %v4509_v46  ;;  %3984 = vmatpush.msrb.mxu1 %v4525_v40  ;;  %v4577_v40 = vld [vmem:[%s7917_s8 + $0xce0] sm:$0xff] }
 0xa3b   :  { %3938 = vmatpush.msra.mxu3 %v4493_v29  ;;  %4007 = vmatpush.msrb.mxu2 %v4541_v49  ;;  %v4592_v29 = vld [vmem:[%s7917_s8 + $0xd58] sm:$0xff]  ;;  %v4611_v49 = vld [vmem:[%s7917_s8 + $0xdf0] sm:$0xff] }
 0xa3c   :  { %3962 = vmatpush.msrb.mxu0 %v4508_v25  ;;  %3985 = vmatpush.msrb.mxu1 %v4524_v33  ;;  %v4563_v25 = vld [vmem:[%s7917_s8 + $0xc70] sm:$0xff]  ;;  %v4576_v33 = vld [vmem:[%s7917_s8 + $0xcd8] sm:$0xff] }
 0xa3d   :  { %3939 = vmatpush.msra.mxu3 %v4492_v4  ;;  %4008 = vmatpush.msrb.mxu2 %v4540_v14  ;;  %v4591_v4 = vld [vmem:[%s7917_s8 + $0xd50] sm:$0xff]  ;;  %v4610_v14 = vld [vmem:[%s7917_s8 + $0xde8] sm:$0xff] }
 0xa3e   :  { %3963 = vmatpush.msrb.mxu0 %v4507_v35  ;;  %3986 = vmatpush.msrb.mxu1 %v4523_v13  ;;  %v4562_v35 = vld [vmem:[%s7917_s8 + $0xc68] sm:$0xff]  ;;  %v4575_v13 = vld [vmem:[%s7917_s8 + $0xcd0] sm:$0xff] }
 0xa3f   :  { %3940 = vmatpush.msra.mxu3 %v4491_v7  ;;  %4009 = vmatpush.msrb.mxu2 %v4539_v51  ;;  %v4590_v7 = vld [vmem:[%s7917_s8 + $0xd48] sm:$0xff]  ;;  %v4609_v51 = vld [vmem:[%s7917_s8 + $0xde0] sm:$0xff] }
 0xa40   :  { %3964 = vmatpush.msrb.mxu0 %v4506_v16  ;;  %3987 = vmatpush.msrb.mxu1 %v4522_v53  ;;  %v4561_v16 = vld [vmem:[%s7917_s8 + $0xc60] sm:$0xff]  ;;  %v4574_v53 = vld [vmem:[%s7917_s8 + $0xcc8] sm:$0xff] }
 0xa41   :  { %3941 = vmatpush.msra.mxu3 %v4490_v61  ;;  %4010 = vmatpush.msrb.mxu2 %v4538_v41  ;;  %v4589_v61 = vld [vmem:[%s7917_s8 + $0xd40] sm:$0xff]  ;;  %v4608_v41 = vld [vmem:[%s7917_s8 + $0xdd8] sm:$0xff] }
 0xa42   :  { %3965 = vmatpush.msrb.mxu0 %v4505_v19  ;;  %3988 = vmatpush.msrb.mxu1 %v4521_v63  ;;  %v4560_v19 = vld [vmem:[%s7917_s8 + $0xc58] sm:$0xff]  ;;  %v4573_v63 = vld [vmem:[%s7917_s8 + $0xcc0] sm:$0xff] }
 0xa43   :  { %3942 = vmatpush.msra.mxu3 %v4489_v2  ;;  %4011 = vmatpush.msrb.mxu2 %v4537_v56  ;;  %v4588_v2 = vld [vmem:[%s7917_s8 + $0xd38] sm:$0xff]  ;;  %v4607_v56 = vld [vmem:[%s7917_s8 + $0xdd0] sm:$0xff] }
 0xa44   :  { %3966 = vmatpush.msrb.mxu0 %v4504_v48  ;;  %3989 = vmatpush.msrb.mxu1 %v4520_v20  ;;  %v4559_v48 = vld [vmem:[%s7917_s8 + $0xc50] sm:$0xff]  ;;  %v4572_v20 = vld [vmem:[%s7917_s8 + $0xcb8] sm:$0xff] }
 0xa45   :  { %3943 = vmatpush.msra.mxu3 %v4488_v1  ;;  %4012 = vmatpush.msrb.mxu2 %v4536_v21  ;;  %v4587_v1 = vld [vmem:[%s7917_s8 + $0xd30] sm:$0xff]  ;;  %v4606_v21 = vld [vmem:[%s7917_s8 + $0xdc8] sm:$0xff] }
 0xa46   :  { %3967 = vmatpush.msrb.mxu0 %v4503_v38  ;;  %3990 = vmatpush.msrb.mxu1 %v4519_v45  ;;  %v4558_v38 = vld [vmem:[%s7917_s8 + $0xc48] sm:$0xff]  ;;  %v4571_v45 = vld [vmem:[%s7917_s8 + $0xcb0] sm:$0xff] }
 0xa47   :  { %3944 = vmatpush.msra.mxu3 %v4487_v17  ;;  %4013 = vmatpush.msrb.mxu2 %v4535_v27  ;;  %v4586_v17 = vld [vmem:[%s7917_s8 + $0xd28] sm:$0xff]  ;;  %v4605_v27 = vld [vmem:[%s7917_s8 + $0xdc0] sm:$0xff] }
 0xa48   :  { %3968 = vmatpush.msrb.mxu0 %v4502_v5  ;;  %3991 = vmatpush.msrb.mxu1 %v4518_v50  ;;  %v4557_v5 = vld [vmem:[%s7917_s8 + $0xc40] sm:$0xff]  ;;  %v4570_v50 = vld [vmem:[%s7917_s8 + $0xca8] sm:$0xff] }
 0xa49   :  { %3945 = vmatpush.msra.mxu3 %v4486_v44  ;;  %4014 = vmatpush.msrb.mxu2 %v4534_v18  ;;  %v4585_v44 = vld [vmem:[%s7917_s8 + $0xd20] sm:$0xff]  ;;  %v4604_v18 = vld [vmem:[%s7917_s8 + $0xdb8] sm:$0xff] }
 0xa4a   :  { %3969 = vmatpush.msrb.mxu0 %v4501_v47  ;;  %3992 = vmatpush.msrb.mxu1 %v4517_v11  ;;  %v4556_v47 = vld [vmem:[%s7917_s8 + $0xc38] sm:$0xff]  ;;  %v4569_v11 = vld [vmem:[%s7917_s8 + $0xca0] sm:$0xff] }
 0xa4b   :  { %3946 = vmatpush.msra.mxu3 %v4485_v30  ;;  %4015 = vmatpush.msrb.mxu2 %v4533_v39  ;;  %v4555_v30 = vld [vmem:[%s7917_s8 + $0xc30] sm:$0xff]  ;;  %v4568_v39 = vld [vmem:[%s7917_s8 + $0xc98] sm:$0xff] }
 0xa4c   :  { %v3217_v24 = vpop.f32.mrf.mxu0 }
 0xa4d   :  { %v3218_v15 = vadd.f32 %v3217_v24, %v3140_v54  ;;  %v3240_v37 = vpop.f32.mrf.mxu1  ;;  %v4584_v24 = vld [vmem:[%s7917_s8 + $0xd18] sm:$0xff] }
 0xa4e   :  { %v3241_v43 = vadd.f32 %v3240_v37, %v3141_v62  ;;  %v4603_v37 = vld [vmem:[%s7917_s8 + $0xdb0] sm:$0xff] }
 0xa4f   :  { %v3546_v58 = vmax.f32 %v3218_v15, 0.0 }
 0xa50   :  { %v3547_v34 = vmax.f32 %v3241_v43, 0.0  ;;  %v4554_v43 = vld [vmem:[%s7917_s8 + $0xc28] sm:$0xff] }
 0xa51   :  { %3878 = vmatmul.f32.vlgmr.msra.gmra.mxu0 %v3546_v58 }
 0xa52   :  { %3901 = vmatmul.f32.vlgmr.msra.gmra.mxu1 %v3547_v34  ;;  %v3194_v23 = vpop.f32.mrf.mxu3  ;;  %4046 = vmatpush.msra.mxu0 %v4580_v57  ;;  %v4567_v34 = vld [vmem:[%s7917_s8 + $0xc90] sm:$0xff] }
 0xa53   :  { %v3195_v22 = vadd.f32 %v3194_v23, %v3139_v28  ;;  %v3263_v59 = vpop.f32.mrf.mxu2  ;;  %4069 = vmatpush.msra.mxu1 %v4596_v36  ;;  %v4583_v36 = vld [vmem:[%s7917_s8 + $0xd10] sm:$0xff] }
 0xa54   :  { %v3264_v60 = vadd.f32 %v3263_v59, %v3142_v52  ;;  %4047 = vmatpush.msra.mxu0 %v4579_v26  ;;  %v4582_v59 = vld [vmem:[%s7917_s8 + $0xd08] sm:$0xff] }
 0xa55   :  { %v3545_v10 = vmax.f32 %v3195_v22, 0.0  ;;  %4070 = vmatpush.msra.mxu1 %v4595_v32  ;;  %v4553_v32 = vld [vmem:[%s7917_s8 + $0xc20] sm:$0xff] }
 0xa56   :  { %v3548_v46 = vmax.f32 %v3264_v60, 0.0  ;;  %4048 = vmatpush.msra.mxu0 %v4578_v9  ;;  %v3144_v9 = vperm.slane %v7421_v0, 5  ;;  %v4601_v60 = vld [vmem:[%s7917_s8 + $0xda0] sm:$0xff] }
 0xa57   :  { %3855 = vmatmul.f32.vlgmr.msrb.gmra.mxu3 %v3545_v10  ;;  %4071 = vmatpush.msra.mxu1 %v4594_v3  ;;  %v4552_v3 = vld [vmem:[%s7917_s8 + $0xc18] sm:$0xff] }
 0xa58   :  { %3924 = vmatmul.f32.vlgmr.msra.gmra.mxu2 %v3548_v46  ;;  %4023 = vmatpush.msrb.mxu3 %v4564_v42  ;;  %v3145_v42 = vperm.slane %v7421_v0, 6  ;;  %v4565_v46 = vld [vmem:[%s7917_s8 + $0xc80] sm:$0xff] }
 0xa59   :  { %4049 = vmatpush.msra.mxu0 %v4577_v40  ;;  %4072 = vmatpush.msra.mxu1 %v4593_v55  ;;  %v4581_v40 = vld [vmem:[%s7917_s8 + $0xd00] sm:$0xff] }
 0xa5a   :  { %4092 = vmatpush.msra.mxu2 %v4612_v12  ;;  %4024 = vmatpush.msrb.mxu3 %v4563_v25  ;;  %v4600_v25 = vld [vmem:[%s7917_s8 + $0xd98] sm:$0xff] }
 0xa5b   :  { %4050 = vmatpush.msra.mxu0 %v4576_v33  ;;  %4073 = vmatpush.msra.mxu1 %v4592_v29  ;;  %v4551_v33 = vld [vmem:[%s7917_s8 + $0xc10] sm:$0xff] }
 0xa5c   :  { %4093 = vmatpush.msra.mxu2 %v4611_v49  ;;  %4025 = vmatpush.msrb.mxu3 %v4562_v35 }
 0xa5d   :  { %4051 = vmatpush.msra.mxu0 %v4575_v13  ;;  %4074 = vmatpush.msra.mxu1 %v4591_v4  ;;  %v4550_v4 = vld [vmem:[%s7917_s8 + $0xc08] sm:$0xff] }
 0xa5e   :  { %4094 = vmatpush.msra.mxu2 %v4610_v14  ;;  %4026 = vmatpush.msrb.mxu3 %v4561_v16 }
 0xa5f   :  { %4052 = vmatpush.msra.mxu0 %v4574_v53  ;;  %4075 = vmatpush.msra.mxu1 %v4590_v7  ;;  %v3143_v7 = vperm.slane %v7421_v0, 4 }
 0xa60   :  { %4095 = vmatpush.msra.mxu2 %v4609_v51  ;;  %4027 = vmatpush.msrb.mxu3 %v4560_v19  ;;  %v4644_v51 = vld [vmem:[%s7917_s8 + $0xef8] sm:$0xff] }
 0xa61   :  { %4053 = vmatpush.msra.mxu0 %v4573_v63  ;;  %4076 = vmatpush.msra.mxu1 %v4589_v61  ;;  %v3146_v63 = vperm.slane %v7421_v0, 7  ;;  %v4660_v61 = vld [vmem:[%s7917_s8 + $0xf78] sm:$0xff] }
 0xa62   :  { %4096 = vmatpush.msra.mxu2 %v4608_v41  ;;  %4028 = vmatpush.msrb.mxu3 %v4559_v48  ;;  %v4598_v41 = vld [vmem:[%s7917_s8 + $0xd88] sm:$0xff]  ;;  %v4643_v48 = vld [vmem:[%s7917_s8 + $0xef0] sm:$0xff] }
 0xa63   :  { %4054 = vmatpush.msra.mxu0 %v4572_v20  ;;  %4077 = vmatpush.msra.mxu1 %v4588_v2  ;;  %v4549_v20 = vld [vmem:[%s7917_s8 + $0xc00] sm:$0xff]  ;;  %v4659_v2 = vld [vmem:[%s7917_s8 + $0xf70] sm:$0xff] }
 0xa64   :  { %4097 = vmatpush.msra.mxu2 %v4607_v56  ;;  %4029 = vmatpush.msrb.mxu3 %v4558_v38  ;;  %v4597_v56 = vld [vmem:[%s7917_s8 + $0xd80] sm:$0xff] }
 0xa65   :  { %4055 = vmatpush.msra.mxu0 %v4571_v45  ;;  %4078 = vmatpush.msra.mxu1 %v4587_v1  ;;  %v4642_v1 = vld [vmem:[%s7917_s8 + $0xee8] sm:$0xff] }
 0xa66   :  { %4098 = vmatpush.msra.mxu2 %v4606_v21  ;;  %4030 = vmatpush.msrb.mxu3 %v4557_v5 }
 0xa67   :  { %4056 = vmatpush.msra.mxu0 %v4570_v50  ;;  %4079 = vmatpush.msra.mxu1 %v4586_v17  ;;  %v4658_v50 = vld [vmem:[%s7917_s8 + $0xf68] sm:$0xff] }
 0xa68   :  { %4099 = vmatpush.msra.mxu2 %v4605_v27  ;;  %4031 = vmatpush.msrb.mxu3 %v4556_v47 }
 0xa69   :  { %v3220_v15 = vpop.f32.mrf.mxu0  ;;  %4057 = vmatpush.msra.mxu0 %v4569_v11  ;;  %4080 = vmatpush.msra.mxu1 %v4585_v44  ;;  %v4628_v11 = vld [vmem:[%s7917_s8 + $0xe78] sm:$0xff] }
 0xa6a   :  { %v3221_v58 = vadd.f32 %v3220_v15, %v3140_v54  ;;  %v3243_v57 = vpop.f32.mrf.mxu1  ;;  %4100 = vmatpush.msra.mxu2 %v4604_v18  ;;  %4032 = vmatpush.msrb.mxu3 %v4555_v30  ;;  %v4602_v54 = vld [vmem:[%s7917_s8 + $0xda8] sm:$0xff]  ;;  %v4641_v30 = vld [vmem:[%s7917_s8 + $0xee0] sm:$0xff] }
 0xa6b   :  { %v3244_v26 = vadd.f32 %v3243_v57, %v3141_v62  ;;  %4058 = vmatpush.msra.mxu0 %v4568_v39  ;;  %4081 = vmatpush.msra.mxu1 %v4584_v24  ;;  %v4566_v62 = vld [vmem:[%s7917_s8 + $0xc88] sm:$0xff]  ;;  %v4657_v39 = vld [vmem:[%s7917_s8 + $0xf60] sm:$0xff]  ;;  %v7687_v24 = vld [vmem:[%s7916_s7 + $0x18] sm:$0xff] }
 0xa6c   :  { %v3562_v23 = vmax.f32 %v3221_v58, 0.0  ;;  %4101 = vmatpush.msra.mxu2 %v4603_v37  ;;  %4033 = vmatpush.msrb.mxu3 %v4554_v43  ;;  %v4676_v37 = vld [vmem:[%s7917_s8 + $0xff8] sm:$0xff]  ;;  %v4627_v58 = vld [vmem:[%s7917_s8 + $0xe70] sm:$0xff] }
 0xa6d   :  { %v3563_v22 = vmax.f32 %v3244_v26, 0.0  ;;  %4059 = vmatpush.msra.mxu0 %v4567_v34  ;;  %4082 = vmatpush.msra.mxu1 %v4583_v36  ;;  %v4640_v57 = vld [vmem:[%s7917_s8 + $0xed8] sm:$0xff]  ;;  %v3148_v36 = vperm.slane %v7687_v24, 1 }
 0xa6e   :  { %3881 = vmatmul.f32.gmra.mxu0 %v3562_v23  ;;  %4102 = vmatpush.msra.mxu2 %v4602_v54  ;;  %v4656_v34 = vld [vmem:[%s7917_s8 + $0xf58] sm:$0xff]  ;;  %v4675_v54 = vld [vmem:[%s7917_s8 + $0xff0] sm:$0xff]  ;;  %v3149_v23 = vperm.slane %v7687_v24, 2 }
 0xa6f   :  { %3904 = vmatmul.f32.gmra.mxu1 %v3563_v22  ;;  %v3197_v10 = vpop.f32.mrf.mxu3  ;;  %4034 = vmatpush.msrb.mxu3 %v4553_v32  ;;  %v4626_v32 = vld [vmem:[%s7917_s8 + $0xe68] sm:$0xff] }
 0xa70   :  { %v3198_v55 = vadd.f32 %v3197_v10, %v3139_v28  ;;  %v3266_v12 = vpop.f32.mrf.mxu2  ;;  %4060 = vmatpush.msra.mxu0 %v4566_v62  ;;  %4083 = vmatpush.msra.mxu1 %v4582_v59  ;;  %v4639_v59 = vld [vmem:[%s7917_s8 + $0xed0] sm:$0xff]  ;;  %v4674_v10 = vld [vmem:[%s7917_s8 + $0xfe8] sm:$0xff] }
 0xa71   :  { %v3267_v29 = vadd.f32 %v3266_v12, %v3142_v52  ;;  %v3309_v49 = vpop.f32.mrf.mxu0  ;;  %4103 = vmatpush.msra.mxu2 %v4601_v60  ;;  %4035 = vmatpush.msrb.mxu3 %v4552_v3  ;;  %v4599_v52 = vld [vmem:[%s7917_s8 + $0xd90] sm:$0xff]  ;;  %v4638_v12 = vld [vmem:[%s7917_s8 + $0xec8] sm:$0xff] }
 0xa72   :  { %v3561_v35 = vmax.f32 %v3198_v55, 0.0  ;;  %v3310_v13 = vadd.f32 %v3309_v49, %v3144_v9  ;;  %v3332_v28 = vpop.f32.mrf.mxu1  ;;  %4061 = vmatpush.msra.mxu0 %v4565_v46  ;;  %4084 = vmatpush.msra.mxu1 %v4581_v40  ;;  %v4673_v49 = vld [vmem:[%s7917_s8 + $0xfe0] sm:$0xff] }
 0xa73   :  { %v3564_v14 = vmax.f32 %v3267_v29, 0.0  ;;  %v3333_v16 = vadd.f32 %v3332_v28, %v3145_v42  ;;  %4104 = vmatpush.msra.mxu2 %v4600_v25  ;;  %4036 = vmatpush.msrb.mxu3 %v4551_v33  ;;  %v4654_v25 = vld [vmem:[%s7917_s8 + $0xf48] sm:$0xff] }
 0xa74   :  { %v3550_v53 = vmax.f32 %v3310_v13, 0.0  ;;  %3858 = vmatmul.f32.gmra.mxu3 %v3561_v35  ;;  %v4624_v35 = vld [vmem:[%s7917_s8 + $0xe58] sm:$0xff]  ;;  %v3147_v13 = vperm.slane %v7687_v24, 0 }
 0xa75   :  { %v3551_v19 = vmax.f32 %v3333_v16, 0.0  ;;  %3927 = vmatmul.f32.gmra.mxu2 %v3564_v14  ;;  %4037 = vmatpush.msrb.mxu3 %v4550_v4  ;;  %v4637_v4 = vld [vmem:[%s7917_s8 + $0xec0] sm:$0xff]  ;;  %v3150_v16 = vperm.slane %v7687_v24, 3 }
 0xa76   :  { %3970 = vmatmul.f32.vlgmr.msrb.gmra.mxu0 %v3550_v53  ;;  %4105 = vmatpush.msra.mxu2 %v4599_v52  ;;  %v4653_v14 = vld [vmem:[%s7917_s8 + $0xf40] sm:$0xff]  ;;  %v4672_v53 = vld [vmem:[%s7917_s8 + $0xfd8] sm:$0xff] }
 0xa77   :  { %3993 = vmatmul.f32.vlgmr.msrb.gmra.mxu1 %v3551_v19  ;;  %v3286_v0 = vpop.f32.mrf.mxu3  ;;  %4138 = vmatpush.msrb.mxu0 %v4644_v51  ;;  %v4623_v51 = vld [vmem:[%s7917_s8 + $0xe50] sm:$0xff] }
 0xa78   :  { %v3287_v38 = vadd.f32 %v3286_v0, %v3143_v7  ;;  %v3355_v45 = vpop.f32.mrf.mxu2  ;;  %4161 = vmatpush.msrb.mxu1 %v4660_v61  ;;  %4106 = vmatpush.msra.mxu2 %v4598_v41  ;;  %v4636_v61 = vld [vmem:[%s7917_s8 + $0xeb8] sm:$0xff] }
 0xa79   :  { %v3356_v21 = vadd.f32 %v3355_v45, %v3146_v63  ;;  %v3312_v5 = vpop.f32.mrf.mxu0  ;;  %4139 = vmatpush.msrb.mxu0 %v4643_v48  ;;  %4038 = vmatpush.msrb.mxu3 %v4549_v20  ;;  %v4652_v41 = vld [vmem:[%s7917_s8 + $0xf38] sm:$0xff]  ;;  %v4671_v20 = vld [vmem:[%s7917_s8 + $0xfd0] sm:$0xff] }
 0xa7a   :  { %v3549_v17 = vmax.f32 %v3287_v38, 0.0  ;;  %v3313_v27 = vadd.f32 %v3312_v5, %v3144_v9  ;;  %v3335_v47 = vpop.f32.mrf.mxu1  ;;  %4162 = vmatpush.msrb.mxu1 %v4659_v2  ;;  %4107 = vmatpush.msra.mxu2 %v4597_v56  ;;  %v4655_v9 = vld [vmem:[%s7917_s8 + $0xf50] sm:$0xff]  ;;  %v4622_v2 = vld [vmem:[%s7917_s8 + $0xe48] sm:$0xff]  ;;  %v4621_v5 = vld [vmem:[%s7917_s8 + $0xe40] sm:$0xff] }
 0xa7b   :  { %v3552_v44 = vmax.f32 %v3356_v21, 0.0  ;;  %v3336_v18 = vadd.f32 %v3335_v47, %v3145_v42  ;;  %4140 = vmatpush.msrb.mxu0 %v4642_v1  ;;  %v4625_v42 = vld [vmem:[%s7917_s8 + $0xe60] sm:$0xff]  ;;  %v4635_v38 = vld [vmem:[%s7917_s8 + $0xeb0] sm:$0xff]  ;;  %v4670_v21 = vld [vmem:[%s7917_s8 + $0xfc8] sm:$0xff] }
 0xa7c   :  { %v3566_v15 = vmax.f32 %v3313_v27, 0.0  ;;  %4163 = vmatpush.msrb.mxu1 %v4658_v50  ;;  %3947 = vmatmul.f32.vlgmr.msra.gmra.mxu3 %v3549_v17  ;;  %v4651_v45 = vld [vmem:[%s7917_s8 + $0xf30] sm:$0xff]  ;;  %v4634_v27 = vld [vmem:[%s7917_s8 + $0xea8] sm:$0xff] }
 0xa7d   :  { %v3567_v43 = vmax.f32 %v3336_v18, 0.0  ;;  %4016 = vmatmul.f32.vlgmr.msrb.gmra.mxu2 %v3552_v44  ;;  %4115 = vmatpush.msra.mxu3 %v4628_v11  ;;  %v4650_v47 = vld [vmem:[%s7917_s8 + $0xf28] sm:$0xff]  ;;  %v4669_v44 = vld [vmem:[%s7917_s8 + $0xfc0] sm:$0xff]  ;;  %v4620_v18 = vld [vmem:[%s7917_s8 + $0xe38] sm:$0xff] }
 0xa7e   :  { %4141 = vmatpush.msrb.mxu0 %v4641_v30  ;;  %4164 = vmatpush.msrb.mxu1 %v4657_v39  ;;  %v4633_v39 = vld [vmem:[%s7917_s8 + $0xea0] sm:$0xff] }
 0xa7f   :  { %4184 = vmatpush.msrb.mxu2 %v4676_v37  ;;  %3973 = vmatmul.f32.gmra.mxu0 %v3566_v15  ;;  %v3289_v26 = vpop.f32.mrf.mxu3  ;;  %v4649_v15 = vld [vmem:[%s7917_s8 + $0xf20] sm:$0xff] }
 0xa80   :  { %3996 = vmatmul.f32.gmra.mxu1 %v3567_v43  ;;  %v3290_v22 = vadd.f32 %v3289_v26, %v3143_v7  ;;  %v3358_v62 = vpop.f32.mrf.mxu2  ;;  %4116 = vmatpush.msra.mxu3 %v4627_v58  ;;  %v4668_v58 = vld [vmem:[%s7917_s8 + $0xfb8] sm:$0xff] }
 0xa81   :  { %v3359_v60 = vadd.f32 %v3358_v62, %v3146_v63  ;;  %4142 = vmatpush.msrb.mxu0 %v4640_v57  ;;  %4165 = vmatpush.msrb.mxu1 %v4656_v34  ;;  %v3401_v3 = vpop.f32.mrf.mxu0  ;;  %v4619_v34 = vld [vmem:[%s7917_s8 + $0xe30] sm:$0xff] }
 0xa82   :  { %v3565_v46 = vmax.f32 %v3290_v22, 0.0  ;;  %4185 = vmatpush.msrb.mxu2 %v4675_v54  ;;  %v3402_v40 = vadd.f32 %v3401_v3, %v3148_v36  ;;  %v3424_v55 = vpop.f32.mrf.mxu1  ;;  %4117 = vmatpush.msra.mxu3 %v4626_v32  ;;  %v4648_v32 = vld [vmem:[%s7917_s8 + $0xf18] sm:$0xff]  ;;  %v3153_v22 = vperm.slane %v7687_v24, 6  ;;  %v4631_v3 = vld [vmem:[%s7917_s8 + $0xe90] sm:$0xff] }
 0xa83   :  { %v3568_v33 = vmax.f32 %v3359_v60, 0.0  ;;  %v3425_v29 = vadd.f32 %v3424_v55, %v3149_v23  ;;  %4143 = vmatpush.msrb.mxu0 %v4639_v59  ;;  %4166 = vmatpush.msrb.mxu1 %v4655_v9  ;;  %v4667_v9 = vld [vmem:[%s7917_s8 + $0xfb0] sm:$0xff]  ;;  %v4618_v60 = vld [vmem:[%s7917_s8 + $0xe28] sm:$0xff] }
 0xa84   :  { %4186 = vmatpush.msrb.mxu2 %v4674_v10  ;;  %4118 = vmatpush.msra.mxu3 %v4625_v42  ;;  %v3554_v28 = vmax.f32 %v3402_v40, 0.0  ;;  %v4647_v10 = vld [vmem:[%s7917_s8 + $0xf10] sm:$0xff]  ;;  %v4617_v40 = vld [vmem:[%s7917_s8 + $0xe20] sm:$0xff] }
 0xa85   :  { %4144 = vmatpush.msrb.mxu0 %v4638_v12  ;;  %4167 = vmatpush.msrb.mxu1 %v4654_v25  ;;  %v3555_v52 = vmax.f32 %v3425_v29, 0.0  ;;  %v4630_v25 = vld [vmem:[%s7917_s8 + $0xe88] sm:$0xff] }
 0xa86   :  { %4187 = vmatpush.msrb.mxu2 %v4673_v49  ;;  %3950 = vmatmul.f32.gmra.mxu3 %v3565_v46  ;;  %v4666_v46 = vld [vmem:[%s7917_s8 + $0xfa8] sm:$0xff]  ;;  %v4665_v49 = vld [vmem:[%s7917_s8 + $0xfa0] sm:$0xff] }
 0xa87   :  { %4019 = vmatmul.f32.gmra.mxu2 %v3568_v33  ;;  %4119 = vmatpush.msra.mxu3 %v4624_v35  ;;  %v3378_v7 = vpop.f32.mrf.mxu3  ;;  %v4646_v33 = vld [vmem:[%s7917_s8 + $0xf08] sm:$0xff]  ;;  %v3151_v35 = vperm.slane %v7687_v24, 4 }
 0xa88   :  { %4145 = vmatpush.msrb.mxu0 %v4637_v4  ;;  %4168 = vmatpush.msrb.mxu1 %v4653_v14  ;;  %v3379_v19 = vadd.f32 %v3378_v7, %v3147_v13  ;;  %v3447_v63 = vpop.f32.mrf.mxu2  ;;  %v3154_v4 = vperm.slane %v7687_v24, 7 }
 0xa89   :  { %4188 = vmatpush.msrb.mxu2 %v4672_v53  ;;  %4062 = vmatmul.f32.vlgmr.msra.gmra.mxu0 %v3554_v28  ;;  %v3448_v48 = vadd.f32 %v3447_v63, %v3150_v16  ;;  %v3404_v0 = vpop.f32.mrf.mxu0  ;;  %v4616_v28 = vld [vmem:[%s7917_s8 + $0xe18] sm:$0xff]  ;;  %v4645_v53 = vld [vmem:[%s7917_s8 + $0xf00] sm:$0xff]  ;;  %v4615_v63 = vld [vmem:[%s7917_s8 + $0xe10] sm:$0xff] }
 0xa8a   :  { %4085 = vmatmul.f32.vlgmr.msra.gmra.mxu1 %v3555_v52  ;;  %4120 = vmatpush.msra.mxu3 %v4623_v51  ;;  %v3427_v56 = vpop.f32.mrf.mxu1  ;;  %v3405_v1 = vadd.f32 %v3404_v0, %v3148_v36  ;;  %v3553_v50 = vmax.f32 %v3379_v19, 0.0  ;;  %v3152_v36 = vperm.slane %v7687_v24, 5  ;;  %v4629_v52 = vld [vmem:[%s7917_s8 + $0xe80] sm:$0xff]  ;;  %v4664_v51 = vld [vmem:[%s7917_s8 + $0xf98] sm:$0xff]  ;;  %v4614_v0 = vld [vmem:[%s7917_s8 + $0xe08] sm:$0xff] }
 0xa8b   :  { %4146 = vmatpush.msrb.mxu0 %v4636_v61  ;;  %4169 = vmatpush.msrb.mxu1 %v4652_v41  ;;  %v3428_v17 = vadd.f32 %v3427_v56, %v3149_v23  ;;  %v3556_v11 = vmax.f32 %v3448_v48, 0.0  ;;  %v4632_v23 = vld [vmem:[%s7917_s8 + $0xe98] sm:$0xff]  ;;  %v4663_v48 = vld [vmem:[%s7917_s8 + $0xf90] sm:$0xff]  ;;  %v4662_v56 = vld [vmem:[%s7917_s8 + $0xf88] sm:$0xff] }
 0xa8c   :  { %4189 = vmatpush.msrb.mxu2 %v4671_v20  ;;  %4121 = vmatpush.msra.mxu3 %v4622_v2  ;;  %v3570_v30 = vmax.f32 %v3405_v1, 0.0 }
 0xa8d   :  { %4147 = vmatpush.msrb.mxu0 %v4635_v38  ;;  %4170 = vmatpush.msrb.mxu1 %v4651_v45  ;;  %v3571_v43 = vmax.f32 %v3428_v17, 0.0  ;;  %v4613_v45 = vld [vmem:[%s7917_s8 + $0xe00] sm:$0xff] }
 0xa8e   :  { %4190 = vmatpush.msrb.mxu2 %v4670_v21  ;;  %4122 = vmatpush.msra.mxu3 %v4621_v5  ;;  %v4661_v21 = vld [vmem:[%s7917_s8 + $0xf80] sm:$0xff] }
 0xa8f   :  { %4148 = vmatpush.msrb.mxu0 %v4634_v27  ;;  %4171 = vmatpush.msrb.mxu1 %v4650_v47  ;;  %v3381_v37 = vpop.f32.mrf.mxu3 }
 0xa90   :  { %4191 = vmatpush.msrb.mxu2 %v4669_v44  ;;  %4039 = vmatmul.f32.vlgmr.msrb.gmra.mxu3 %v3553_v50  ;;  %v3450_v57 = vpop.f32.mrf.mxu2  ;;  %v3382_v54 = vadd.f32 %v3381_v37, %v3147_v13 }
 0xa91   :  { %4108 = vmatmul.f32.vlgmr.msra.gmra.mxu2 %v3556_v11  ;;  %4123 = vmatpush.msra.mxu3 %v4620_v18  ;;  %v3493_v26 = vpop.f32.mrf.mxu0  ;;  %v3451_v59 = vadd.f32 %v3450_v57, %v3150_v16 }
 0xa92   :  { %4149 = vmatpush.msrb.mxu0 %v4633_v39  ;;  %4172 = vmatpush.msrb.mxu1 %v4649_v15  ;;  %v3516_v62 = vpop.f32.mrf.mxu1  ;;  %v3494_v42 = vadd.f32 %v3493_v26, %v3152_v36  ;;  %v3569_v55 = vmax.f32 %v3382_v54, 0.0 }
 0xa93   :  { %4192 = vmatpush.msrb.mxu2 %v4668_v58  ;;  %4065 = vmatmul.f32.gmra.mxu0 %v3570_v30  ;;  %v3517_v12 = vadd.f32 %v3516_v62, %v3153_v22  ;;  %v3572_v29 = vmax.f32 %v3451_v59, 0.0 }
 0xa94   :  { %4088 = vmatmul.f32.gmra.mxu1 %v3571_v43  ;;  %4124 = vmatpush.msra.mxu3 %v4619_v34  ;;  %v3558_v16 = vmax.f32 %v3494_v42, 0.0 }
 0xa95   :  { %4150 = vmatpush.msrb.mxu0 %v4632_v23  ;;  %4173 = vmatpush.msrb.mxu1 %v4648_v32  ;;  %v3559_v7 = vmax.f32 %v3517_v12, 0.0 }
 0xa96   :  { %4193 = vmatpush.msrb.mxu2 %v4667_v9  ;;  %4125 = vmatpush.msra.mxu3 %v4618_v60 }
 0xa97   :  { %4151 = vmatpush.msrb.mxu0 %v4631_v3  ;;  %4174 = vmatpush.msrb.mxu1 %v4647_v10  ;;  %v3470_v13 = vpop.f32.mrf.mxu3 }
 0xa98   :  { %4194 = vmatpush.msrb.mxu2 %v4666_v46  ;;  %4126 = vmatpush.msra.mxu3 %v4617_v40  ;;  %v3539_v14 = vpop.f32.mrf.mxu2  ;;  %v3471_v19 = vadd.f32 %v3470_v13, %v3151_v35 }
 0xa99   :  { %4152 = vmatpush.msrb.mxu0 %v4630_v25  ;;  %4175 = vmatpush.msrb.mxu1 %v4646_v33  ;;  %v3496_v24 = vpop.f32.mrf.mxu0  ;;  %v3540_v41 = vadd.f32 %v3539_v14, %v3154_v4 }
 0xa9a   :  { %4195 = vmatpush.msrb.mxu2 %v4665_v49  ;;  %4042 = vmatmul.f32.gmra.mxu3 %v3569_v55  ;;  %v3519_v61 = vpop.f32.mrf.mxu1  ;;  %v3497_v20 = vadd.f32 %v3496_v24, %v3152_v36  ;;  %v3557_v38 = vmax.f32 %v3471_v19, 0.0  ;;  %v4692_v36 = vld [vmem:[%s7918_s9 + $0x1] ss:$0 sm:$0xff] }
 0xa9b   :  { %4111 = vmatmul.f32.gmra.mxu2 %v3572_v29  ;;  %4127 = vmatpush.msra.mxu3 %v4616_v28  ;;  %v3520_v2 = vadd.f32 %v3519_v61, %v3153_v22  ;;  %v3560_v1 = vmax.f32 %v3540_v41, 0.0 }
 0xa9c   :  { %4153 = vmatpush.msrb.mxu0 %v4629_v52  ;;  %4176 = vmatpush.msrb.mxu1 %v4645_v53  ;;  %v3574_v50 = vmax.f32 %v3497_v20, 0.0 }
 0xa9d   :  { %4196 = vmatpush.msrb.mxu2 %v4664_v51  ;;  %4154 = vmatmul.f32.vlgmr.msrb.gmra.mxu0 %v3558_v16  ;;  %v3575_v27 = vmax.f32 %v3520_v2, 0.0 }
 0xa9e   :  { %4177 = vmatmul.f32.vlgmr.msrb.gmra.mxu1 %v3559_v7  ;;  %4128 = vmatpush.msra.mxu3 %v4615_v63 }
 0xa9f   :  { %4197 = vmatpush.msrb.mxu2 %v4663_v48  ;;  %v3473_v5 = vpop.f32.mrf.mxu3 }
 0xaa0   :  { %4129 = vmatpush.msra.mxu3 %v4614_v0  ;;  %v3542_v17 = vpop.f32.mrf.mxu2  ;;  %v3474_v47 = vadd.f32 %v3473_v5, %v3151_v35 }
 0xaa1   :  { %4198 = vmatpush.msrb.mxu2 %v4662_v56  ;;  %v3543_v11 = vadd.f32 %v3542_v17, %v3154_v4 }
 0xaa2   :  { %4130 = vmatpush.msra.mxu3 %v4613_v45  ;;  %v3573_v44 = vmax.f32 %v3474_v47, 0.0 }
 0xaa3   :  { %4199 = vmatpush.msrb.mxu2 %v4661_v21  ;;  %4131 = vmatmul.f32.vlgmr.msra.gmra.mxu3 %v3557_v38  ;;  %v3576_v18 = vmax.f32 %v3543_v11, 0.0 }
 0xaa4   :  { %4200 = vmatmul.f32.vlgmr.msrb.gmra.mxu2 %v3560_v1 }
 0xaa5   :  { %4157 = vmatmul.f32.gmra.mxu0 %v3574_v50 }
 0xaa6   :  { %4180 = vmatmul.f32.gmra.mxu1 %v3575_v27 }
 0xaab   :  { %4134 = vmatmul.f32.gmra.mxu3 %v3573_v44 }
 0xaac   :  { %4203 = vmatmul.f32.gmra.mxu2 %v3576_v18 }
 0xace   :  { %v3879_v30 = vpop.f32.mrf.mxu0 }
 0xacf   :  { %v3902_v39 = vpop.f32.mrf.mxu1 }
 0xada   :  { %v3856_v15 = vpop.f32.mrf.mxu3 }
 0xadb   :  { %v3925_v37 = vpop.f32.mrf.mxu2  ;;  %v3857_v26 = vadd.f32 %v4692_v36, %v3856_v15 }
 0xadd   :  { %v3880_v22 = vadd.f32 %v3879_v30, %v3857_v26 }
 0xadf   :  { %v3903_v59 = vadd.f32 %v3902_v39, %v3880_v22 }
 0xae1   :  { %v3926_v3 = vadd.f32 %v3925_v37, %v3903_v59 }
 0xaeb   :  { %v3882_v43 = vpop.f32.mrf.mxu0 }
 0xaec   :  { %v3905_v58 = vpop.f32.mrf.mxu1 }
 0xaf3   :  { %v3971_v54 = vpop.f32.mrf.mxu0 }
 0xaf4   :  { %v3994_v32 = vpop.f32.mrf.mxu1 }
 0xaf7   :  { %v3859_v57 = vpop.f32.mrf.mxu3 }
 0xaf8   :  { %v3928_v34 = vpop.f32.mrf.mxu2  ;;  %v3860_v9 = vadd.f32 %v4692_v36, %v3859_v57 }
 0xafa   :  { %v3883_v10 = vadd.f32 %v3882_v43, %v3860_v9 }
 0xafc   :  { %v3974_v60 = vpop.f32.mrf.mxu0  ;;  %v3906_v12 = vadd.f32 %v3905_v58, %v3883_v10  ;;  %v4263_v10 = vld [vmem:[%s7920_s11] sm:$0xff] }
 0xafd   :  { %v3997_v46 = vpop.f32.mrf.mxu1  ;;  %4291 = vmatpush.msrb.mxu3 %v4263_v10 }
 0xafe   :  { %v3929_v33 = vadd.f32 %v3928_v34, %v3906_v12 }
 0xaff   :  { %v3948_v23 = vpop.f32.mrf.mxu3 }
 0xb00   :  { %v4017_v62 = vpop.f32.mrf.mxu2  ;;  %v3949_v40 = vadd.f32 %v3948_v23, %v3926_v3 }
 0xb02   :  { %v3972_v25 = vadd.f32 %v3971_v54, %v3949_v40 }
 0xb04   :  { %v3995_v49 = vadd.f32 %v3994_v32, %v3972_v25  ;;  %v4265_v25 = vld [vmem:[%s7910_s1] sm:$0x3] }
 0xb06   :  { %v4063_v29 = vpop.f32.mrf.mxu0  ;;  %v4018_v14 = vadd.f32 %v4017_v62, %v3995_v49 }
 0xb07   :  { %v4086_v28 = vpop.f32.mrf.mxu1 }
 0xb09   :  { %v3951_v42 = vpop.f32.mrf.mxu3 }
 0xb0a   :  { %v4020_v55 = vpop.f32.mrf.mxu2  ;;  %v3952_v35 = vadd.f32 %v3951_v42, %v3929_v33 }
 0xb0c   :  { %v3975_v16 = vadd.f32 %v3974_v60, %v3952_v35 }
 0xb0e   :  { %v3998_v53 = vadd.f32 %v3997_v46, %v3975_v16 }
 0xb10   :  { %v4066_v7 = vpop.f32.mrf.mxu0  ;;  %v4021_v63 = vadd.f32 %v4020_v55, %v3998_v53 }
 0xb11   :  { %v4089_v19 = vpop.f32.mrf.mxu1 }
 0xb13   :  { %v4040_v13 = vpop.f32.mrf.mxu3 }
 0xb14   :  { %v4109_v4 = vpop.f32.mrf.mxu2  ;;  %v4041_v52 = vadd.f32 %v4040_v13, %v4018_v14 }
 0xb16   :  { %v4064_v51 = vadd.f32 %v4063_v29, %v4041_v52  ;;  %v4872_v29 = vmov 0  }
 0xb17   :  { %4686 = vset.pattern.permute.xlu0 %v4872_v29 }
 0xb18   :  { %v4087_v41 = vadd.f32 %v4086_v28, %v4064_v51 }
 0xb1a   :  { %v4110_v20 = vadd.f32 %v4109_v4, %v4087_v41  ;;  %v4155_v2 = vpop.f32.mrf.mxu0 }
 0xb1b   :  { %v4178_v45 = vpop.f32.mrf.mxu1 }
 0xb1d   :  { %v4043_v24 = vpop.f32.mrf.mxu3 }
 0xb1e   :  { %v4112_v61 = vpop.f32.mrf.mxu2  ;;  %v4044_v48 = vadd.f32 %v4043_v24, %v4021_v63 }
 0xb20   :  { %v4067_v0 = vadd.f32 %v4066_v7, %v4044_v48 }
 0xb22   :  { %v4090_v1 = vadd.f32 %v4089_v19, %v4067_v0  ;;  %v4158_v18 = vpop.f32.mrf.mxu0 }
 0xb23   :  { %v4181_v15 = vpop.f32.mrf.mxu1 }
 0xb24   :  { %v4113_v17 = vadd.f32 %v4112_v61, %v4090_v1 }
 0xb26   :  { %v4132_v56 = vpop.f32.mrf.mxu3 }
 0xb27   :  { %v4133_v38 = vadd.f32 %v4132_v56, %v4110_v20  ;;  %v4201_v5 = vpop.f32.mrf.mxu2  ;;  %v4264_v56 = vld [vmem:[%s7920_s11 + $0x8] sm:$0x3] }
 0xb29   :  { %v4156_v21 = vadd.f32 %v4155_v2, %v4133_v38  ;;  %v4271_v38 = vperm.slane %v4264_v56, 0 }
 0xb2b   :  { %v4179_v50 = vadd.f32 %v4178_v45, %v4156_v21  ;;  %v4296_v21 = vperm.slane %v4264_v56, 1 }
 0xb2d   :  { %v4202_v27 = vadd.f32 %v4201_v5, %v4179_v50 }
 0xb2e   :  { %v4135_v47 = vpop.f32.mrf.mxu3 }
 0xb2f   :  { %v4136_v11 = vadd.f32 %v4135_v47, %v4113_v17  ;;  %v4207_v44 = vadd.f32 %v4202_v27, %v6952_v6  ;;  %v4204_v43 = vpop.f32.mrf.mxu2 }
 0xb31   :  { %v4159_v30 = vadd.f32 %v4158_v18, %v4136_v11  ;;  %v4209_v39 = vsel %vm86_vm2, %v4207_v44, 0.0 }
 0xb32   :  { %4210 = vadd.xlane.f32.xlu1 %v4209_v39 }
 0xb33   :  { %v4182_v37 = vadd.f32 %v4181_v15, %v4159_v30 }
 0xb35   :  { %v4205_v58 = vadd.f32 %v4204_v43, %v4182_v37 }
 0xb37   :  { %v4208_v57 = vadd.f32 %v4205_v58, %v6982_v31 }
 0xb39   :  { %v4212_v34 = vsel %vm86_vm2, %v4208_v57, 0.0 }
 0xb3a   :  { %4213 = vadd.xlane.f32.xlu0 %v4212_v34 }
 0xb4e   :  { %4268 = vperm.xlu0 %4686, %v4265_v25  }
 0xba5   :  { %v4211_v36 = vpop.xlane.xlu1 %4210 }
 0xba6   :  { %v4215_v26 = vmul.f32 %v4211_v36, %v5435_v8 }
 0xba8   :  { %v4217_v54 = vsub.f32 %v4207_v44, %v4215_v26 }
 0xbaa   :  { %v4219_v23 = vmul.f32 %v4217_v54, %v4217_v54 }
 0xbac   :  { %v4221_v6 = vsel %vm86_vm2, %v4219_v23, 0.0 }
 0xbad   :  { %4222 = vadd.xlane.f32.xlu2 %v4221_v6  ;;  %v4214_v32 = vpop.xlane.xlu0 %4213 }
 0xbae   :  { %v4216_v22 = vmul.f32 %v4214_v32, %v5435_v8 }
 0xbb0   :  { %v4218_v62 = vsub.f32 %v4208_v57, %v4216_v22 }
 0xbb2   :  { %v4220_v59 = vmul.f32 %v4218_v62, %v4218_v62 }
 0xbb4   :  { %v4224_v9 = vsel %vm86_vm2, %v4220_v59, 0.0 }
 0xbb5   :  { %4225 = vadd.xlane.f32.xlu1 %v4224_v9 }
 0xbc0   :  { %v4269_v45 = vpop.permute.xlu0 %4268 }
 0xbc1   :  { %v4272_v1 = vmul.f32 %v4271_v38, %v4269_v45 }
 0xc20   :  { %v4223_v31 = vpop.xlane.xlu2 %4222 }
 0xc21   :  { %v4227_v60 = vmul.f32 %v4223_v31, %v5435_v8 }
 0xc23   :  { %v4229_v3 = vadd.f32 1e-05, %v4227_v60 }
 0xc25   :  { %4835 = vrsqrt.f32 %v4229_v3  ;;  %vm4237_vm10 = vweird.f32 %v4229_v3 }
 0xc28   :  { %v4226_v42 = vpop.xlane.xlu1 %4225 }
 0xc29   :  { %v4228_v46 = vmul.f32 %v4226_v42, %v5435_v8  ;;  %v4840_v8 = vld [vmem:[%s7919_s10 + $0x4] sm:$0xf] }
 0xc2a   :  { %v4253_v14 = vperm.slane %v4840_v8, 2  ;;  %v4256_v53 = vperm.slane %v4840_v8, 3 }
 0xc2b   :  { %v4836_v40 = vpop.eup %4835  ;;  %v4230_v55 = vadd.f32 1e-05, %v4228_v46 }
 0xc2c   :  { %v4232_v12 = vmul.f32 %v4836_v40, %v4229_v3  ;;  %vm4238_vm9 = vweird.f32 %v4836_v40 }
 0xc2d   :  { %4837 = vrsqrt.f32 %v4230_v55  ;;  %vm4239_vm11 = vmor %vm4237_vm10, %vm4238_vm9  ;;  %vm4247_vm14 = vweird.f32 %v4230_v55 }
 0xc2e   :  { %v4233_v33 = vmul.f32 %v4836_v40, %v4232_v12 }
 0xc30   :  { %v4234_v49 = vmul.f32 0.5, %v4233_v33 }
 0xc32   :  { %v4235_v35 = vsub.f32 1.5, %v4234_v49 }
 0xc33   :  { %v4838_v13 = vpop.eup %4837 }
 0xc34   :  { %v4236_v28 = vmul.f32 %v4836_v40, %v4235_v35  ;;  %v4242_v4 = vmul.f32 %v4838_v13, %v4230_v55  ;;  %vm4248_vm13 = vweird.f32 %v4838_v13 }
 0xc35   :  { %vm4249_vm15 = vmor %vm4247_vm14, %vm4248_vm13 }
 0xc36   :  { %v4240_v16 = vsel %vm4239_vm11, %v4836_v40, %v4236_v28  ;;  %v4243_v52 = vmul.f32 %v4838_v13, %v4242_v4 }
 0xc37   :  { %v4251_v7 = vmul.f32 %v4240_v16, %v4217_v54 }
 0xc38   :  { %v4244_v51 = vmul.f32 0.5, %v4243_v52 }
 0xc39   :  { %v4254_v24 = vmul.f32 %v4253_v14, %v4251_v7 }
 0xc3a   :  { %v4245_v19 = vsub.f32 1.5, %v4244_v51 }
 0xc3b   :  { %v4257_v63 = vadd.f32 %v4256_v53, %v4254_v24 }
 0xc3c   :  { %v4246_v61 = vmul.f32 %v4838_v13, %v4245_v19 }
 0xc3d   :  { %4259 = vst.msk [vmem:[#allocation2] sm:$0xff] %vm86_vm2, %v4257_v63 }
 0xc3e   :  { %v4250_v41 = vsel %vm4249_vm15, %v4838_v13, %v4246_v61 }
 0xc3f   :  { %v4252_v48 = vmul.f32 %v4250_v41, %v4218_v62 }
 0xc41   :  { %v4255_v20 = vmul.f32 %v4253_v14, %v4252_v48 }
 0xc43   :  { %v4258_v0 = vadd.f32 %v4256_v53, %v4255_v20 }
 0xc45   :  { %4260 = vst.msk [vmem:[#allocation2 + $0x8] sm:$0xff] %vm86_vm2, %v4258_v0 }
 0xc4c   :  { %v4262_v2 = vld [vmem:[#allocation2 + $0x7] ss:$8 sm:$0x3] }
 0xc4d   :  { %4678 = vmatmul.msk.f32.vlgmr.msrb.gmra.mxu3 %vm86_vm2, %v4262_v2 }
 0xcd0   :  { %v4293_v5 = vpop.f32.mrf.mxu3 }
 0xcd1   :  { %v4294_v50 = vadd.f32 %v4293_v5, %v4272_v1 }
 0xcd3   :  { %v4297_v17 = vadd.f32 %v4296_v21, %v4294_v50 }
 0xcd5   :  { %4298 = vst [vmem:[#allocation3] sm:$0x3] %v4297_v17 }
 0xcd6   :  { %4309 = dma.vmem_to_hbm [thread:$0]  %s4305_s15, 32, %s4307_s19, [#allocation4]  }
 0xcd7   :  { %4865 = dma.done.wait [#allocation4], 32  }
 0xcd8   :  { %4866 = vsyncadd [#allocation4], 4294967264 }
 0xcd9   :  { %4314 = vsyncpa [#allocation4], 1 }

</bundles_post_ra>
